<compile_context>
chip_gen: v7x
topology: tpu7x:2x2x1
jax: 0.10.0
libtpu: 0.0.40
codegen_flags: <defaults>
</compile_context>

<pallas_src>
import functools
import math

import jax
import jax.numpy as jnp
from jax.experimental import pallas as pl
from jax.experimental.pallas import tpu as pltpu


# ----------------------------- config (small) --------------------------------
VOCAB = 1000
MAX_POS = 64
HIDDEN = 128          # distilbert: 768
N_HEADS = 4           # distilbert: 12
HEAD_DIM = HIDDEN // N_HEADS
FFN = 4 * HIDDEN      # distilbert: 3072
N_LAYERS = 2          # distilbert: 6
NUM_LABELS = 4        # ag_news has 4 labels
LANE = 128
EPS = 1e-12           # DistilBERT LayerNorm eps


def _layernorm(x, g, b, eps):
    mean = jnp.mean(x, axis=-1, keepdims=True)
    xc = x - mean
    var = jnp.mean(xc * xc, axis=-1, keepdims=True)
    return xc * jax.lax.rsqrt(var + eps) * g + b


# ------------------------------ fused encoder kernel --------------------------
def _encoder_kernel(emb_ref, bias_ref, embg_ref, embb_ref,
                    wqkv_ref, bqkv_ref, wo_ref, bo_ref, ln1g_ref, ln1b_ref,
                    w1_ref, b1_ref, w2_ref, b2_ref, ln2g_ref, ln2b_ref,
                    clsw_ref, clsb_ref,
                    logits_ref,
                    x_scr, ctx_scr, *, B, S, eps):
    """One grid step == one transformer layer.  Activations stay in x_scr (VMEM)
    across layers; per-layer weights arrive via the BlockSpec pipeline."""
    l = pl.program_id(0)
    n_layers = pl.num_programs(0)

    # ---- layer 0: embedding LayerNorm (residual input of the first layer) ----
    @pl.when(l == 0)
    def _():
        x_scr[...] = _layernorm(emb_ref[...], embg_ref[...], embb_ref[...], eps)
        logits_ref[...] = jnp.zeros_like(logits_ref)

    x = x_scr[...]                                           # (B*S, H) f32

    # ---------------------------- attention sublayer --------------------------
    qkv = jnp.dot(x.astype(jnp.bfloat16), wqkv_ref[0],
                  preferred_element_type=jnp.float32) + bqkv_ref[0]   # (B*S, 3H)
    qkv16 = qkv.astype(jnp.bfloat16)                         # single cast

    for b in range(B):                                       # static unroll
        r0, r1 = b * S, (b + 1) * S
        bias_full = jnp.broadcast_to(bias_ref[b], (S, S))    # hoisted per batch
        for h in range(N_HEADS):                             # static unroll
            lo = h * HEAD_DIM
            q = qkv16[r0:r1, lo:lo + HEAD_DIM]               # scale folded into wq
            k = qkv16[r0:r1, HIDDEN + lo:HIDDEN + lo + HEAD_DIM]
            v = qkv16[r0:r1, 2 * HIDDEN + lo:2 * HIDDEN + lo + HEAD_DIM]
            s = jnp.dot(q, k.T, preferred_element_type=jnp.float32) + bias_full
            s = s - jnp.max(s, axis=-1, keepdims=True)
            p = jnp.exp(s)
            p = p * pl.reciprocal(jnp.sum(p, axis=-1, keepdims=True), approx=True)
            # write head context at its lane offset -> output proj stays K=128
            ctx_scr[r0:r1, lo:lo + HEAD_DIM] = jnp.dot(
                p.astype(jnp.bfloat16), v, preferred_element_type=jnp.float32)

    attn = jnp.dot(ctx_scr[...].astype(jnp.bfloat16), wo_ref[0],
                   preferred_element_type=jnp.float32) + bo_ref[0]
    x = _layernorm(attn + x, ln1g_ref[0], ln1b_ref[0], eps)

    # ------------------------------- FFN sublayer ------------------------------
    h1 = jnp.dot(x.astype(jnp.bfloat16), w1_ref[0],
                 preferred_element_type=jnp.float32) + b1_ref[0]
    # TODO(synk): HF DistilBERT uses exact erf-GELU; tanh approximation is used
    # here for a guaranteed Mosaic lowering (~1e-3 relative difference).
    h1 = jax.nn.gelu(h1, approximate=True)
    h2 = jnp.dot(h1.astype(jnp.bfloat16), w2_ref[0],
                 preferred_element_type=jnp.float32) + b2_ref[0]
    x = _layernorm(h2 + x, ln2g_ref[0], ln2b_ref[0], eps)

    x_scr[...] = x                                           # carry to next layer

    # ---- last layer: classifier head on the CLS rows (lane-padded output) ----
    @pl.when(l == n_layers - 1)
    def _():
        cls = jnp.concatenate([x_scr[b * S:b * S + 1, :] for b in range(B)], axis=0)
        logits_ref[...] = jnp.dot(cls.astype(jnp.bfloat16), clsw_ref[...],
                                  preferred_element_type=jnp.float32) + clsb_ref[...]


def encoder_forward(emb, bias, params, *, B, S):
    """emb: (B*S, H) f32 word+pos embeddings; bias: (B, 1, S) additive mask."""
    BS, H = emb.shape
    const2 = lambda l: (0, 0)
    const3 = lambda l: (0, 0, 0)
    layer3 = lambda l: (l, 0, 0)

    logits_pad = pl.pallas_call(
        functools.partial(_encoder_kernel, B=B, S=S, eps=EPS),
        out_shape=jax.ShapeDtypeStruct((B, LANE), jnp.float32),
        grid=(N_LAYERS,),
        in_specs=[
            pl.BlockSpec((BS, H), const2),            # emb
            pl.BlockSpec((B, 1, S), const3),          # mask bias
            pl.BlockSpec((1, H), const2),             # emb ln gamma
            pl.BlockSpec((1, H), const2),             # emb ln beta
            pl.BlockSpec((1, H, 3 * H), layer3),      # w_qkv (stacked per layer)
            pl.BlockSpec((1, 1, 3 * H), layer3),      # b_qkv
            pl.BlockSpec((1, H, H), layer3),          # w_o
            pl.BlockSpec((1, 1, H), layer3),          # b_o
            pl.BlockSpec((1, 1, H), layer3),          # ln1 gamma
            pl.BlockSpec((1, 1, H), layer3),          # ln1 beta
            pl.BlockSpec((1, H, FFN), layer3),        # w1
            pl.BlockSpec((1, 1, FFN), layer3),        # b1
            pl.BlockSpec((1, FFN, H), layer3),        # w2
            pl.BlockSpec((1, 1, H), layer3),          # b2
            pl.BlockSpec((1, 1, H), layer3),          # ln2 gamma
            pl.BlockSpec((1, 1, H), layer3),          # ln2 beta
            pl.BlockSpec((H, LANE), const2),          # classifier weight (lane-padded)
            pl.BlockSpec((1, LANE), const2),          # classifier bias (lane-padded)
        ],
        out_specs=pl.BlockSpec((B, LANE), const2),    # resident across layers
        scratch_shapes=[
            pltpu.VMEM((BS, H), jnp.float32),         # activation carry
            pltpu.VMEM((BS, H), jnp.float32),         # per-head context assembly
        ],
        compiler_params=pltpu.CompilerParams(dimension_semantics=("arbitrary",)),
    )(emb, bias, params["emb_ln_g"], params["emb_ln_b"],
      params["w_qkv"], params["b_qkv"], params["w_o"], params["b_o"],
      params["ln1_g"], params["ln1_b"],
      params["w1"], params["b1"], params["w2"], params["b2"],
      params["ln2_g"], params["ln2_b"],
      params["cls_w_pad"], params["cls_b_pad"])
    return logits_pad[:, :NUM_LABELS]


# ------------------------------ model (glue in JAX) ---------------------------
def text_classifier_forward(params, input_ids, attention_mask):
    B, S = input_ids.shape
    # TODO(synk): vocab embedding gather stays in plain JAX (no clean Pallas
    # gather equivalent worth a kernel at this scale).
    word = jnp.take(params["word_emb"], input_ids, axis=0)            # (B, S, H)
    pos = jnp.take(params["pos_emb"], jnp.arange(S), axis=0)[None]    # (1, S, H)
    emb = (word + pos).reshape(B * S, HIDDEN)
    # Additive key-side mask bias, one per batch element (no per-head replication).
    bias = ((1.0 - attention_mask.astype(jnp.float32)) * -1e9).reshape(B, 1, S)
    return encoder_forward(emb, bias, params, B=B, S=S)


# ------------------------------ deterministic init ----------------------------
def init_params(key):
    def nrm(k, shape, scale=0.02):
        return scale * jax.random.normal(k, shape, jnp.float32)

    qscale = 1.0 / math.sqrt(HEAD_DIM)
    keys = iter(jax.random.split(key, 3 + 6 * N_LAYERS))

    params = {
        "word_emb": nrm(next(keys), (VOCAB, HIDDEN)),
        "pos_emb": nrm(next(keys), (MAX_POS, HIDDEN)),
        "emb_ln_g": jnp.ones((1, HIDDEN), jnp.float32),
        "emb_ln_b": jnp.zeros((1, HIDDEN), jnp.float32),
    }

    # Classifier head padded to a full 128-lane output (sliced back after the kernel).
    cls_w = nrm(next(keys), (HIDDEN, NUM_LABELS))
    params["cls_w_pad"] = (jnp.zeros((HIDDEN, LANE), jnp.bfloat16)
                           .at[:, :NUM_LABELS].set(cls_w.astype(jnp.bfloat16)))
    params["cls_b_pad"] = jnp.zeros((1, LANE), jnp.float32)

    wqkv, bqkv, wo, bo, ln1g, ln1b = [], [], [], [], [], []
    w1s, b1s, w2s, b2s, ln2g, ln2b = [], [], [], [], [], []
    for _ in range(N_LAYERS):
        wq = nrm(next(keys), (HIDDEN, HIDDEN))
        wk = nrm(next(keys), (HIDDEN, HIDDEN))
        wv = nrm(next(keys), (HIDDEN, HIDDEN))
        wo_l = nrm(next(keys), (HIDDEN, HIDDEN))
        w1 = nrm(next(keys), (HIDDEN, FFN))
        w2 = nrm(next(keys), (FFN, HIDDEN))
        # Fused QKV weight (bf16) with 1/sqrt(head_dim) folded into the Q slice.
        wqkv.append(jnp.concatenate([wq * qscale, wk, wv], axis=1).astype(jnp.bfloat16))
        bqkv.append(jnp.zeros((1, 3 * HIDDEN), jnp.float32))
        wo.append(wo_l.astype(jnp.bfloat16))
        bo.append(jnp.zeros((1, HIDDEN), jnp.float32))
        ln1g.append(jnp.ones((1, HIDDEN), jnp.float32))
        ln1b.append(jnp.zeros((1, HIDDEN), jnp.float32))
        w1s.append(w1.astype(jnp.bfloat16))
        b1s.append(jnp.zeros((1, FFN), jnp.float32))
        w2s.append(w2.astype(jnp.bfloat16))
        b2s.append(jnp.zeros((1, HIDDEN), jnp.float32))
        ln2g.append(jnp.ones((1, HIDDEN), jnp.float32))
        ln2b.append(jnp.zeros((1, HIDDEN), jnp.float32))

    params.update({
        "w_qkv": jnp.stack(wqkv), "b_qkv": jnp.stack(bqkv),
        "w_o": jnp.stack(wo), "b_o": jnp.stack(bo),
        "ln1_g": jnp.stack(ln1g), "ln1_b": jnp.stack(ln1b),
        "w1": jnp.stack(w1s), "b1": jnp.stack(b1s),
        "w2": jnp.stack(w2s), "b2": jnp.stack(b2s),
        "ln2_g": jnp.stack(ln2g), "ln2_b": jnp.stack(ln2b),
    })
    return params


# ------------------------------------ main -------------------------------------
if __name__ == "__main__":
    B, S = 2, 16
    key = jax.random.PRNGKey(0)
    k_ids, k_params = jax.random.split(key)

    input_ids = jax.random.randint(k_ids, (B, S), 0, VOCAB, dtype=jnp.int32)
    # second example has 4 padding positions at the end
    lengths = jnp.array([S, S - 4], jnp.int32)
    attention_mask = (jnp.arange(S)[None, :] < lengths[:, None]).astype(jnp.int32)

    params = init_params(k_params)

    fwd = jax.jit(text_classifier_forward)
    logits = fwd(params, input_ids, attention_mask)
    jax.block_until_ready(logits)

    assert logits.shape == (B, NUM_LABELS), logits.shape
    assert bool(jnp.all(jnp.isfinite(logits)))
    print("KERNEL_OK")
</pallas_src>

<mosaic_0001>
module attributes {stable_mosaic.version = 11 : i64} {
  func.func @_encoder_kernel(%arg0: i32, %arg1: memref<32x128xf32, #tpu.memory_space<vmem>>, %arg2: memref<2x1x16xf32, #tpu.memory_space<vmem>>, %arg3: memref<1x128xf32, #tpu.memory_space<vmem>>, %arg4: memref<1x128xf32, #tpu.memory_space<vmem>>, %arg5: memref<1x128x384xbf16, #tpu.memory_space<vmem>>, %arg6: memref<1x1x384xf32, #tpu.memory_space<vmem>>, %arg7: memref<1x128x128xbf16, #tpu.memory_space<vmem>>, %arg8: memref<1x1x128xf32, #tpu.memory_space<vmem>>, %arg9: memref<1x1x128xf32, #tpu.memory_space<vmem>>, %arg10: memref<1x1x128xf32, #tpu.memory_space<vmem>>, %arg11: memref<1x128x512xbf16, #tpu.memory_space<vmem>>, %arg12: memref<1x1x512xf32, #tpu.memory_space<vmem>>, %arg13: memref<1x512x128xbf16, #tpu.memory_space<vmem>>, %arg14: memref<1x1x128xf32, #tpu.memory_space<vmem>>, %arg15: memref<1x1x128xf32, #tpu.memory_space<vmem>>, %arg16: memref<1x1x128xf32, #tpu.memory_space<vmem>>, %arg17: memref<128x128xbf16, #tpu.memory_space<vmem>>, %arg18: memref<1x128xf32, #tpu.memory_space<vmem>>, %arg19: memref<2x128xf32, #tpu.memory_space<vmem>>, %arg20: memref<32x128xf32, #tpu.memory_space<vmem>>, %arg21: memref<32x128xf32, #tpu.memory_space<vmem>>) attributes {dimension_semantics = [#tpu.dimension_semantics<arbitrary>], iteration_bounds = array<i64: 2>, scalar_prefetch = 0 : i64, scratch_operands = 2 : i64, tpu.core_type = #tpu.core_type<tc>, window_params = [{pipeline_mode = #tpu.pipeline_mode<synchronous>, transform_indices = @transform_0, window_bounds = array<i64: 32, 128>}, {pipeline_mode = #tpu.pipeline_mode<synchronous>, transform_indices = @transform_1, window_bounds = array<i64: 2, 1, 16>}, {pipeline_mode = #tpu.pipeline_mode<synchronous>, transform_indices = @transform_2, window_bounds = array<i64: 1, 128>}, {pipeline_mode = #tpu.pipeline_mode<synchronous>, transform_indices = @transform_3, window_bounds = array<i64: 1, 128>}, {transform_indices = @transform_4, window_bounds = array<i64: 1, 128, 384>}, {transform_indices = @transform_5, window_bounds = array<i64: 1, 1, 384>}, {transform_indices = @transform_6, window_bounds = array<i64: 1, 128, 128>}, {transform_indices = @transform_7, window_bounds = array<i64: 1, 1, 128>}, {transform_indices = @transform_8, window_bounds = array<i64: 1, 1, 128>}, {transform_indices = @transform_9, window_bounds = array<i64: 1, 1, 128>}, {transform_indices = @transform_10, window_bounds = array<i64: 1, 128, 512>}, {transform_indices = @transform_11, window_bounds = array<i64: 1, 1, 512>}, {transform_indices = @transform_12, window_bounds = array<i64: 1, 512, 128>}, {transform_indices = @transform_13, window_bounds = array<i64: 1, 1, 128>}, {transform_indices = @transform_14, window_bounds = array<i64: 1, 1, 128>}, {transform_indices = @transform_15, window_bounds = array<i64: 1, 1, 128>}, {pipeline_mode = #tpu.pipeline_mode<synchronous>, transform_indices = @transform_16, window_bounds = array<i64: 128, 128>}, {pipeline_mode = #tpu.pipeline_mode<synchronous>, transform_indices = @transform_17, window_bounds = array<i64: 1, 128>}, {pipeline_mode = #tpu.pipeline_mode<synchronous>, transform_indices = @transform_18, window_bounds = array<i64: 2, 128>}]} {
    %c0_i32 = arith.constant 0 : i32
    %0 = arith.cmpi eq, %arg0, %c0_i32 : i32
    %1 = arith.extui %0 : i1 to i32
    %c0_i32_0 = arith.constant 0 : i32
    %2 = arith.cmpi ne, %1, %c0_i32_0 : i32
    scf.if %2 {
      %c0_109 = arith.constant 0 : index
      %c0_110 = arith.constant 0 : index
      %265 = vector.load %arg1[%c0_109, %c0_110] : memref<32x128xf32, #tpu.memory_space<vmem>>, vector<32x128xf32>
      %c0_111 = arith.constant 0 : index
      %c0_112 = arith.constant 0 : index
      %266 = vector.load %arg3[%c0_111, %c0_112] : memref<1x128xf32, #tpu.memory_space<vmem>>, vector<1x128xf32>
      %c0_113 = arith.constant 0 : index
      %c0_114 = arith.constant 0 : index
      %267 = vector.load %arg4[%c0_113, %c0_114] : memref<1x128xf32, #tpu.memory_space<vmem>>, vector<1x128xf32>
      %cst_115 = arith.constant dense<0.000000e+00> : vector<32xf32>
      %268 = vector.multi_reduction <add>, %265, %cst_115 [1] : vector<32x128xf32> to vector<32xf32>
      %269 = vector.shape_cast %268 : vector<32xf32> to vector<32x1xf32>
      %cst_116 = arith.constant 1.280000e+02 : f32
      %270 = vector.broadcast %cst_116 : f32 to vector<32x1xf32>
      %271 = arith.divf %269, %270 : vector<32x1xf32>
      %272 = vector.broadcast %271 : vector<32x1xf32> to vector<32x128xf32>
      %273 = arith.subf %265, %272 : vector<32x128xf32>
      %274 = arith.mulf %273, %273 : vector<32x128xf32>
      %cst_117 = arith.constant dense<0.000000e+00> : vector<32xf32>
      %275 = vector.multi_reduction <add>, %274, %cst_117 [1] : vector<32x128xf32> to vector<32xf32>
      %276 = vector.shape_cast %275 : vector<32xf32> to vector<32x1xf32>
      %cst_118 = arith.constant 1.280000e+02 : f32
      %277 = vector.broadcast %cst_118 : f32 to vector<32x1xf32>
      %278 = arith.divf %276, %277 : vector<32x1xf32>
      %cst_119 = arith.constant 9.99999996E-13 : f32
      %279 = vector.broadcast %cst_119 : f32 to vector<32x1xf32>
      %280 = arith.addf %278, %279 : vector<32x1xf32>
      %281 = math.rsqrt %280 : vector<32x1xf32>
      %282 = vector.broadcast %281 : vector<32x1xf32> to vector<32x128xf32>
      %283 = arith.mulf %273, %282 : vector<32x128xf32>
      %284 = vector.broadcast %266 : vector<1x128xf32> to vector<32x128xf32>
      %285 = arith.mulf %283, %284 : vector<32x128xf32>
      %286 = vector.broadcast %267 : vector<1x128xf32> to vector<32x128xf32>
      %287 = arith.addf %285, %286 : vector<32x128xf32>
      %c0_120 = arith.constant 0 : index
      %c0_121 = arith.constant 0 : index
      %288 = vector.load %arg20[%c0_120, %c0_121] : memref<32x128xf32, #tpu.memory_space<vmem>>, vector<32x128xf32>
      tpu.vector_store %arg20[%c0_120, %c0_121], %287 {strides = array<i32>} : memref<32x128xf32, #tpu.memory_space<vmem>>, vector<32x128xf32>,
      %cst_122 = arith.constant 0.000000e+00 : f32
      %289 = vector.broadcast %cst_122 : f32 to vector<2x128xf32>
      %c0_123 = arith.constant 0 : index
      %c0_124 = arith.constant 0 : index
      %290 = vector.load %arg19[%c0_123, %c0_124] : memref<2x128xf32, #tpu.memory_space<vmem>>, vector<2x128xf32>
      tpu.vector_store %arg19[%c0_123, %c0_124], %289 {strides = array<i32>} : memref<2x128xf32, #tpu.memory_space<vmem>>, vector<2x128xf32>,
    } else {
    }
    %c0 = arith.constant 0 : index
    %c0_1 = arith.constant 0 : index
    %3 = vector.load %arg20[%c0, %c0_1] : memref<32x128xf32, #tpu.memory_space<vmem>>, vector<32x128xf32>
    %4 = arith.truncf %3 : vector<32x128xf32> to vector<32x128xbf16>
    %c0_2 = arith.constant 0 : index
    %c0_3 = arith.constant 0 : index
    %c0_4 = arith.constant 0 : index
    %5 = vector.load %arg5[%c0_2, %c0_3, %c0_4] : memref<1x128x384xbf16, #tpu.memory_space<vmem>>, vector<1x128x384xbf16>
    %6 = vector.shape_cast %5 : vector<1x128x384xbf16> to vector<128x384xbf16>
    %cst = arith.constant dense<0.000000e+00> : vector<32x384xf32>
    %7 = tpu.matmul %4, %6, %cst {dimension_numbers = #tpu.dot_dimension_numbers<[1], [0], [0], [1], [0, 0, 1, 1], [], []>} : vector<32x128xbf16>, vector<128x384xbf16>, vector<32x384xf32> -> vector<32x384xf32>
    %c0_5 = arith.constant 0 : index
    %c0_6 = arith.constant 0 : index
    %c0_7 = arith.constant 0 : index
    %8 = vector.load %arg6[%c0_5, %c0_6, %c0_7] : memref<1x1x384xf32, #tpu.memory_space<vmem>>, vector<1x1x384xf32>
    %9 = vector.shape_cast %8 : vector<1x1x384xf32> to vector<1x384xf32>
    %10 = vector.broadcast %9 : vector<1x384xf32> to vector<32x384xf32>
    %11 = arith.addf %7, %10 : vector<32x384xf32>
    %12 = arith.truncf %11 : vector<32x384xf32> to vector<32x384xbf16>
    %c0_8 = arith.constant 0 : index
    %c0_9 = arith.constant 0 : index
    %c0_10 = arith.constant 0 : index
    %13 = vector.load %arg2[%c0_8, %c0_9, %c0_10] : memref<2x1x16xf32, #tpu.memory_space<vmem>>, vector<1x1x16xf32>
    %14 = vector.shape_cast %13 : vector<1x1x16xf32> to vector<1x16xf32>
    %15 = vector.shape_cast %14 : vector<1x16xf32> to vector<1x16xf32>
    %16 = vector.broadcast %15 : vector<1x16xf32> to vector<16x16xf32>
    %17 = vector.extract_strided_slice %12 {offsets = [0, 0], sizes = [16, 32], strides = [1, 1]} : vector<32x384xbf16> to vector<16x32xbf16>
    %18 = vector.extract_strided_slice %12 {offsets = [0, 128], sizes = [16, 32], strides = [1, 1]} : vector<32x384xbf16> to vector<16x32xbf16>
    %19 = vector.extract_strided_slice %12 {offsets = [0, 256], sizes = [16, 32], strides = [1, 1]} : vector<32x384xbf16> to vector<16x32xbf16>
    %20 = tpu.transpose %18, [1, 0] : vector<16x32xbf16> -> vector<32x16xbf16>
    %cst_11 = arith.constant dense<0.000000e+00> : vector<16x16xf32>
    %21 = tpu.matmul %17, %20, %cst_11 {dimension_numbers = #tpu.dot_dimension_numbers<[1], [0], [0], [1], [0, 0, 1, 1], [], []>} : vector<16x32xbf16>, vector<32x16xbf16>, vector<16x16xf32> -> vector<16x16xf32>
    %22 = arith.addf %21, %16 : vector<16x16xf32>
    %cst_12 = arith.constant dense<0xFF800000> : vector<16xf32>
    %23 = vector.multi_reduction <maximumf>, %22, %cst_12 [1] : vector<16x16xf32> to vector<16xf32>
    %24 = vector.shape_cast %23 : vector<16xf32> to vector<16x1xf32>
    %25 = vector.broadcast %24 : vector<16x1xf32> to vector<16x16xf32>
    %26 = arith.subf %22, %25 : vector<16x16xf32>
    %27 = math.exp %26 : vector<16x16xf32>
    %cst_13 = arith.constant dense<0.000000e+00> : vector<16xf32>
    %28 = vector.multi_reduction <add>, %27, %cst_13 [1] : vector<16x16xf32> to vector<16xf32>
    %29 = vector.shape_cast %28 : vector<16xf32> to vector<16x1xf32>
    %30 = tpu.reciprocal %29 {approx = true} : vector<16x1xf32> -> vector<16x1xf32>
    %31 = vector.broadcast %30 : vector<16x1xf32> to vector<16x16xf32>
    %32 = arith.mulf %27, %31 : vector<16x16xf32>
    %33 = arith.truncf %32 : vector<16x16xf32> to vector<16x16xbf16>
    %cst_14 = arith.constant dense<0.000000e+00> : vector<16x32xf32>
    %34 = tpu.matmul %33, %19, %cst_14 {dimension_numbers = #tpu.dot_dimension_numbers<[1], [0], [0], [1], [0, 0, 1, 1], [], []>} : vector<16x16xbf16>, vector<16x32xbf16>, vector<16x32xf32> -> vector<16x32xf32>
    %c0_15 = arith.constant 0 : index
    %c0_16 = arith.constant 0 : index
    %35 = vector.load %arg21[%c0_15, %c0_16] : memref<32x128xf32, #tpu.memory_space<vmem>>, vector<16x32xf32>
    tpu.vector_store %arg21[%c0_15, %c0_16], %34 {strides = array<i32>} : memref<32x128xf32, #tpu.memory_space<vmem>>, vector<16x32xf32>,
    %36 = vector.extract_strided_slice %12 {offsets = [0, 32], sizes = [16, 32], strides = [1, 1]} : vector<32x384xbf16> to vector<16x32xbf16>
    %37 = vector.extract_strided_slice %12 {offsets = [0, 160], sizes = [16, 32], strides = [1, 1]} : vector<32x384xbf16> to vector<16x32xbf16>
    %38 = vector.extract_strided_slice %12 {offsets = [0, 288], sizes = [16, 32], strides = [1, 1]} : vector<32x384xbf16> to vector<16x32xbf16>
    %39 = tpu.transpose %37, [1, 0] : vector<16x32xbf16> -> vector<32x16xbf16>
    %cst_17 = arith.constant dense<0.000000e+00> : vector<16x16xf32>
    %40 = tpu.matmul %36, %39, %cst_17 {dimension_numbers = #tpu.dot_dimension_numbers<[1], [0], [0], [1], [0, 0, 1, 1], [], []>} : vector<16x32xbf16>, vector<32x16xbf16>, vector<16x16xf32> -> vector<16x16xf32>
    %41 = arith.addf %40, %16 : vector<16x16xf32>
    %cst_18 = arith.constant dense<0xFF800000> : vector<16xf32>
    %42 = vector.multi_reduction <maximumf>, %41, %cst_18 [1] : vector<16x16xf32> to vector<16xf32>
    %43 = vector.shape_cast %42 : vector<16xf32> to vector<16x1xf32>
    %44 = vector.broadcast %43 : vector<16x1xf32> to vector<16x16xf32>
    %45 = arith.subf %41, %44 : vector<16x16xf32>
    %46 = math.exp %45 : vector<16x16xf32>
    %cst_19 = arith.constant dense<0.000000e+00> : vector<16xf32>
    %47 = vector.multi_reduction <add>, %46, %cst_19 [1] : vector<16x16xf32> to vector<16xf32>
    %48 = vector.shape_cast %47 : vector<16xf32> to vector<16x1xf32>
    %49 = tpu.reciprocal %48 {approx = true} : vector<16x1xf32> -> vector<16x1xf32>
    %50 = vector.broadcast %49 : vector<16x1xf32> to vector<16x16xf32>
    %51 = arith.mulf %46, %50 : vector<16x16xf32>
    %52 = arith.truncf %51 : vector<16x16xf32> to vector<16x16xbf16>
    %cst_20 = arith.constant dense<0.000000e+00> : vector<16x32xf32>
    %53 = tpu.matmul %52, %38, %cst_20 {dimension_numbers = #tpu.dot_dimension_numbers<[1], [0], [0], [1], [0, 0, 1, 1], [], []>} : vector<16x16xbf16>, vector<16x32xbf16>, vector<16x32xf32> -> vector<16x32xf32>
    %c0_21 = arith.constant 0 : index
    %c32 = arith.constant 32 : index
    %54 = vector.load %arg21[%c0_21, %c32] : memref<32x128xf32, #tpu.memory_space<vmem>>, vector<16x32xf32>
    tpu.vector_store %arg21[%c0_21, %c32], %53 {strides = array<i32>} : memref<32x128xf32, #tpu.memory_space<vmem>>, vector<16x32xf32>,
    %55 = vector.extract_strided_slice %12 {offsets = [0, 64], sizes = [16, 32], strides = [1, 1]} : vector<32x384xbf16> to vector<16x32xbf16>
    %56 = vector.extract_strided_slice %12 {offsets = [0, 192], sizes = [16, 32], strides = [1, 1]} : vector<32x384xbf16> to vector<16x32xbf16>
    %57 = vector.extract_strided_slice %12 {offsets = [0, 320], sizes = [16, 32], strides = [1, 1]} : vector<32x384xbf16> to vector<16x32xbf16>
    %58 = tpu.transpose %56, [1, 0] : vector<16x32xbf16> -> vector<32x16xbf16>
    %cst_22 = arith.constant dense<0.000000e+00> : vector<16x16xf32>
    %59 = tpu.matmul %55, %58, %cst_22 {dimension_numbers = #tpu.dot_dimension_numbers<[1], [0], [0], [1], [0, 0, 1, 1], [], []>} : vector<16x32xbf16>, vector<32x16xbf16>, vector<16x16xf32> -> vector<16x16xf32>
    %60 = arith.addf %59, %16 : vector<16x16xf32>
    %cst_23 = arith.constant dense<0xFF800000> : vector<16xf32>
    %61 = vector.multi_reduction <maximumf>, %60, %cst_23 [1] : vector<16x16xf32> to vector<16xf32>
    %62 = vector.shape_cast %61 : vector<16xf32> to vector<16x1xf32>
    %63 = vector.broadcast %62 : vector<16x1xf32> to vector<16x16xf32>
    %64 = arith.subf %60, %63 : vector<16x16xf32>
    %65 = math.exp %64 : vector<16x16xf32>
    %cst_24 = arith.constant dense<0.000000e+00> : vector<16xf32>
    %66 = vector.multi_reduction <add>, %65, %cst_24 [1] : vector<16x16xf32> to vector<16xf32>
    %67 = vector.shape_cast %66 : vector<16xf32> to vector<16x1xf32>
    %68 = tpu.reciprocal %67 {approx = true} : vector<16x1xf32> -> vector<16x1xf32>
    %69 = vector.broadcast %68 : vector<16x1xf32> to vector<16x16xf32>
    %70 = arith.mulf %65, %69 : vector<16x16xf32>
    %71 = arith.truncf %70 : vector<16x16xf32> to vector<16x16xbf16>
    %cst_25 = arith.constant dense<0.000000e+00> : vector<16x32xf32>
    %72 = tpu.matmul %71, %57, %cst_25 {dimension_numbers = #tpu.dot_dimension_numbers<[1], [0], [0], [1], [0, 0, 1, 1], [], []>} : vector<16x16xbf16>, vector<16x32xbf16>, vector<16x32xf32> -> vector<16x32xf32>
    %c0_26 = arith.constant 0 : index
    %c64 = arith.constant 64 : index
    %73 = vector.load %arg21[%c0_26, %c64] : memref<32x128xf32, #tpu.memory_space<vmem>>, vector<16x32xf32>
    tpu.vector_store %arg21[%c0_26, %c64], %72 {strides = array<i32>} : memref<32x128xf32, #tpu.memory_space<vmem>>, vector<16x32xf32>,
    %74 = vector.extract_strided_slice %12 {offsets = [0, 96], sizes = [16, 32], strides = [1, 1]} : vector<32x384xbf16> to vector<16x32xbf16>
    %75 = vector.extract_strided_slice %12 {offsets = [0, 224], sizes = [16, 32], strides = [1, 1]} : vector<32x384xbf16> to vector<16x32xbf16>
    %76 = vector.extract_strided_slice %12 {offsets = [0, 352], sizes = [16, 32], strides = [1, 1]} : vector<32x384xbf16> to vector<16x32xbf16>
    %77 = tpu.transpose %75, [1, 0] : vector<16x32xbf16> -> vector<32x16xbf16>
    %cst_27 = arith.constant dense<0.000000e+00> : vector<16x16xf32>
    %78 = tpu.matmul %74, %77, %cst_27 {dimension_numbers = #tpu.dot_dimension_numbers<[1], [0], [0], [1], [0, 0, 1, 1], [], []>} : vector<16x32xbf16>, vector<32x16xbf16>, vector<16x16xf32> -> vector<16x16xf32>
    %79 = arith.addf %78, %16 : vector<16x16xf32>
    %cst_28 = arith.constant dense<0xFF800000> : vector<16xf32>
    %80 = vector.multi_reduction <maximumf>, %79, %cst_28 [1] : vector<16x16xf32> to vector<16xf32>
    %81 = vector.shape_cast %80 : vector<16xf32> to vector<16x1xf32>
    %82 = vector.broadcast %81 : vector<16x1xf32> to vector<16x16xf32>
    %83 = arith.subf %79, %82 : vector<16x16xf32>
    %84 = math.exp %83 : vector<16x16xf32>
    %cst_29 = arith.constant dense<0.000000e+00> : vector<16xf32>
    %85 = vector.multi_reduction <add>, %84, %cst_29 [1] : vector<16x16xf32> to vector<16xf32>
    %86 = vector.shape_cast %85 : vector<16xf32> to vector<16x1xf32>
    %87 = tpu.reciprocal %86 {approx = true} : vector<16x1xf32> -> vector<16x1xf32>
    %88 = vector.broadcast %87 : vector<16x1xf32> to vector<16x16xf32>
    %89 = arith.mulf %84, %88 : vector<16x16xf32>
    %90 = arith.truncf %89 : vector<16x16xf32> to vector<16x16xbf16>
    %cst_30 = arith.constant dense<0.000000e+00> : vector<16x32xf32>
    %91 = tpu.matmul %90, %76, %cst_30 {dimension_numbers = #tpu.dot_dimension_numbers<[1], [0], [0], [1], [0, 0, 1, 1], [], []>} : vector<16x16xbf16>, vector<16x32xbf16>, vector<16x32xf32> -> vector<16x32xf32>
    %c0_31 = arith.constant 0 : index
    %c96 = arith.constant 96 : index
    %92 = vector.load %arg21[%c0_31, %c96] : memref<32x128xf32, #tpu.memory_space<vmem>>, vector<16x32xf32>
    tpu.vector_store %arg21[%c0_31, %c96], %91 {strides = array<i32>} : memref<32x128xf32, #tpu.memory_space<vmem>>, vector<16x32xf32>,
    %c1 = arith.constant 1 : index
    %c0_32 = arith.constant 0 : index
    %c0_33 = arith.constant 0 : index
    %93 = vector.load %arg2[%c1, %c0_32, %c0_33] : memref<2x1x16xf32, #tpu.memory_space<vmem>>, vector<1x1x16xf32>
    %94 = vector.shape_cast %93 : vector<1x1x16xf32> to vector<1x16xf32>
    %95 = vector.shape_cast %94 : vector<1x16xf32> to vector<1x16xf32>
    %96 = vector.broadcast %95 : vector<1x16xf32> to vector<16x16xf32>
    %97 = vector.extract_strided_slice %12 {offsets = [16, 0], sizes = [16, 32], strides = [1, 1]} : vector<32x384xbf16> to vector<16x32xbf16>
    %98 = vector.extract_strided_slice %12 {offsets = [16, 128], sizes = [16, 32], strides = [1, 1]} : vector<32x384xbf16> to vector<16x32xbf16>
    %99 = vector.extract_strided_slice %12 {offsets = [16, 256], sizes = [16, 32], strides = [1, 1]} : vector<32x384xbf16> to vector<16x32xbf16>
    %100 = tpu.transpose %98, [1, 0] : vector<16x32xbf16> -> vector<32x16xbf16>
    %cst_34 = arith.constant dense<0.000000e+00> : vector<16x16xf32>
    %101 = tpu.matmul %97, %100, %cst_34 {dimension_numbers = #tpu.dot_dimension_numbers<[1], [0], [0], [1], [0, 0, 1, 1], [], []>} : vector<16x32xbf16>, vector<32x16xbf16>, vector<16x16xf32> -> vector<16x16xf32>
    %102 = arith.addf %101, %96 : vector<16x16xf32>
    %cst_35 = arith.constant dense<0xFF800000> : vector<16xf32>
    %103 = vector.multi_reduction <maximumf>, %102, %cst_35 [1] : vector<16x16xf32> to vector<16xf32>
    %104 = vector.shape_cast %103 : vector<16xf32> to vector<16x1xf32>
    %105 = vector.broadcast %104 : vector<16x1xf32> to vector<16x16xf32>
    %106 = arith.subf %102, %105 : vector<16x16xf32>
    %107 = math.exp %106 : vector<16x16xf32>
    %cst_36 = arith.constant dense<0.000000e+00> : vector<16xf32>
    %108 = vector.multi_reduction <add>, %107, %cst_36 [1] : vector<16x16xf32> to vector<16xf32>
    %109 = vector.shape_cast %108 : vector<16xf32> to vector<16x1xf32>
    %110 = tpu.reciprocal %109 {approx = true} : vector<16x1xf32> -> vector<16x1xf32>
    %111 = vector.broadcast %110 : vector<16x1xf32> to vector<16x16xf32>
    %112 = arith.mulf %107, %111 : vector<16x16xf32>
    %113 = arith.truncf %112 : vector<16x16xf32> to vector<16x16xbf16>
    %cst_37 = arith.constant dense<0.000000e+00> : vector<16x32xf32>
    %114 = tpu.matmul %113, %99, %cst_37 {dimension_numbers = #tpu.dot_dimension_numbers<[1], [0], [0], [1], [0, 0, 1, 1], [], []>} : vector<16x16xbf16>, vector<16x32xbf16>, vector<16x32xf32> -> vector<16x32xf32>
    %c16 = arith.constant 16 : index
    %c0_38 = arith.constant 0 : index
    %115 = vector.load %arg21[%c16, %c0_38] : memref<32x128xf32, #tpu.memory_space<vmem>>, vector<16x32xf32>
    tpu.vector_store %arg21[%c16, %c0_38], %114 {strides = array<i32>} : memref<32x128xf32, #tpu.memory_space<vmem>>, vector<16x32xf32>,
    %116 = vector.extract_strided_slice %12 {offsets = [16, 32], sizes = [16, 32], strides = [1, 1]} : vector<32x384xbf16> to vector<16x32xbf16>
    %117 = vector.extract_strided_slice %12 {offsets = [16, 160], sizes = [16, 32], strides = [1, 1]} : vector<32x384xbf16> to vector<16x32xbf16>
    %118 = vector.extract_strided_slice %12 {offsets = [16, 288], sizes = [16, 32], strides = [1, 1]} : vector<32x384xbf16> to vector<16x32xbf16>
    %119 = tpu.transpose %117, [1, 0] : vector<16x32xbf16> -> vector<32x16xbf16>
    %cst_39 = arith.constant dense<0.000000e+00> : vector<16x16xf32>
    %120 = tpu.matmul %116, %119, %cst_39 {dimension_numbers = #tpu.dot_dimension_numbers<[1], [0], [0], [1], [0, 0, 1, 1], [], []>} : vector<16x32xbf16>, vector<32x16xbf16>, vector<16x16xf32> -> vector<16x16xf32>
    %121 = arith.addf %120, %96 : vector<16x16xf32>
    %cst_40 = arith.constant dense<0xFF800000> : vector<16xf32>
    %122 = vector.multi_reduction <maximumf>, %121, %cst_40 [1] : vector<16x16xf32> to vector<16xf32>
    %123 = vector.shape_cast %122 : vector<16xf32> to vector<16x1xf32>
    %124 = vector.broadcast %123 : vector<16x1xf32> to vector<16x16xf32>
    %125 = arith.subf %121, %124 : vector<16x16xf32>
    %126 = math.exp %125 : vector<16x16xf32>
    %cst_41 = arith.constant dense<0.000000e+00> : vector<16xf32>
    %127 = vector.multi_reduction <add>, %126, %cst_41 [1] : vector<16x16xf32> to vector<16xf32>
    %128 = vector.shape_cast %127 : vector<16xf32> to vector<16x1xf32>
    %129 = tpu.reciprocal %128 {approx = true} : vector<16x1xf32> -> vector<16x1xf32>
    %130 = vector.broadcast %129 : vector<16x1xf32> to vector<16x16xf32>
    %131 = arith.mulf %126, %130 : vector<16x16xf32>
    %132 = arith.truncf %131 : vector<16x16xf32> to vector<16x16xbf16>
    %cst_42 = arith.constant dense<0.000000e+00> : vector<16x32xf32>
    %133 = tpu.matmul %132, %118, %cst_42 {dimension_numbers = #tpu.dot_dimension_numbers<[1], [0], [0], [1], [0, 0, 1, 1], [], []>} : vector<16x16xbf16>, vector<16x32xbf16>, vector<16x32xf32> -> vector<16x32xf32>
    %c16_43 = arith.constant 16 : index
    %c32_44 = arith.constant 32 : index
    %134 = vector.load %arg21[%c16_43, %c32_44] : memref<32x128xf32, #tpu.memory_space<vmem>>, vector<16x32xf32>
    tpu.vector_store %arg21[%c16_43, %c32_44], %133 {strides = array<i32>} : memref<32x128xf32, #tpu.memory_space<vmem>>, vector<16x32xf32>,
    %135 = vector.extract_strided_slice %12 {offsets = [16, 64], sizes = [16, 32], strides = [1, 1]} : vector<32x384xbf16> to vector<16x32xbf16>
    %136 = vector.extract_strided_slice %12 {offsets = [16, 192], sizes = [16, 32], strides = [1, 1]} : vector<32x384xbf16> to vector<16x32xbf16>
    %137 = vector.extract_strided_slice %12 {offsets = [16, 320], sizes = [16, 32], strides = [1, 1]} : vector<32x384xbf16> to vector<16x32xbf16>
    %138 = tpu.transpose %136, [1, 0] : vector<16x32xbf16> -> vector<32x16xbf16>
    %cst_45 = arith.constant dense<0.000000e+00> : vector<16x16xf32>
    %139 = tpu.matmul %135, %138, %cst_45 {dimension_numbers = #tpu.dot_dimension_numbers<[1], [0], [0], [1], [0, 0, 1, 1], [], []>} : vector<16x32xbf16>, vector<32x16xbf16>, vector<16x16xf32> -> vector<16x16xf32>
    %140 = arith.addf %139, %96 : vector<16x16xf32>
    %cst_46 = arith.constant dense<0xFF800000> : vector<16xf32>
    %141 = vector.multi_reduction <maximumf>, %140, %cst_46 [1] : vector<16x16xf32> to vector<16xf32>
    %142 = vector.shape_cast %141 : vector<16xf32> to vector<16x1xf32>
    %143 = vector.broadcast %142 : vector<16x1xf32> to vector<16x16xf32>
    %144 = arith.subf %140, %143 : vector<16x16xf32>
    %145 = math.exp %144 : vector<16x16xf32>
    %cst_47 = arith.constant dense<0.000000e+00> : vector<16xf32>
    %146 = vector.multi_reduction <add>, %145, %cst_47 [1] : vector<16x16xf32> to vector<16xf32>
    %147 = vector.shape_cast %146 : vector<16xf32> to vector<16x1xf32>
    %148 = tpu.reciprocal %147 {approx = true} : vector<16x1xf32> -> vector<16x1xf32>
    %149 = vector.broadcast %148 : vector<16x1xf32> to vector<16x16xf32>
    %150 = arith.mulf %145, %149 : vector<16x16xf32>
    %151 = arith.truncf %150 : vector<16x16xf32> to vector<16x16xbf16>
    %cst_48 = arith.constant dense<0.000000e+00> : vector<16x32xf32>
    %152 = tpu.matmul %151, %137, %cst_48 {dimension_numbers = #tpu.dot_dimension_numbers<[1], [0], [0], [1], [0, 0, 1, 1], [], []>} : vector<16x16xbf16>, vector<16x32xbf16>, vector<16x32xf32> -> vector<16x32xf32>
    %c16_49 = arith.constant 16 : index
    %c64_50 = arith.constant 64 : index
    %153 = vector.load %arg21[%c16_49, %c64_50] : memref<32x128xf32, #tpu.memory_space<vmem>>, vector<16x32xf32>
    tpu.vector_store %arg21[%c16_49, %c64_50], %152 {strides = array<i32>} : memref<32x128xf32, #tpu.memory_space<vmem>>, vector<16x32xf32>,
    %154 = vector.extract_strided_slice %12 {offsets = [16, 96], sizes = [16, 32], strides = [1, 1]} : vector<32x384xbf16> to vector<16x32xbf16>
    %155 = vector.extract_strided_slice %12 {offsets = [16, 224], sizes = [16, 32], strides = [1, 1]} : vector<32x384xbf16> to vector<16x32xbf16>
    %156 = vector.extract_strided_slice %12 {offsets = [16, 352], sizes = [16, 32], strides = [1, 1]} : vector<32x384xbf16> to vector<16x32xbf16>
    %157 = tpu.transpose %155, [1, 0] : vector<16x32xbf16> -> vector<32x16xbf16>
    %cst_51 = arith.constant dense<0.000000e+00> : vector<16x16xf32>
    %158 = tpu.matmul %154, %157, %cst_51 {dimension_numbers = #tpu.dot_dimension_numbers<[1], [0], [0], [1], [0, 0, 1, 1], [], []>} : vector<16x32xbf16>, vector<32x16xbf16>, vector<16x16xf32> -> vector<16x16xf32>
    %159 = arith.addf %158, %96 : vector<16x16xf32>
    %cst_52 = arith.constant dense<0xFF800000> : vector<16xf32>
    %160 = vector.multi_reduction <maximumf>, %159, %cst_52 [1] : vector<16x16xf32> to vector<16xf32>
    %161 = vector.shape_cast %160 : vector<16xf32> to vector<16x1xf32>
    %162 = vector.broadcast %161 : vector<16x1xf32> to vector<16x16xf32>
    %163 = arith.subf %159, %162 : vector<16x16xf32>
    %164 = math.exp %163 : vector<16x16xf32>
    %cst_53 = arith.constant dense<0.000000e+00> : vector<16xf32>
    %165 = vector.multi_reduction <add>, %164, %cst_53 [1] : vector<16x16xf32> to vector<16xf32>
    %166 = vector.shape_cast %165 : vector<16xf32> to vector<16x1xf32>
    %167 = tpu.reciprocal %166 {approx = true} : vector<16x1xf32> -> vector<16x1xf32>
    %168 = vector.broadcast %167 : vector<16x1xf32> to vector<16x16xf32>
    %169 = arith.mulf %164, %168 : vector<16x16xf32>
    %170 = arith.truncf %169 : vector<16x16xf32> to vector<16x16xbf16>
    %cst_54 = arith.constant dense<0.000000e+00> : vector<16x32xf32>
    %171 = tpu.matmul %170, %156, %cst_54 {dimension_numbers = #tpu.dot_dimension_numbers<[1], [0], [0], [1], [0, 0, 1, 1], [], []>} : vector<16x16xbf16>, vector<16x32xbf16>, vector<16x32xf32> -> vector<16x32xf32>
    %c16_55 = arith.constant 16 : index
    %c96_56 = arith.constant 96 : index
    %172 = vector.load %arg21[%c16_55, %c96_56] : memref<32x128xf32, #tpu.memory_space<vmem>>, vector<16x32xf32>
    tpu.vector_store %arg21[%c16_55, %c96_56], %171 {strides = array<i32>} : memref<32x128xf32, #tpu.memory_space<vmem>>, vector<16x32xf32>,
    %c0_57 = arith.constant 0 : index
    %c0_58 = arith.constant 0 : index
    %173 = vector.load %arg21[%c0_57, %c0_58] : memref<32x128xf32, #tpu.memory_space<vmem>>, vector<32x128xf32>
    %174 = arith.truncf %173 : vector<32x128xf32> to vector<32x128xbf16>
    %c0_59 = arith.constant 0 : index
    %c0_60 = arith.constant 0 : index
    %c0_61 = arith.constant 0 : index
    %175 = vector.load %arg7[%c0_59, %c0_60, %c0_61] : memref<1x128x128xbf16, #tpu.memory_space<vmem>>, vector<1x128x128xbf16>
    %176 = vector.shape_cast %175 : vector<1x128x128xbf16> to vector<128x128xbf16>
    %cst_62 = arith.constant dense<0.000000e+00> : vector<32x128xf32>
    %177 = tpu.matmul %174, %176, %cst_62 {dimension_numbers = #tpu.dot_dimension_numbers<[1], [0], [0], [1], [0, 0, 1, 1], [], []>} : vector<32x128xbf16>, vector<128x128xbf16>, vector<32x128xf32> -> vector<32x128xf32>
    %c0_63 = arith.constant 0 : index
    %c0_64 = arith.constant 0 : index
    %c0_65 = arith.constant 0 : index
    %178 = vector.load %arg8[%c0_63, %c0_64, %c0_65] : memref<1x1x128xf32, #tpu.memory_space<vmem>>, vector<1x1x128xf32>
    %179 = vector.shape_cast %178 : vector<1x1x128xf32> to vector<1x128xf32>
    %180 = vector.broadcast %179 : vector<1x128xf32> to vector<32x128xf32>
    %181 = arith.addf %177, %180 : vector<32x128xf32>
    %182 = arith.addf %181, %3 : vector<32x128xf32>
    %c0_66 = arith.constant 0 : index
    %c0_67 = arith.constant 0 : index
    %c0_68 = arith.constant 0 : index
    %183 = vector.load %arg9[%c0_66, %c0_67, %c0_68] : memref<1x1x128xf32, #tpu.memory_space<vmem>>, vector<1x1x128xf32>
    %184 = vector.shape_cast %183 : vector<1x1x128xf32> to vector<1x128xf32>
    %c0_69 = arith.constant 0 : index
    %c0_70 = arith.constant 0 : index
    %c0_71 = arith.constant 0 : index
    %185 = vector.load %arg10[%c0_69, %c0_70, %c0_71] : memref<1x1x128xf32, #tpu.memory_space<vmem>>, vector<1x1x128xf32>
    %186 = vector.shape_cast %185 : vector<1x1x128xf32> to vector<1x128xf32>
    %cst_72 = arith.constant dense<0.000000e+00> : vector<32xf32>
    %187 = vector.multi_reduction <add>, %182, %cst_72 [1] : vector<32x128xf32> to vector<32xf32>
    %188 = vector.shape_cast %187 : vector<32xf32> to vector<32x1xf32>
    %cst_73 = arith.constant 1.280000e+02 : f32
    %189 = vector.broadcast %cst_73 : f32 to vector<32x1xf32>
    %190 = arith.divf %188, %189 : vector<32x1xf32>
    %191 = vector.broadcast %190 : vector<32x1xf32> to vector<32x128xf32>
    %192 = arith.subf %182, %191 : vector<32x128xf32>
    %193 = arith.mulf %192, %192 : vector<32x128xf32>
    %cst_74 = arith.constant dense<0.000000e+00> : vector<32xf32>
    %194 = vector.multi_reduction <add>, %193, %cst_74 [1] : vector<32x128xf32> to vector<32xf32>
    %195 = vector.shape_cast %194 : vector<32xf32> to vector<32x1xf32>
    %cst_75 = arith.constant 1.280000e+02 : f32
    %196 = vector.broadcast %cst_75 : f32 to vector<32x1xf32>
    %197 = arith.divf %195, %196 : vector<32x1xf32>
    %cst_76 = arith.constant 9.99999996E-13 : f32
    %198 = vector.broadcast %cst_76 : f32 to vector<32x1xf32>
    %199 = arith.addf %197, %198 : vector<32x1xf32>
    %200 = math.rsqrt %199 : vector<32x1xf32>
    %201 = vector.broadcast %200 : vector<32x1xf32> to vector<32x128xf32>
    %202 = arith.mulf %192, %201 : vector<32x128xf32>
    %203 = vector.broadcast %184 : vector<1x128xf32> to vector<32x128xf32>
    %204 = arith.mulf %202, %203 : vector<32x128xf32>
    %205 = vector.broadcast %186 : vector<1x128xf32> to vector<32x128xf32>
    %206 = arith.addf %204, %205 : vector<32x128xf32>
    %207 = arith.truncf %206 : vector<32x128xf32> to vector<32x128xbf16>
    %c0_77 = arith.constant 0 : index
    %c0_78 = arith.constant 0 : index
    %c0_79 = arith.constant 0 : index
    %208 = vector.load %arg11[%c0_77, %c0_78, %c0_79] : memref<1x128x512xbf16, #tpu.memory_space<vmem>>, vector<1x128x512xbf16>
    %209 = vector.shape_cast %208 : vector<1x128x512xbf16> to vector<128x512xbf16>
    %cst_80 = arith.constant dense<0.000000e+00> : vector<32x512xf32>
    %210 = tpu.matmul %207, %209, %cst_80 {dimension_numbers = #tpu.dot_dimension_numbers<[1], [0], [0], [1], [0, 0, 1, 1], [], []>} : vector<32x128xbf16>, vector<128x512xbf16>, vector<32x512xf32> -> vector<32x512xf32>
    %c0_81 = arith.constant 0 : index
    %c0_82 = arith.constant 0 : index
    %c0_83 = arith.constant 0 : index
    %211 = vector.load %arg12[%c0_81, %c0_82, %c0_83] : memref<1x1x512xf32, #tpu.memory_space<vmem>>, vector<1x1x512xf32>
    %212 = vector.shape_cast %211 : vector<1x1x512xf32> to vector<1x512xf32>
    %213 = vector.broadcast %212 : vector<1x512xf32> to vector<32x512xf32>
    %214 = arith.addf %210, %213 : vector<32x512xf32>
    %215 = arith.mulf %214, %214 : vector<32x512xf32>
    %216 = arith.mulf %214, %215 : vector<32x512xf32>
    %cst_84 = arith.constant 4.471500e-02 : f32
    %217 = vector.broadcast %cst_84 : f32 to vector<32x512xf32>
    %218 = arith.mulf %217, %216 : vector<32x512xf32>
    %219 = arith.addf %214, %218 : vector<32x512xf32>
    %cst_85 = arith.constant 0.797884583 : f32
    %220 = vector.broadcast %cst_85 : f32 to vector<32x512xf32>
    %221 = arith.mulf %220, %219 : vector<32x512xf32>
    %222 = math.tanh %221 : vector<32x512xf32>
    %cst_86 = arith.constant 1.000000e+00 : f32
    %223 = vector.broadcast %cst_86 : f32 to vector<32x512xf32>
    %224 = arith.addf %223, %222 : vector<32x512xf32>
    %cst_87 = arith.constant 5.000000e-01 : f32
    %225 = vector.broadcast %cst_87 : f32 to vector<32x512xf32>
    %226 = arith.mulf %225, %224 : vector<32x512xf32>
    %227 = arith.mulf %214, %226 : vector<32x512xf32>
    %228 = arith.truncf %227 : vector<32x512xf32> to vector<32x512xbf16>
    %c0_88 = arith.constant 0 : index
    %c0_89 = arith.constant 0 : index
    %c0_90 = arith.constant 0 : index
    %229 = vector.load %arg13[%c0_88, %c0_89, %c0_90] : memref<1x512x128xbf16, #tpu.memory_space<vmem>>, vector<1x512x128xbf16>
    %230 = vector.shape_cast %229 : vector<1x512x128xbf16> to vector<512x128xbf16>
    %cst_91 = arith.constant dense<0.000000e+00> : vector<32x128xf32>
    %231 = tpu.matmul %228, %230, %cst_91 {dimension_numbers = #tpu.dot_dimension_numbers<[1], [0], [0], [1], [0, 0, 1, 1], [], []>} : vector<32x512xbf16>, vector<512x128xbf16>, vector<32x128xf32> -> vector<32x128xf32>
    %c0_92 = arith.constant 0 : index
    %c0_93 = arith.constant 0 : index
    %c0_94 = arith.constant 0 : index
    %232 = vector.load %arg14[%c0_92, %c0_93, %c0_94] : memref<1x1x128xf32, #tpu.memory_space<vmem>>, vector<1x1x128xf32>
    %233 = vector.shape_cast %232 : vector<1x1x128xf32> to vector<1x128xf32>
    %234 = vector.broadcast %233 : vector<1x128xf32> to vector<32x128xf32>
    %235 = arith.addf %231, %234 : vector<32x128xf32>
    %236 = arith.addf %235, %206 : vector<32x128xf32>
    %c0_95 = arith.constant 0 : index
    %c0_96 = arith.constant 0 : index
    %c0_97 = arith.constant 0 : index
    %237 = vector.load %arg15[%c0_95, %c0_96, %c0_97] : memref<1x1x128xf32, #tpu.memory_space<vmem>>, vector<1x1x128xf32>
    %238 = vector.shape_cast %237 : vector<1x1x128xf32> to vector<1x128xf32>
    %c0_98 = arith.constant 0 : index
    %c0_99 = arith.constant 0 : index
    %c0_100 = arith.constant 0 : index
    %239 = vector.load %arg16[%c0_98, %c0_99, %c0_100] : memref<1x1x128xf32, #tpu.memory_space<vmem>>, vector<1x1x128xf32>
    %240 = vector.shape_cast %239 : vector<1x1x128xf32> to vector<1x128xf32>
    %cst_101 = arith.constant dense<0.000000e+00> : vector<32xf32>
    %241 = vector.multi_reduction <add>, %236, %cst_101 [1] : vector<32x128xf32> to vector<32xf32>
    %242 = vector.shape_cast %241 : vector<32xf32> to vector<32x1xf32>
    %cst_102 = arith.constant 1.280000e+02 : f32
    %243 = vector.broadcast %cst_102 : f32 to vector<32x1xf32>
    %244 = arith.divf %242, %243 : vector<32x1xf32>
    %245 = vector.broadcast %244 : vector<32x1xf32> to vector<32x128xf32>
    %246 = arith.subf %236, %245 : vector<32x128xf32>
    %247 = arith.mulf %246, %246 : vector<32x128xf32>
    %cst_103 = arith.constant dense<0.000000e+00> : vector<32xf32>
    %248 = vector.multi_reduction <add>, %247, %cst_103 [1] : vector<32x128xf32> to vector<32xf32>
    %249 = vector.shape_cast %248 : vector<32xf32> to vector<32x1xf32>
    %cst_104 = arith.constant 1.280000e+02 : f32
    %250 = vector.broadcast %cst_104 : f32 to vector<32x1xf32>
    %251 = arith.divf %249, %250 : vector<32x1xf32>
    %cst_105 = arith.constant 9.99999996E-13 : f32
    %252 = vector.broadcast %cst_105 : f32 to vector<32x1xf32>
    %253 = arith.addf %251, %252 : vector<32x1xf32>
    %254 = math.rsqrt %253 : vector<32x1xf32>
    %255 = vector.broadcast %254 : vector<32x1xf32> to vector<32x128xf32>
    %256 = arith.mulf %246, %255 : vector<32x128xf32>
    %257 = vector.broadcast %238 : vector<1x128xf32> to vector<32x128xf32>
    %258 = arith.mulf %256, %257 : vector<32x128xf32>
    %259 = vector.broadcast %240 : vector<1x128xf32> to vector<32x128xf32>
    %260 = arith.addf %258, %259 : vector<32x128xf32>
    %c0_106 = arith.constant 0 : index
    %c0_107 = arith.constant 0 : index
    %261 = vector.load %arg20[%c0_106, %c0_107] : memref<32x128xf32, #tpu.memory_space<vmem>>, vector<32x128xf32>
    tpu.vector_store %arg20[%c0_106, %c0_107], %260 {strides = array<i32>} : memref<32x128xf32, #tpu.memory_space<vmem>>, vector<32x128xf32>,
    %c1_i32 = arith.constant 1 : i32
    %262 = arith.cmpi eq, %arg0, %c1_i32 : i32
    %263 = arith.extui %262 : i1 to i32
    %c0_i32_108 = arith.constant 0 : i32
    %264 = arith.cmpi ne, %263, %c0_i32_108 : i32
    scf.if %264 {
      %c0_109 = arith.constant 0 : index
      %c0_110 = arith.constant 0 : index
      %265 = vector.load %arg20[%c0_109, %c0_110] : memref<32x128xf32, #tpu.memory_space<vmem>>, vector<1x128xf32>
      %c16_111 = arith.constant 16 : index
      %c0_112 = arith.constant 0 : index
      %266 = vector.load %arg20[%c16_111, %c0_112] : memref<32x128xf32, #tpu.memory_space<vmem>>, vector<1x128xf32>
      %267 = tpu.concatenate %265, %266 in 0 : vector<1x128xf32>, vector<1x128xf32> -> vector<2x128xf32>
      %268 = arith.truncf %267 : vector<2x128xf32> to vector<2x128xbf16>
      %c0_113 = arith.constant 0 : index
      %c0_114 = arith.constant 0 : index
      %269 = vector.load %arg17[%c0_113, %c0_114] : memref<128x128xbf16, #tpu.memory_space<vmem>>, vector<128x128xbf16>
      %cst_115 = arith.constant dense<0.000000e+00> : vector<2x128xf32>
      %270 = tpu.matmul %268, %269, %cst_115 {dimension_numbers = #tpu.dot_dimension_numbers<[1], [0], [0], [1], [0, 0, 1, 1], [], []>} : vector<2x128xbf16>, vector<128x128xbf16>, vector<2x128xf32> -> vector<2x128xf32>
      %c0_116 = arith.constant 0 : index
      %c0_117 = arith.constant 0 : index
      %271 = vector.load %arg18[%c0_116, %c0_117] : memref<1x128xf32, #tpu.memory_space<vmem>>, vector<1x128xf32>
      %272 = vector.broadcast %271 : vector<1x128xf32> to vector<2x128xf32>
      %273 = arith.addf %270, %272 : vector<2x128xf32>
      %c0_118 = arith.constant 0 : index
      %c0_119 = arith.constant 0 : index
      %274 = vector.load %arg19[%c0_118, %c0_119] : memref<2x128xf32, #tpu.memory_space<vmem>>, vector<2x128xf32>
      tpu.vector_store %arg19[%c0_118, %c0_119], %273 {strides = array<i32>} : memref<2x128xf32, #tpu.memory_space<vmem>>, vector<2x128xf32>,
    } else {
    }
    return
  }
  func.func @transform_0(%arg0: i32) -> (i32, i32) {
    %c0_i32 = arith.constant 0 : i32
    %c0_i32_0 = arith.constant 0 : i32
    %c0_i32_1 = arith.constant 0 : i32
    return %c0_i32, %c0_i32_0 : i32, i32
  }
  func.func @transform_1(%arg0: i32) -> (i32, i32, i32) {
    %c0_i32 = arith.constant 0 : i32
    %c0_i32_0 = arith.constant 0 : i32
    %c0_i32_1 = arith.constant 0 : i32
    %c0_i32_2 = arith.constant 0 : i32
    return %c0_i32, %c0_i32_0, %c0_i32_1 : i32, i32, i32
  }
  func.func @transform_2(%arg0: i32) -> (i32, i32) {
    %c0_i32 = arith.constant 0 : i32
    %c0_i32_0 = arith.constant 0 : i32
    %c0_i32_1 = arith.constant 0 : i32
    return %c0_i32, %c0_i32_0 : i32, i32
  }
  func.func @transform_3(%arg0: i32) -> (i32, i32) {
    %c0_i32 = arith.constant 0 : i32
    %c0_i32_0 = arith.constant 0 : i32
    %c0_i32_1 = arith.constant 0 : i32
    return %c0_i32, %c0_i32_0 : i32, i32
  }
  func.func @transform_4(%arg0: i32) -> (i32, i32, i32) {
    %c0_i32 = arith.constant 0 : i32
    %c0_i32_0 = arith.constant 0 : i32
    %c0_i32_1 = arith.constant 0 : i32
    return %arg0, %c0_i32, %c0_i32_0 : i32, i32, i32
  }
  func.func @transform_5(%arg0: i32) -> (i32, i32, i32) {
    %c0_i32 = arith.constant 0 : i32
    %c0_i32_0 = arith.constant 0 : i32
    %c0_i32_1 = arith.constant 0 : i32
    return %arg0, %c0_i32, %c0_i32_0 : i32, i32, i32
  }
  func.func @transform_6(%arg0: i32) -> (i32, i32, i32) {
    %c0_i32 = arith.constant 0 : i32
    %c0_i32_0 = arith.constant 0 : i32
    %c0_i32_1 = arith.constant 0 : i32
    return %arg0, %c0_i32, %c0_i32_0 : i32, i32, i32
  }
  func.func @transform_7(%arg0: i32) -> (i32, i32, i32) {
    %c0_i32 = arith.constant 0 : i32
    %c0_i32_0 = arith.constant 0 : i32
    %c0_i32_1 = arith.constant 0 : i32
    return %arg0, %c0_i32, %c0_i32_0 : i32, i32, i32
  }
  func.func @transform_8(%arg0: i32) -> (i32, i32, i32) {
    %c0_i32 = arith.constant 0 : i32
    %c0_i32_0 = arith.constant 0 : i32
    %c0_i32_1 = arith.constant 0 : i32
    return %arg0, %c0_i32, %c0_i32_0 : i32, i32, i32
  }
  func.func @transform_9(%arg0: i32) -> (i32, i32, i32) {
    %c0_i32 = arith.constant 0 : i32
    %c0_i32_0 = arith.constant 0 : i32
    %c0_i32_1 = arith.constant 0 : i32
    return %arg0, %c0_i32, %c0_i32_0 : i32, i32, i32
  }
  func.func @transform_10(%arg0: i32) -> (i32, i32, i32) {
    %c0_i32 = arith.constant 0 : i32
    %c0_i32_0 = arith.constant 0 : i32
    %c0_i32_1 = arith.constant 0 : i32
    return %arg0, %c0_i32, %c0_i32_0 : i32, i32, i32
  }
  func.func @transform_11(%arg0: i32) -> (i32, i32, i32) {
    %c0_i32 = arith.constant 0 : i32
    %c0_i32_0 = arith.constant 0 : i32
    %c0_i32_1 = arith.constant 0 : i32
    return %arg0, %c0_i32, %c0_i32_0 : i32, i32, i32
  }
  func.func @transform_12(%arg0: i32) -> (i32, i32, i32) {
    %c0_i32 = arith.constant 0 : i32
    %c0_i32_0 = arith.constant 0 : i32
    %c0_i32_1 = arith.constant 0 : i32
    return %arg0, %c0_i32, %c0_i32_0 : i32, i32, i32
  }
  func.func @transform_13(%arg0: i32) -> (i32, i32, i32) {
    %c0_i32 = arith.constant 0 : i32
    %c0_i32_0 = arith.constant 0 : i32
    %c0_i32_1 = arith.constant 0 : i32
    return %arg0, %c0_i32, %c0_i32_0 : i32, i32, i32
  }
  func.func @transform_14(%arg0: i32) -> (i32, i32, i32) {
    %c0_i32 = arith.constant 0 : i32
    %c0_i32_0 = arith.constant 0 : i32
    %c0_i32_1 = arith.constant 0 : i32
    return %arg0, %c0_i32, %c0_i32_0 : i32, i32, i32
  }
  func.func @transform_15(%arg0: i32) -> (i32, i32, i32) {
    %c0_i32 = arith.constant 0 : i32
    %c0_i32_0 = arith.constant 0 : i32
    %c0_i32_1 = arith.constant 0 : i32
    return %arg0, %c0_i32, %c0_i32_0 : i32, i32, i32
  }
  func.func @transform_16(%arg0: i32) -> (i32, i32) {
    %c0_i32 = arith.constant 0 : i32
    %c0_i32_0 = arith.constant 0 : i32
    %c0_i32_1 = arith.constant 0 : i32
    return %c0_i32, %c0_i32_0 : i32, i32
  }
  func.func @transform_17(%arg0: i32) -> (i32, i32) {
    %c0_i32 = arith.constant 0 : i32
    %c0_i32_0 = arith.constant 0 : i32
    %c0_i32_1 = arith.constant 0 : i32
    return %c0_i32, %c0_i32_0 : i32, i32
  }
  func.func @transform_18(%arg0: i32) -> (i32, i32) {
    %c0_i32 = arith.constant 0 : i32
    %c0_i32_0 = arith.constant 0 : i32
    %c0_i32_1 = arith.constant 0 : i32
    return %c0_i32, %c0_i32_0 : i32, i32
  }
}

</mosaic_0001>

<bundles_post_ra>
// kernel: text_classifier_forward.1
= control target key start
LH: loop header
LB: loop body
LE: loop exit
PB: predicated region body
PF: predicated region fallthrough
CT: control target
= control target key end

     0   :  { %s5583_s0 = inlined_call_operand.vmem [shape: f32[32,128], index: 0, kind: input, shape index: {}]   ;;  %s5584_s1 = inlined_call_operand.vmem [shape: f32[2,1,16], index: 1, kind: input, shape index: {}]   ;;  %s5585_s2 = inlined_call_operand.vmem [shape: f32[1,128], index: 2, kind: input, shape index: {}]   ;;  %s5586_s3 = inlined_call_operand.vmem [shape: f32[1,128], index: 3, kind: input, shape index: {}]   ;;  %s5587_s4 = inlined_call_operand.hbm [shape: bf16[2,128,384], index: 4, kind: input, shape index: {}]   ;;  %s5588_s5 = inlined_call_operand.vmem [shape: f32[2,1,384], index: 5, kind: input, shape index: {}]   ;;  %s5589_s6 = inlined_call_operand.vmem [shape: bf16[2,128,128], index: 6, kind: input, shape index: {}]   ;;  %s5590_s7 = inlined_call_operand.vmem [shape: f32[2,1,128], index: 7, kind: input, shape index: {}]   ;;  %s5591_s8 = inlined_call_operand.vmem [shape: f32[2,1,128], index: 8, kind: input, shape index: {}]   ;;  %s5592_s9 = inlined_call_operand.vmem [shape: f32[2,1,128], index: 9, kind: input, shape index: {}]   ;;  %s5593_s10 = inlined_call_operand.vmem [shape: bf16[2,128,512], index: 10, kind: input, shape index: {}]   ;;  %s5594_s11 = inlined_call_operand.vmem [shape: f32[2,1,512], index: 11, kind: input, shape index: {}]   ;;  %s5595_s12 = inlined_call_operand.hbm [shape: bf16[2,512,128], index: 12, kind: input, shape index: {}]   ;;  %s5596_s13 = inlined_call_operand.vmem [shape: f32[2,1,128], index: 13, kind: input, shape index: {}]   ;;  %s5597_s14 = inlined_call_operand.vmem [shape: f32[2,1,128], index: 14, kind: input, shape index: {}]   ;;  %s5598_s15 = inlined_call_operand.vmem [shape: f32[2,1,128], index: 15, kind: input, shape index: {}]   ;;  %s5599_s16 = inlined_call_operand.hbm [shape: bf16[128,128], index: 16, kind: input, shape index: {}]   ;;  %s5600_s17 = inlined_call_operand.vmem [shape: f32[1,128], index: 17, kind: input, shape index: {}]   ;;  %s5601_s18 = inlined_call_operand.hbm [shape: f32[2,128], index: 18, kind: output, shape index: {}]  }
   0x1   :  { %5613 = sst [smem:[#allocation18_spill]] %s5583_s0 }
   0x2   :  { %5614 = sst [smem:[#allocation19_spill]] %s5584_s1 }
   0x3   :  { %5615 = sst [smem:[#allocation20_spill]] %s5585_s2 }
   0x4   :  { %5616 = sst [smem:[#allocation21_spill]] %s5586_s3 }
   0x5   :  { %5617 = sst [smem:[#allocation22_spill]] %s5587_s4 }
   0x6   :  { %5618 = sst [smem:[#allocation23_spill]] %s5588_s5 }
   0x7   :  { %5619 = sst [smem:[#allocation24_spill]] %s5589_s6 }
   0x8   :  { %5620 = sst [smem:[#allocation25_spill]] %s5595_s12 }
   0x9   :  { %5621 = sst [smem:[#allocation26_spill]] %s5597_s14 }
   0xa   :  { %5622 = sst [smem:[#allocation27_spill]] %s5598_s15 }
   0xb   :  { %5623 = sst [smem:[#allocation28_spill]] %s5599_s16 }
   0xc   :  { %5624 = sst [smem:[#allocation29_spill]] %s5600_s17 }
   0xd   :  { %5625 = sst [smem:[#allocation30_spill]] %s5601_s18 }
   0xe   :  { %23 = vsyncpa [#allocation5], 0 }
   0xf   :  { %25 = vsyncpa [#allocation5 + $0x1], 0 }
  0x10   :  { %26 = vsyncpa [#allocation8], 0 }
  0x11   :  { %28 = vsyncpa [#allocation8 + $0x1], 0 }
  0x12   :  { %29 = vsyncpa [#allocation6], 0  ;;  %s4666_s27 = smov 0   ;;  %s4668_s28 = smov 0  }
  0x13   :  { %s4670_s29 = smov 0   ;;  %s4672_s30 = smov 0  }
  0x14 LB: > { %5626 = sst [smem:[#allocation15_spill]] %s4548_s29  ;;  %s4685_s0 = sadd.s32 4294967295, %s4552_s30   ;;  %s4552_s30 = sphi %s4672_s30, %s5660_s30   ;;  %s4548_s29 = sphi %s4670_s29, %s5662_s29   ;;  %s4544_s28 = sphi %s4668_s28, %s5664_s28   ;;  %s4540_s27 = sphi %s4666_s27, %s5663_s27  }
  0x15   : > { %p139_p0 = scmp.ne.s32.totalorder %s4544_s28, %s4540_s27  ;;  %p5605_p1 = scmp.eq.s32.totalorder %s4685_s0, 0 }
  0x16   : > { %p3632_p2 = scmp.ge.s32.totalorder %s4552_s30, 1  ;;  %p499_p3 = scmp.lt.s32.totalorder %s4552_s30, 3 }
  0x17   : > { %p4694_p5 = por %p5605_p1, %p139_p0  ;;  %s4554_s20 = smov [#allocation9]  }
  0x18   : > { %p4698_p6 = pnand %p3632_p2, %p499_p3  ;;  %s523_s21 = sshll.u32 %s4554_s20, 4  ;;  %s524_s21 = int_to_ptr.vmem [resolvable:$true] %s523_s21 }
  0x19   : > { %s5627_s19 = scalar_select %p4694_p5, 1, 0 }
  0x1a   : > { %s5628_s1 = scalar_select %p4698_p6, 1, 0 }
  0x1b   : > { %p4077_p7 = pneg %p4698_p6  ;;  %s4711_s2 = sadd.s32 1, %s4552_s30  }
  0x1c   : > { %5630 = sst [smem:[#allocation16_spill]] %s4711_s2  ;;  %s126_s23 = sadd.s32 1, %s4548_s29 }
  0x1d   : > { %p4706_p8 = pnand %p4077_p7, %p5605_p1  ;;  %s123_s24 = ssub.s32 %s4552_s30, %s4711_s2 }
  0x1e   : > { %s5631_s16 = sld [smem:[#allocation28_spill]] }
  0x1f   : > { %p4394_p10 = pneg %p4706_p8 }
  0x24   : > { %s4392_s27 = scalar_lea.hbm %s5631_s16, 1024 }
  0x25   : > { %p4393_p9 = scmp.ne.s32.totalorder %s5631_s16, %s4392_s27  ;;  %p4399_p13 = scmp.lt.u32.totalorder %s4392_s27, %s5631_s16 }
  0x27   : > { %p4395_p11 = pnand %p4394_p10, %p4393_p9 }
  0x29   : > { %p4396_p12 = pneg %p4395_p11 }
  0x2b   : > { %p4401_p0 = pnand %p4399_p13, %p4396_p12 }
  0x2d   : > { %4404 = shalt.err (!%p4401_p0)
}
  0x2e   : > { %s4405_s15 = scalar_lea.vmem %s524_s21, 1024  ;;  %p4413_p4 = scmp.lt.s32.totalorder %s524_s21, %s524_s21 }
  0x2f   : > { %p4406_p2 = scmp.ne.s32.totalorder %s524_s21, %s4405_s15  ;;  %p4414_p1 = scmp.lt.s32.totalorder %s4405_s15, %s4405_s15 }
  0x31   : > { %p4408_p3 = pnand %p4406_p2, %p4394_p10  ;;  %p4415_p5 = por %p4414_p1, %p4413_p4 }
  0x33   : > { %p4409_p7 = pneg %p4408_p3 }
  0x35   : > { %p4416_p6 = pnand %p4415_p5, %p4409_p7 }
  0x37   : > { %4419 = shalt.err (!%p4416_p6)
}
  0x38   : > { %s5608_s18 = smov 64   ;;  %s5609_s3 = smov 4  }
  0x39   : > { %4080 = dma.hbm_to_vmem [thread:$0]  (!%p4706_p8), %s5631_s16, 1024, %s524_s21, [#allocation8], %s5608_s18, %s5608_s18, %s5609_s3  }
  0x3a   : > { %p124_p1 = scmp.eq.s32.totalorder %s123_s24, 0  ;;  %p133_p4 = scmp.ne.s32.totalorder %s4548_s29, %s4544_s28 }
  0x3b   : > { %p134_p5 = scmp.eq.s32.totalorder %s4552_s30, 0  ;;  %p4089_p6 = scmp.lt.s32.totalorder %s4552_s30, 2 }
  0x3c   : > { %s4740_s15 = scalar_select %p124_p1, %s4548_s29, %s126_s23  }
  0x3d   : > { %p135_p9 = por %p134_p5, %p133_p4  ;;  %s4743_s26 = sand.u32 1, %s4548_s29  }
  0x3e   : > { %5632 = sst [smem:[#allocation17_spill]] %s4740_s15  ;;  %s4061_s22 = smul.u32 192, %s4743_s26 }
  0x3f   : > { %s4062_s27 = smul.u32 3072, %s4552_s30  ;;  %p4747_p10 = pnand %p4089_p6, %p135_p9 }
  0x40   : > { %s5634_s4 = sld [smem:[#allocation22_spill]]  ;;  %s544_s23 = scalar_lea.vmem [#allocation4], %s4061_s22 }
  0x41   : > { %s551_s24 = sshll.u32 %s544_s23, 4  ;;  %s541_s3 = scalar_lea.sflag [#allocation5], %s4743_s26  ;;  %s4756_s24 = int_to_ptr.vmem [resolvable:$true] %s551_s24 }
  0x42   : > { %p4422_p11 = pneg %p4747_p10 }
  0x46   : > { %s4754_s21 = scalar_lea.hbm %s5634_s4, %s4062_s27  ;;  %s4425_s25 = scalar_lea.hbm %s5634_s4, 6144 }
  0x47   : > { %s4420_s16 = scalar_lea.hbm %s4754_s21, 3072  ;;  %p4426_p0 = scmp.lt.u32.totalorder %s4754_s21, %s5634_s4 }
  0x48   : > { %p4421_p8 = scmp.ne.s32.totalorder %s4754_s21, %s4420_s16  ;;  %p4427_p2 = scmp.lt.u32.totalorder %s4425_s25, %s4420_s16 }
  0x49   : > { %p4429_p7 = scmp.lt.u32.totalorder %s4420_s16, %s4754_s21 }
  0x4a   : > { %p4423_p12 = pnand %p4422_p11, %p4421_p8  ;;  %p4428_p3 = por %p4427_p2, %p4426_p0 }
  0x4c   : > { %p4424_p13 = pneg %p4423_p12  ;;  %p4430_p1 = por %p4429_p7, %p4428_p3 }
  0x4e   : > { %p4431_p4 = pnand %p4430_p1, %p4424_p13 }
  0x50   : > { %4434 = shalt.err (!%p4431_p4)
}
  0x51   : > { %s4435_s22 = scalar_lea.vmem %s4756_s24, 3072  ;;  %s4557_s23 = smov [#allocation4]  }
  0x52   : > { %p4436_p5 = scmp.ne.s32.totalorder %s4756_s24, %s4435_s22  ;;  %s4440_s27 = sshll.u32 %s4557_s23, 4  ;;  %s4441_s27 = int_to_ptr.vmem [resolvable:$false] %s4440_s27 }
  0x53   : > { %s4442_s29 = scalar_lea.vmem %s4441_s27, 6144  ;;  %p4443_p8 = scmp.lt.s32.totalorder %s4756_s24, %s4441_s27 }
  0x54   : > { %p4438_p6 = pnand %p4436_p5, %p4422_p11  ;;  %p4444_p12 = scmp.lt.s32.totalorder %s4442_s29, %s4435_s22 }
  0x56   : > { %p4439_p9 = pneg %p4438_p6  ;;  %p4445_p0 = por %p4444_p12, %p4443_p8 }
  0x58   : > { %p4446_p2 = pnand %p4445_p0, %p4439_p9 }
  0x5a   : > { %4449 = shalt.err (!%p4446_p2)
}
  0x5b   : > { %s4558_s16 = smov 192   ;;  %s4559_s15 = smov 12  }
  0x5c   : > { %4084 = dma.hbm_to_vmem [thread:$0]  (!%p4747_p10), %s4754_s21, 3072, %s4756_s24, %s541_s3, %s4558_s16, %s4558_s16, %s4559_s15  }
  0x5d   : > { %s3636_s17 = sshll.u32 %s4743_s26, 8  ;;  %s3785_s25 = sshll.u32 %s4552_s30, 12 }
  0x5e   : > { %s5635_s12 = sld [smem:[#allocation25_spill]]  ;;  %s613_s29 = scalar_lea.vmem [#allocation7], %s3636_s17 }
  0x5f   : > { %s620_s18 = sshll.u32 %s613_s29, 4  ;;  %s5636_s4 = sand.u32 1, %s4552_s30   ;;  %s4794_s18 = int_to_ptr.vmem [resolvable:$true] %s620_s18 }
  0x60   : > { %s4798_s2 = scalar_lea.sflag [#allocation8], %s5636_s4 }
  0x64   : > { %s4792_s27 = scalar_lea.hbm %s5635_s12, %s3785_s25  ;;  %s4455_s21 = scalar_lea.hbm %s5635_s12, 8192 }
  0x65   : > { %s4450_s14 = scalar_lea.hbm %s4792_s27, 4096  ;;  %p4456_p1 = scmp.lt.u32.totalorder %s4792_s27, %s5635_s12 }
  0x66   : > { %p4451_p13 = scmp.ne.s32.totalorder %s4792_s27, %s4450_s14  ;;  %p4457_p4 = scmp.lt.u32.totalorder %s4455_s21, %s4450_s14 }
  0x67   : > { %p4459_p6 = scmp.lt.u32.totalorder %s4450_s14, %s4792_s27 }
  0x68   : > { %p4453_p3 = pnand %p4451_p13, %p4422_p11  ;;  %p4458_p5 = por %p4457_p4, %p4456_p1 }
  0x6a   : > { %p4454_p7 = pneg %p4453_p3  ;;  %p4460_p9 = por %p4459_p6, %p4458_p5 }
  0x6c   : > { %p4461_p8 = pnand %p4460_p9, %p4454_p7 }
  0x6e   : > { %4464 = shalt.err (!%p4461_p8)
}
  0x6f   : > { %s4465_s4 = scalar_lea.vmem %s4794_s18, 4096  ;;  %s4560_s30 = smov [#allocation7]  }
  0x70   : > { %p4466_p12 = scmp.ne.s32.totalorder %s4794_s18, %s4465_s4  ;;  %s4470_s15 = sshll.u32 %s4560_s30, 4  ;;  %s4471_s15 = int_to_ptr.vmem [resolvable:$false] %s4470_s15 }
  0x71   : > { %s4472_s17 = scalar_lea.vmem %s4471_s15, 8192  ;;  %p4473_p13 = scmp.lt.s32.totalorder %s4794_s18, %s4471_s15 }
  0x72   : > { %p4468_p0 = pnand %p4466_p12, %p4422_p11  ;;  %p4474_p3 = scmp.lt.s32.totalorder %s4472_s17, %s4465_s4 }
  0x74   : > { %p4469_p2 = pneg %p4468_p0  ;;  %p4475_p1 = por %p4474_p3, %p4473_p13 }
  0x76   : > { %p4476_p4 = pnand %p4475_p1, %p4469_p2 }
  0x78   : > { %4479 = shalt.err (!%p4476_p4)
}
  0x79   : > { %s5637_s14 = smov 4   ;;  %s5638_s25 = smov 64  }
  0x7a   : > { %4087 = dma.hbm_to_vmem [thread:$0]  (!%p4747_p10), %s4792_s27, 4096, %s4794_s18, %s4798_s2, %s5638_s25, %s5638_s25, %s5637_s14  }
  0x7b   : > { %p5639_p11 = scmp.ne.s32.totalorder %s5628_s1, 0 }
  0x7c   : > { %s652_s23 = sand.u32 (!%p5639_p11), 1, %s4544_s28   ;;  %p5640_p7 = scmp.ne.s32.totalorder (!%p5639_p11), %s5627_s19, 0 }
  0x7d   : > { %650 = sbr.rel (%p5639_p11) target bundleno = 3440 (0xd70), region = 92  ;;  %s653_s29 = scalar_lea.sflag (!%p5639_p11), [#allocation5], %s652_s23 }
  0x7e   : > { %s4063_s22 = smul.u32 (!%p5639_p11), 192, %s652_s23 }
  0x80   : > { %s4830_s3 = scalar_lea.vmem (!%p5639_p11), [#allocation4], %s4063_s22 }
  0x84   : > { %4523 = dma.done.wait (%p5640_p7), %s653_s29, 3072  }
  0x85   : > { %4525 = vsyncadd (%p5640_p7), %s653_s29, 4294964224  ;;  %s661_s20 = sand.u32 1, %s4685_s0   ;;  %s3640_s26 = sshll.u32 %s652_s23, 8 }
  0x86   : > { %s662_s2 = scalar_lea.sflag [#allocation8], %s661_s20  ;;  %s4837_s18 = scalar_lea.vmem [#allocation7], %s3640_s26 }
  0x87   : > { %4527 = dma.done.wait (%p5640_p7), %s662_s2, 4096  }
  0x88   : > { %4529 = vsyncadd (%p5640_p7), %s662_s2, 4294963200  ;;  %p5641_p10 = scmp.eq.s32.totalorder %s4685_s0, 0 }
  0x8a   : > { %4531 = dma.done.wait (%p5641_p10), [#allocation8], 1024   ;;  %p5642_p5 = pmov %p5641_p10 }
  0x8b   : > { %p758_p6 = scmp.lt.s32.totalorder %s4685_s0, 1  ;;  %s5643_s6 = sld [smem:[#allocation24_spill]] }
  0x8c   : > { %4533 = vsyncadd (%p5642_p5), [#allocation8], 4294966272  ;;  %s5644_s5 = sld [smem:[#allocation23_spill]]  ;;  %s5645_s20 = sld [smem:[#allocation26_spill]] }
  0x8d   : > { %s4849_s1 = scalar_select %p758_p6, %s4685_s0, 1 }
  0x8e   : > { %s5646_s12 = sld [smem:[#allocation27_spill]]  ;;  %p5647_p9 = scmp.ne.s32.totalorder %s4685_s0, 0 }
  0x8f   : > { %s4064_s19 = smul.u32 3, %s4849_s1  ;;  %s3786_s27 = sshll.u32 %s4849_s1, 6  ;;  %v4561_v20 = vmov (!%p5647_p9), 0.0  }
  0x90   : > { %s3787_s21 = sshll.u32 %s4849_s1, 8  ;;  %s3646_s4 = sshll.u32 %s4849_s1, 2  ;;  %874 = vst [vmem:[#allocation10] sm:$0x3] (!%p5647_p9), %v4561_v20 }
  0x91   : > { %s4856_s16 = scalar_lea.vmem %s5643_s6, %s3786_s27  ;;  %s4879_s6 = scalar_lea.vmem %s5593_s10, %s3787_s21 }
  0x92   : > { %s4865_s25 = scalar_lea.vmem %s5644_s5, %s4064_s19  ;;  %s4885_s19 = scalar_lea.vmem %s5594_s11, %s3646_s4 }
  0x93   : > { %s787_s23 = scalar_lea.vmem %s5596_s13, %s4849_s1  ;;  %s790_s26 = scalar_lea.vmem %s5645_s20, %s4849_s1 }
  0x94   : > { %s793_s27 = scalar_lea.vmem %s5646_s12, %s4849_s1  ;;  %798 = sbr.rel (%p5647_p9) target bundleno = 476 (0x1dc), region = 108 }
  0x95   : > { %s5648_s15 = sld [smem:[#allocation18_spill]] (!%p5647_p9)  ;;  %s5649_s22 = sld [smem:[#allocation20_spill]] (!%p5647_p9) }
  0x96   : > { %s5650_s24 = sld [smem:[#allocation21_spill]] (!%p5647_p9) }
  0x9b   : > { %v799_v0 = vld [vmem:[%s5648_s15] sm:$0xff]  ;;  %v801_v1 = vld [vmem:[%s5648_s15 + $0x10] sm:$0xff]  ;;  %v800_v2 = vld [vmem:[%s5648_s15 + $0x8] sm:$0xff] }
  0x9c   : > { %805 = vadd.xlane.f32.xlu0 %v799_v0  ;;  %809 = vadd.xlane.f32.xlu1 %v801_v1  ;;  %v802_v3 = vld [vmem:[%s5648_s15 + $0x18] sm:$0xff]  ;;  %v3648_v34 = vld [vmem:[%s5649_s22] ss:$0 sm:$0xff] }
  0x9d   : > { %v3649_v36 = vld [vmem:[%s5650_s24] ss:$0 sm:$0xff] }
  0xa0   : > { %807 = vadd.xlane.f32.xlu0 %v800_v2  ;;  %811 = vadd.xlane.f32.xlu1 %v802_v3 }
 0x129   : > { %v806_v4 = vpop.xlane.xlu0 %805  ;;  %v810_v5 = vpop.xlane.xlu1 %809 }
 0x12a   : > { %v814_v6 = vmul.f32 0.0078125, %v806_v4  ;;  %v816_v7 = vmul.f32 0.0078125, %v810_v5 }
 0x12c   : > { %v818_v8 = vsub.f32 %v799_v0, %v814_v6  ;;  %v820_v9 = vsub.f32 %v801_v1, %v816_v7 }
 0x12d   : > { %v808_v10 = vpop.xlane.xlu0 %807  ;;  %v812_v11 = vpop.xlane.xlu1 %811 }
 0x12e   : > { %v815_v12 = vmul.f32 0.0078125, %v808_v10  ;;  %v822_v13 = vmul.f32 %v818_v8, %v818_v8  ;;  %v817_v14 = vmul.f32 0.0078125, %v812_v11  ;;  %v824_v17 = vmul.f32 %v820_v9, %v820_v9 }
 0x130   : > { %v819_v15 = vsub.f32 %v800_v2, %v815_v12  ;;  %826 = vadd.xlane.f32.xlu0 %v822_v13  ;;  %v821_v16 = vsub.f32 %v802_v3, %v817_v14 }
 0x132   : > { %v823_v18 = vmul.f32 %v819_v15, %v819_v15  ;;  %v825_v19 = vmul.f32 %v821_v16, %v821_v16 }
 0x134   : > { %830 = vadd.xlane.f32.xlu0 %v824_v17  ;;  %828 = vadd.xlane.f32.xlu1 %v823_v18 }
 0x138   : > { %832 = vadd.xlane.f32.xlu1 %v825_v19 }
 0x1bd   : > { %v827_v21 = vpop.xlane.xlu0 %826 }
 0x1be   : > { %v834_v22 = vmul.f32 0.0078125, %v827_v21 }
 0x1c0   : > { %v838_v23 = vadd.f32 1e-12, %v834_v22 }
 0x1c1   : > { %v829_v24 = vpop.xlane.xlu1 %828  ;;  %v831_v25 = vpop.xlane.xlu0 %830 }
 0x1c2   : > { %4140 = vrsqrt.f32 %v838_v23  ;;  %v835_v26 = vmul.f32 0.0078125, %v829_v24  ;;  %v836_v27 = vmul.f32 0.0078125, %v831_v25 }
 0x1c4   : > { %v839_v28 = vadd.f32 1e-12, %v835_v26  ;;  %v840_v29 = vadd.f32 1e-12, %v836_v27 }
 0x1c5   : > { %v833_v30 = vpop.xlane.xlu1 %832 }
 0x1c6   : > { %4142 = vrsqrt.f32 %v839_v28  ;;  %v837_v31 = vmul.f32 0.0078125, %v833_v30 }
 0x1c7   : > { %4144 = vrsqrt.f32 %v840_v29 }
 0x1c8   : > { %v841_v32 = vadd.f32 1e-12, %v837_v31 }
 0x1ca   : > { %4146 = vrsqrt.f32 %v841_v32 }
 0x1cc   : > { %v4141_v33 = vpop.eup %4140 }
 0x1cd   : > { %v846_v35 = vmul.f32 %v4141_v33, %v818_v8 }
 0x1cf   : > { %v856_v37 = vmul.f32 %v3648_v34, %v846_v35 }
 0x1d0   : > { %v4143_v38 = vpop.eup %4142 }
 0x1d1   : > { %v4145_v39 = vpop.eup %4144  ;;  %v866_v40 = vadd.f32 %v3649_v36, %v856_v37  ;;  %v847_v41 = vmul.f32 %v4143_v38, %v819_v15 }
 0x1d2   : > { %v848_v42 = vmul.f32 %v4145_v39, %v820_v9 }
 0x1d3   : > { %870 = vst [vmem:[#allocation2] sm:$0xff] %v866_v40  ;;  %v857_v43 = vmul.f32 %v3648_v34, %v847_v41 }
 0x1d4   : > { %v4147_v44 = vpop.eup %4146  ;;  %v858_v45 = vmul.f32 %v3648_v34, %v848_v42 }
 0x1d5   : > { %v867_v46 = vadd.f32 %v3649_v36, %v857_v43  ;;  %v849_v47 = vmul.f32 %v4147_v44, %v821_v16 }
 0x1d6   : > { %v868_v48 = vadd.f32 %v3649_v36, %v858_v45 }
 0x1d7   : > { %871 = vst [vmem:[#allocation2 + $0x8] sm:$0xff] %v867_v46  ;;  %v859_v49 = vmul.f32 %v3648_v34, %v849_v47 }
 0x1d8   : > { %872 = vst [vmem:[#allocation2 + $0x10] sm:$0xff] %v868_v48 }
 0x1d9   : > { %v869_v50 = vadd.f32 %v3649_v36, %v859_v49 }
 0x1db   : > { %873 = vst [vmem:[#allocation2 + $0x18] sm:$0xff] %v869_v50 }
 0x1dc PF: > { %v4148_v51 = vld [vmem:[%s4830_s3 + $0x4] ss:$12 sps:$4 sm:$0xff]   ;;  %v4150_v52 = vld [vmem:[%s4830_s3] ss:$12 sps:$4 sm:$0xff]   ;;  %v4562_v53 = vmov 0   ;;  %v4563_v10 = vmov 0.0   ;;  %v915_v19 = vlaneseq  ;;  %s5653_s22 = scalar_lea.vmem %s5590_s7, %s4849_s1  ;;  %s5654_s21 = scalar_lea.vmem %s5591_s8, %s4849_s1 }
 0x1dd   : > { %1090 = vmatprep.mubr.bf16.mxu0 %v4562_v53  ;;  %1058 = vmatprep.subr.bf16.mxu0 %v4148_v51  ;;  %v4151_v54 = vld [vmem:[%s4830_s3 + $0x1c] ss:$12 sps:$4 sm:$0xff]   ;;  %v4153_v55 = vld [vmem:[%s4830_s3 + $0x18] ss:$12 sps:$4 sm:$0xff]   ;;  %v4154_v56 = vld [vmem:[%s4830_s3 + $0x34] ss:$12 sps:$4 sm:$0xff]  }
 0x1de   : > { %1059 = vmatpush1.bf16.msra.mxu0 %v4150_v52  ;;  %v4156_v57 = vld [vmem:[%s4830_s3 + $0x30] ss:$12 sps:$4 sm:$0xff]   ;;  %v4157_v58 = vld [vmem:[%s4830_s3 + $0x4c] ss:$12 sps:$4 sm:$0xff]   ;;  %v875_v59 = vld [vmem:[#allocation2] sm:$0xff]  ;;  %vm4564_vm0 = vmmov 0  }
 0x1df   : > { %1060 = vmatprep.subr.bf16.mxu0 %v4151_v54  ;;  %v4159_v60 = vld [vmem:[%s4830_s3 + $0x48] ss:$12 sps:$4 sm:$0xff]   ;;  %v4160_v62 = vld [vmem:[%s4830_s3 + $0x64] ss:$12 sps:$4 sm:$0xff]   ;;  %v4162_v0 = vld [vmem:[%s4830_s3 + $0x60] ss:$12 sps:$4 sm:$0xff]  }
 0x1e0   : > { %v876_v61 = vld [vmem:[#allocation2 + $0x8] sm:$0xff]  ;;  %v4165_v2 = vld [vmem:[%s4830_s3 + $0x78] ss:$12 sps:$4 sm:$0xff]   ;;  %v4166_v3 = vld [vmem:[%s4830_s3 + $0x94] ss:$12 sps:$4 sm:$0xff]   ;;  %v4951_v20 = vshrl.u32 %v915_v19, 7 }
 0x1e1   : > { %v879_v63 = vpack.c.bf16 %v876_v61, %v875_v59  ;;  %v4163_v1 = vld [vmem:[%s4830_s3 + $0x7c] ss:$12 sps:$4 sm:$0xff]   ;;  %v4169_v5 = vld [vmem:[%s4830_s3 + $0xac] ss:$12 sps:$4 sm:$0xff]   ;;  %v877_v7 = vld [vmem:[#allocation2 + $0x10] sm:$0xff]  ;;  %vm1173_vm1 = vcmask 261120  }
 0x1e2   : > { %1061 = vmatpush1.bf16.msra.mxu0 %v4153_v55  ;;  %v4168_v4 = vld [vmem:[%s4830_s3 + $0x90] ss:$12 sps:$4 sm:$0xff]   ;;  %v4171_v6 = vld [vmem:[%s4830_s3 + $0xa8] ss:$12 sps:$4 sm:$0xff]   ;;  %v4173_v12 = vld [vmem:[%s4830_s3 + $0x20] ss:$12 sps:$4 sm:$0xff]  }
 0x1e3   : > { %1062 = vmatprep.subr.bf16.mxu0 %v4154_v56  ;;  %3921 = vmatprep.mubr.bf16.mxu1 %v879_v63  ;;  %v878_v8 = vld [vmem:[#allocation2 + $0x18] sm:$0xff]  ;;  %v4172_v11 = vld [vmem:[%s4830_s3 + $0x8] ss:$12 sps:$4 sm:$0xff]   ;;  %v4177_v16 = vld [vmem:[%s4830_s3 + $0x80] ss:$12 sps:$4 sm:$0xff]   ;;  %v917_v21 = vsub.s32 0, %v4951_v20 }
 0x1e4   : > { %v880_v9 = vpack.c.bf16 %v878_v8, %v877_v7  ;;  %3905 = vmatprep.subr.bf16.mxu1 %v4172_v11  ;;  %v4174_v13 = vld [vmem:[%s4830_s3 + $0x38] ss:$12 sps:$4 sm:$0xff]   ;;  %v4175_v14 = vld [vmem:[%s4830_s3 + $0x50] ss:$12 sps:$4 sm:$0xff]   ;;  %v4176_v15 = vld [vmem:[%s4830_s3 + $0x68] ss:$12 sps:$4 sm:$0xff]  }
 0x1e5   : > { %3906 = vmatpush3.bf16.msra.mxu1 %v4172_v11  ;;  %v4178_v17 = vld [vmem:[%s4830_s3 + $0x98] ss:$12 sps:$4 sm:$0xff]   ;;  %v4179_v18 = vld [vmem:[%s4830_s3 + $0xb0] ss:$12 sps:$4 sm:$0xff]   ;;  %v4955_v22 = vld [vmem:[%s4865_s25] sm:$0x7] }
 0x1e6   : > { %1063 = vmatpush1.bf16.msra.mxu0 %v4156_v57  ;;  %3907 = vmatprep.subr.bf16.mxu1 %v4173_v12  ;;  %v921_v23 = vsub.s32 1, %v4951_v20  ;;  %v918_v24 = vrot.slane %v4955_v22, %v917_v21  ;;  %s4565_s3 = smov 64   ;;  %s4566_s25 = smov 96   ;;  %v925_v55 = vsub.s32 2, %v4951_v20  ;;  %vm1221_vm2 = vcmask 130048  }
 0x1e7   : > { %1064 = vmatprep.subr.bf16.mxu0 %v4157_v58  ;;  %s4567_s4 = smov 32   ;;  %s5651_s29 = sld [smem:[#allocation19_spill]]  ;;  %vm1423_vm3 = vcmask 523520   ;;  %vm1555_vm4 = vcmask 785920   ;;  %vm1687_vm5 = vcmask 1048320  }
 0x1e8   : > { %v922_v26 = vrot.slane %v4955_v22, %v921_v23  ;;  %v926_v57 = vrot.slane %v4955_v22, %v925_v55  ;;  %p3771_p8 = scmp.ne.s32.totalorder %s4685_s0, 1 }
 0x1e9   : > { %3908 = vmatpush3.bf16.msra.mxu1 %v4173_v12  ;;  %vm4569_vm6 = vmmov (!%p3771_p8), 0   ;;  %vm3325_vm7 = vcmask (!%p3771_p8), 1040384  }
 0x1ea   : > { %1065 = vmatpush1.bf16.msra.mxu0 %v4159_v60  ;;  %3909 = vmatprep.subr.bf16.mxu1 %v4174_v13 }
 0x1eb   : > { %1066 = vmatprep.subr.bf16.mxu0 %v4160_v62 }
 0x1ed   : > { %3910 = vmatpush3.bf16.msra.mxu1 %v4174_v13  ;;  %s5652_s14 = smov %s5651_s29 }
 0x1ee   : > { %1067 = vmatpush1.bf16.msra.mxu0 %v4162_v0  ;;  %3911 = vmatprep.subr.bf16.mxu1 %v4175_v14 }
 0x1ef   : > { %1068 = vmatprep.subr.bf16.mxu0 %v4163_v1 }
 0x1f1   : > { %3912 = vmatpush3.bf16.msra.mxu1 %v4175_v14 }
 0x1f2   : > { %1069 = vmatpush1.bf16.msra.mxu0 %v4165_v2  ;;  %3913 = vmatprep.subr.bf16.mxu1 %v4176_v15 }
 0x1f3   : > { %1070 = vmatprep.subr.bf16.mxu0 %v4166_v3 }
 0x1f5   : > { %3914 = vmatpush3.bf16.msra.mxu1 %v4176_v15 }
 0x1f6   : > { %1071 = vmatpush1.bf16.msra.mxu0 %v4168_v4  ;;  %3915 = vmatprep.subr.bf16.mxu1 %v4177_v16 }
 0x1f7   : > { %1072 = vmatprep.subr.bf16.mxu0 %v4169_v5 }
 0x1f9   : > { %3916 = vmatpush3.bf16.msra.mxu1 %v4177_v16  ;;  %v3674_v16 = vld [vmem:[%s5651_s29] ss:$0 sm:$0xff] }
 0x1fa   : > { %1073 = vmatpush1.bf16.msra.mxu0 %v4171_v6  ;;  %3917 = vmatprep.subr.bf16.mxu1 %v4178_v17 }
 0x1fb   : > { %3925 = vmatprep.subr.bf16.mxu0 %v4563_v10 }
 0x1fd   : > { %1091 = vmatmul.mubr.bf16.vlgmr.msra.gmra.mrb[0].mxu0 %v879_v63  ;;  %3918 = vmatpush3.bf16.msra.mxu1 %v4178_v17 }
 0x1fe   : > { %1100 = vmatprep.mubr.bf16.mxu0 %v4562_v53  ;;  %3919 = vmatprep.subr.bf16.mxu1 %v4179_v18 }
 0x201   : > { %3920 = vmatpush3.bf16.msra.mxu1 %v4179_v18 }
 0x202   : > { %3937 = vmatprep.subr.bf16.mxu1 %v4563_v10 }
 0x204   : > { %3922 = vmatmul.mubr.bf16.vlgmr.msra.gmra.mrb[0].mxu1 %v880_v9 }
 0x205   : > { %1101 = vmatmul.mubr.bf16.gmra.mrb[4].mxu0 %v880_v9  ;;  %3939 = vmatprep.mubr.msk.bf16.mxu1 %vm4564_vm0, %v4563_v10 }
 0x206   : > { %3927 = vmatprep.mubr.msk.bf16.mxu0 %vm4564_vm0, %v4563_v10 }
 0x2d0   : > { %v1092_v25 = vpop.f32.mrb[0].mxu0 }
 0x2d1   : > { %v1094_v27 = vpop.f32.mrb[1].mxu0  ;;  %v1093_v29 = vadd.f32 %v1092_v25, %v918_v24 }
 0x2d2   : > { %v1096_v28 = vpop.f32.mrb[2].mxu0  ;;  %v1095_v32 = vadd.f32 %v1094_v27, %v922_v26 }
 0x2d3   : > { %v1097_v30 = vadd.f32 %v1096_v28, %v918_v24  ;;  %v1098_v31 = vpop.f32.mrb[3].mxu0 }
 0x2d4   : > { %v1099_v33 = vadd.f32 %v1098_v31, %v922_v26 }
 0x2d5   : > { %v1160_v34 = vpack.c.bf16 %v1097_v30, %v1093_v29 }
 0x2d6   : > { %v1161_v35 = vpack.c.bf16 %v1099_v33, %v1095_v32 }
 0x2d7   : > { %v3923_v58 = vpop.f32.mrb[0].mxu1 }
 0x2d8   : > { %1428 = vrot.lane.b32.xlu1 %v1161_v35, %s4565_s3  ;;  %1295 = vrot.lane.b32.xlu0 %v1161_v35, %s4566_s25  ;;  %v1178_v36 = vsel %vm1173_vm1, %v1161_v35, 0  ;;  %v1102_v37 = vpop.f32.mrb[4].mxu0  ;;  %v1154_v60 = vadd.f32 %v3923_v58, %v926_v57  ;;  %v1145_v61 = vpop.f32.mrb[1].mxu1 }
 0x2d9   : > { %3926 = vmatpush3.bf16.xpose.msra.mxu0 %v1178_v36  ;;  %v1103_v38 = vadd.f32 %v1102_v37, %v918_v24  ;;  %v1104_v39 = vpop.f32.mrb[5].mxu0  ;;  %v1146_v63 = vadd.f32 %v1145_v61, %v926_v57  ;;  %v3924_v0 = vpop.f32.mrb[2].mxu1 }
 0x2da   : > { %v1105_v40 = vadd.f32 %v1104_v39, %v922_v26  ;;  %v1106_v41 = vpop.f32.mrb[6].mxu0  ;;  %3931 = vmatprep.subr.bf16.mxu0 %v4563_v10  ;;  %v1157_v1 = vadd.f32 %v3924_v0, %v926_v57  ;;  %v1148_v2 = vpop.f32.mrb[3].mxu1 }
 0x2db   : > { %v1107_v42 = vadd.f32 %v1106_v41, %v918_v24  ;;  %v1108_v43 = vpop.f32.mrb[7].mxu0  ;;  %v1149_v3 = vadd.f32 %v1148_v2, %v926_v57 }
 0x2dc   : > { %1426 = vrot.lane.b32.xlu1 %v1160_v34, %s4565_s3  ;;  %1292 = vrot.lane.b32.xlu0 %v1160_v34, %s4566_s25  ;;  %v1109_v44 = vadd.f32 %v1108_v43, %v922_v26  ;;  %v5002_v5 = vpack.c.bf16 %v1157_v1, %v1154_v60 }
 0x2dd   : > { %v1163_v45 = vpack.c.bf16 %v1107_v42, %v1103_v38  ;;  %v5004_v6 = vpack.c.bf16 %v1149_v3, %v1146_v63 }
 0x2de   : > { %v1164_v46 = vpack.c.bf16 %v1109_v44, %v1105_v40 }
 0x2e0   : > { %1558 = vrot.lane.b32.xlu1 %v1160_v34, %s4567_s4  ;;  %1560 = vrot.lane.b32.xlu0 %v1161_v35, %s4567_s4  ;;  %v1702_v62 = vsel %vm1173_vm1, %v1164_v46, 0 }
 0x2e1   : > { %3928 = vmatmul.mubr.msk.bf16.vlgmr.msra.gmra.mrb[8].mxu0 %vm1173_vm1, %v1160_v34 }
 0x2e2   : > { %3933 = vmatprep.mubr.msk.bf16.mxu0 %vm4564_vm0, %v4563_v10  ;;  %3932 = vmatpush3.bf16.msra.mxu0 %v5004_v6 }
 0x2e3   : > { %3943 = vmatprep.subr.bf16.mxu0 %v4563_v10 }
 0x2e4   : > { %1818 = vrot.lane.b32.xlu0 %v1164_v46, %s4566_s25  ;;  %1815 = vrot.lane.b32.xlu1 %v1163_v45, %s4566_s25 }
 0x2e8   : > { %1950 = vrot.lane.b32.xlu0 %v1164_v46, %s4565_s3  ;;  %1948 = vrot.lane.b32.xlu1 %v1163_v45, %s4565_s3 }
 0x2ec   : > { %2081 = vrot.lane.b32.xlu0 %v1164_v46, %s4567_s4  ;;  %2079 = vrot.lane.b32.xlu1 %v1163_v45, %s4567_s4 }
 0x34a   : > { %v1296_v47 = vpop.permute.xlu0 %1295  ;;  %v1429_v49 = vpop.permute.xlu1 %1428 }
 0x34b   : > { %v1301_v48 = vsel %vm1173_vm1, %v1296_v47, 0  ;;  %v1434_v51 = vsel %vm1173_vm1, %v1429_v49, 0 }
 0x34c   : > { %3938 = vmatpush3.bf16.xpose.msra.mxu1 %v1301_v48 }
 0x34d   : > { %3949 = vmatprep.subr.bf16.mxu1 %v4563_v10 }
 0x34e   : > { %v1293_v50 = vpop.permute.xlu0 %1292  ;;  %v1427_v54 = vpop.permute.xlu1 %1426 }
 0x352   : > { %v1561_v52 = vpop.permute.xlu0 %1560  ;;  %v1559_v59 = vpop.permute.xlu1 %1558 }
 0x353   : > { %3940 = vmatmul.mubr.msk.bf16.vlgmr.msra.gmra.mrb[4].mxu1 %vm1173_vm1, %v1293_v50  ;;  %v1566_v56 = vsel %vm1173_vm1, %v1561_v52, 0 }
 0x354   : > { %3950 = vmatpush3.bf16.xpose.msra.mxu1 %v1434_v51  ;;  %3951 = vmatprep.mubr.msk.bf16.mxu1 %vm4564_vm0, %v4563_v10 }
 0x355   : > { %3961 = vmatprep.subr.bf16.mxu1 %v4563_v10 }
 0x356   : > { %v1819_v4 = vpop.permute.xlu0 %1818  ;;  %v1816_v9 = vpop.permute.xlu1 %1815 }
 0x357   : > { %v1824_v7 = vsel %vm1173_vm1, %v1819_v4, 0 }
 0x35a   : > { %v1951_v8 = vpop.permute.xlu0 %1950  ;;  %v1949_v13 = vpop.permute.xlu1 %1948 }
 0x35b   : > { %3952 = vmatmul.mubr.msk.bf16.vlgmr.msra.gmra.mrb[8].mxu1 %vm1173_vm1, %v1427_v54  ;;  %v1956_v11 = vsel %vm1173_vm1, %v1951_v8, 0 }
 0x35c   : > { %3962 = vmatpush3.bf16.xpose.msra.mxu1 %v1566_v56  ;;  %3963 = vmatprep.mubr.msk.bf16.mxu1 %vm4564_vm0, %v4563_v10  ;;  %v3684_v56 = vld [vmem:[%s5652_s14 + $0x1] ss:$0 sm:$0xff] }
 0x35d   : > { %3973 = vmatprep.subr.bf16.mxu1 %v4563_v10 }
 0x35e   : > { %v2082_v12 = vpop.permute.xlu0 %2081  ;;  %v2080_v15 = vpop.permute.xlu1 %2079 }
 0x35f   : > { %v2087_v14 = vsel %vm1173_vm1, %v2082_v12, 0 }
 0x363   : > { %3964 = vmatmul.mubr.msk.bf16.vlgmr.msra.gmra.mrb[12].mxu1 %vm1173_vm1, %v1559_v59 }
 0x364   : > { %3974 = vmatpush3.bf16.xpose.msra.mxu1 %v1702_v62  ;;  %3975 = vmatprep.mubr.msk.bf16.mxu1 %vm4564_vm0, %v4563_v10 }
 0x365   : > { %3985 = vmatprep.subr.bf16.mxu1 %v4563_v10 }
 0x36b   : > { %3976 = vmatmul.mubr.msk.bf16.vlgmr.msra.gmra.mrb[16].mxu1 %vm1173_vm1, %v1163_v45 }
 0x36c   : > { %3986 = vmatpush3.bf16.xpose.msra.mxu1 %v1824_v7  ;;  %3987 = vmatprep.mubr.msk.bf16.mxu1 %vm4564_vm0, %v4563_v10 }
 0x36d   : > { %3997 = vmatprep.subr.bf16.mxu1 %v4563_v10 }
 0x373   : > { %3988 = vmatmul.mubr.msk.bf16.vlgmr.msra.gmra.mrb[20].mxu1 %vm1173_vm1, %v1816_v9 }
 0x374   : > { %3998 = vmatpush3.bf16.xpose.msra.mxu1 %v1956_v11  ;;  %3999 = vmatprep.mubr.msk.bf16.mxu1 %vm4564_vm0, %v4563_v10 }
 0x375   : > { %4009 = vmatprep.subr.bf16.mxu1 %v4563_v10 }
 0x37b   : > { %4000 = vmatmul.mubr.msk.bf16.vlgmr.msra.gmra.mrb[24].mxu1 %vm1173_vm1, %v1949_v13 }
 0x37c   : > { %4010 = vmatpush3.bf16.xpose.msra.mxu1 %v2087_v14  ;;  %4011 = vmatprep.mubr.msk.bf16.mxu1 %vm4564_vm0, %v4563_v10 }
 0x383   : > { %4012 = vmatmul.mubr.msk.bf16.vlgmr.msra.gmra.mrb[28].mxu1 %vm1173_vm1, %v2080_v15 }
 0x3b4   : > { %v1214_v17 = vpop.f32.mrb[8].mxu0 }
 0x3b5   : > { %v5026_v18 = vadd.f32 %v3674_v16, %v1214_v17  ;;  %v3929_v19 = vpop.f32.mrb[9].mxu0 }
 0x3b6   : > { %v1217_v22 = vpop.f32.mrb[10].mxu0 }
 0x3b7   : > { %v1218_v24 = vadd.f32 %v3674_v16, %v1217_v22  ;;  %v3930_v25 = vpop.f32.mrb[11].mxu0  ;;  %v1222_v26 = vsel %vm1221_vm2, %v5026_v18, -inf }
 0x3b8   : > { %1223 = vmax.xlane.f32.xlu0 %v1222_v26 }
 0x3b9   : > { %v1225_v27 = vsel %vm1221_vm2, %v1218_v24, -inf }
 0x3ba   : > { %1226 = vmax.xlane.f32.xlu1 %v1225_v27 }
 0x426   : > { %v1337_v28 = vpop.f32.mrb[4].mxu1 }
 0x427   : > { %v5031_v29 = vadd.f32 %v3674_v16, %v1337_v28  ;;  %v3941_v30 = vpop.f32.mrb[5].mxu1 }
 0x428   : > { %v1340_v31 = vpop.f32.mrb[6].mxu1 }
 0x429   : > { %v5033_v32 = vadd.f32 %v3674_v16, %v1340_v31  ;;  %v3942_v33 = vpop.f32.mrb[7].mxu1  ;;  %v1344_v34 = vsel %vm1221_vm2, %v5031_v29, -inf }
 0x42a   : > { %1345 = vmax.xlane.f32.xlu0 %v1344_v34 }
 0x42b   : > { %v1347_v35 = vsel %vm1221_vm2, %v5033_v32, -inf }
 0x42e   : > { %v1470_v36 = vpop.f32.mrb[8].mxu1  ;;  %1348 = vmax.xlane.f32.xlu0 %v1347_v35 }
 0x42f   : > { %v5039_v37 = vadd.f32 %v3674_v16, %v1470_v36  ;;  %v3953_v38 = vpop.f32.mrb[9].mxu1 }
 0x430   : > { %v1473_v39 = vpop.f32.mrb[10].mxu1 }
 0x431   : > { %v5041_v40 = vadd.f32 %v3674_v16, %v1473_v39  ;;  %v3954_v41 = vpop.f32.mrb[11].mxu1  ;;  %v1477_v42 = vsel %vm1221_vm2, %v5039_v37, -inf }
 0x432   : > { %1478 = vmax.xlane.f32.xlu1 %v1477_v42 }
 0x433   : > { %v1480_v43 = vsel %vm1221_vm2, %v5041_v40, -inf }
 0x434   : > { %1481 = vmax.xlane.f32.xlu0 %v1480_v43 }
 0x436   : > { %v1602_v44 = vpop.f32.mrb[12].mxu1 }
 0x437   : > { %v5047_v45 = vadd.f32 %v3674_v16, %v1602_v44  ;;  %v3965_v46 = vpop.f32.mrb[13].mxu1 }
 0x438   : > { %v1605_v47 = vpop.f32.mrb[14].mxu1 }
 0x439   : > { %v5049_v48 = vadd.f32 %v3674_v16, %v1605_v47  ;;  %v3966_v49 = vpop.f32.mrb[15].mxu1  ;;  %v1609_v50 = vsel %vm1221_vm2, %v5047_v45, -inf }
 0x43a   : > { %1610 = vmax.xlane.f32.xlu1 %v1609_v50 }
 0x43b   : > { %v1612_v51 = vsel %vm1221_vm2, %v5049_v48, -inf }
 0x43c   : > { %1613 = vmax.xlane.f32.xlu0 %v1612_v51 }
 0x43e   : > { %v1738_v52 = vpop.f32.mrb[16].mxu1 }
 0x43f   : > { %v3977_v54 = vpop.f32.mrb[17].mxu1  ;;  %v5081_v31 = vadd.f32 %v3684_v56, %v1738_v52 }
 0x440   : > { %v1741_v57 = vpop.f32.mrb[18].mxu1 }
 0x441   : > { %v5058_v58 = vadd.f32 %v3684_v56, %v1741_v57  ;;  %v3978_v59 = vpop.f32.mrb[19].mxu1  ;;  %v1745_v34 = vsel %vm1221_vm2, %v5081_v31, -inf }
 0x443   : > { %v1748_v60 = vsel %vm1221_vm2, %v5058_v58, -inf }
 0x444   : > { %1749 = vmax.xlane.f32.xlu0 %v1748_v60 }
 0x445   : > { %v1224_v27 = vpop.xlane.xlu0 %1223 }
 0x446   : > { %v1860_v61 = vpop.f32.mrb[20].mxu1  ;;  %v1228_v28 = vsub.f32 %v5026_v18, %v1224_v27 }
 0x447   : > { %v1227_v62 = vpop.xlane.xlu1 %1226  ;;  %v3989_v63 = vpop.f32.mrb[21].mxu1  ;;  %v5083_v33 = vadd.f32 %v3684_v56, %v1860_v61 }
 0x448   : > { %v1229_v0 = vsub.f32 %v1218_v24, %v1227_v62  ;;  %v1863_v1 = vpop.f32.mrb[22].mxu1  ;;  %v1230_v30 = vmul.f32 1.442695, %v1228_v28 }
 0x449   : > { %v5062_v2 = vadd.f32 %v3684_v56, %v1863_v1  ;;  %v3990_v3 = vpop.f32.mrb[23].mxu1  ;;  %v1867_v36 = vsel %vm1221_vm2, %v5083_v33, -inf }
 0x44a   : > { %v1232_v4 = vmul.f32 1.442695, %v1229_v0 }
 0x44b   : > { %1368 = vrot.lane.b32.xlu1 %v5004_v6, %s4566_s25  ;;  %v1870_v7 = vsel %vm1221_vm2, %v5062_v2, -inf }
 0x44c   : > { %4268 = vpow2.f32 %v1232_v4  ;;  %1871 = vmax.xlane.f32.xlu0 %v1870_v7 }
 0x44d   : > { %4270 = vpow2.f32 %v1230_v30 }
 0x44e   : > { %v1992_v8 = vpop.f32.mrb[24].mxu1 }
 0x44f   : > { %v4001_v9 = vpop.f32.mrb[25].mxu1  ;;  %v5087_v35 = vadd.f32 %v3684_v56, %v1992_v8 }
 0x450   : > { %v1995_v11 = vpop.f32.mrb[26].mxu1 }
 0x451   : > { %v5068_v12 = vadd.f32 %v3684_v56, %v1995_v11  ;;  %v4002_v13 = vpop.f32.mrb[27].mxu1  ;;  %v1999_v38 = vsel %vm1221_vm2, %v5087_v35, -inf }
 0x453   : > { %v2002_v14 = vsel %vm1221_vm2, %v5068_v12, -inf }
 0x454   : > { %2003 = vmax.xlane.f32.xlu0 %v2002_v14 }
 0x456   : > { %v5072_v15 = vpop.eup %4268  ;;  %v2123_v16 = vpop.f32.mrb[28].mxu1 }
 0x457   : > { %v4013_v17 = vpop.f32.mrb[29].mxu1  ;;  %v1237_v19 = vsel %vm1221_vm2, %v5072_v15, 0.0  ;;  %v5093_v18 = vpop.eup %4270  ;;  %v5095_v39 = vadd.f32 %v3684_v56, %v2123_v16 }
 0x458   : > { %v2126_v22 = vpop.f32.mrb[30].mxu1  ;;  %1238 = vadd.xlane.f32.xlu0 %v1237_v19  ;;  %v1234_v41 = vsel %vm1221_vm2, %v5093_v18, 0.0 }
 0x459   : > { %v5076_v24 = vadd.f32 %v3684_v56, %v2126_v22  ;;  %v4014_v25 = vpop.f32.mrb[31].mxu1  ;;  %v2130_v42 = vsel %vm1221_vm2, %v5095_v39, -inf }
 0x45b   : > { %v2133_v26 = vsel %vm1221_vm2, %v5076_v24, -inf }
 0x45c   : > { %2134 = vmax.xlane.f32.xlu0 %v2133_v26 }
 0x46f   : > { %1746 = vmax.xlane.f32.xlu1 %v1745_v34 }
 0x473   : > { %1868 = vmax.xlane.f32.xlu1 %v1867_v36 }
 0x477   : > { %2000 = vmax.xlane.f32.xlu1 %v1999_v38 }
 0x47b   : > { %1235 = vadd.xlane.f32.xlu1 %v1234_v41 }
 0x47f   : > { %2131 = vmax.xlane.f32.xlu1 %v2130_v42 }
 0x4b7   : > { %v1346_v43 = vpop.xlane.xlu0 %1345 }
 0x4b8   : > { %v1350_v44 = vsub.f32 %v5031_v29, %v1346_v43 }
 0x4ba   : > { %v1352_v46 = vmul.f32 1.442695, %v1350_v44 }
 0x4bb   : > { %v1349_v47 = vpop.xlane.xlu0 %1348 }
 0x4bc   : > { %4272 = vpow2.f32 %v1352_v46  ;;  %v1351_v49 = vsub.f32 %v5033_v32, %v1349_v47 }
 0x4be   : > { %v1354_v50 = vmul.f32 1.442695, %v1351_v49 }
 0x4bf   : > { %v1479_v29 = vpop.xlane.xlu1 %1478 }
 0x4c0   : > { %4274 = vpow2.f32 %v1354_v50  ;;  %v1483_v32 = vsub.f32 %v5039_v37, %v1479_v29 }
 0x4c1   : > { %v1482_v57 = vpop.xlane.xlu0 %1481 }
 0x4c2   : > { %v1484_v60 = vsub.f32 %v5041_v40, %v1482_v57  ;;  %v1485_v61 = vmul.f32 1.442695, %v1483_v32 }
 0x4c4   : > { %v1487_v0 = vmul.f32 1.442695, %v1484_v60  ;;  %4276 = vpow2.f32 %v1485_v61 }
 0x4c6   : > { %v5103_v51 = vpop.eup %4272  ;;  %4278 = vpow2.f32 %v1487_v0 }
 0x4c7   : > { %v1356_v52 = vsel %vm1221_vm2, %v5103_v51, 0.0  ;;  %v1611_v59 = vpop.xlane.xlu1 %1610 }
 0x4c8   : > { %1357 = vadd.xlane.f32.xlu1 %v1356_v52  ;;  %v1615_v62 = vsub.f32 %v5047_v45, %v1611_v59 }
 0x4c9   : > { %v1614_v63 = vpop.xlane.xlu0 %1613 }
 0x4ca   : > { %v5107_v54 = vpop.eup %4274  ;;  %v1617_v1 = vmul.f32 1.442695, %v1615_v62  ;;  %v1616_v3 = vsub.f32 %v5049_v48, %v1614_v63 }
 0x4cb   : > { %v1359_v56 = vsel %vm1221_vm2, %v5107_v54, 0.0  ;;  %v5120_v8 = vpop.permute.xlu1 %1368 }
 0x4cc   : > { %1360 = vadd.xlane.f32.xlu0 %v1359_v56  ;;  %4280 = vpow2.f32 %v1617_v1 }
 0x4ce   : > { %v5122_v9 = vpop.eup %4276 }
 0x4cf   : > { %v1489_v48 = vsel %vm1221_vm2, %v5122_v9, 0.0 }
 0x4d0   : > { %v5124_v45 = vpop.eup %4278 }
 0x4d1   : > { %v1750_v4 = vpop.xlane.xlu0 %1749  ;;  %v1492_v22 = vsel %vm1221_vm2, %v5124_v45, 0.0 }
 0x4d2   : > { %v1752_v7 = vsub.f32 %v5058_v58, %v1750_v4 }
 0x4d4   : > { %v1755_v37 = vmul.f32 1.442695, %v1752_v7 }
 0x4d6   : > { %v5128_v14 = vpop.eup %4280 }
 0x4d7   : > { %v1621_v25 = vsel %vm1221_vm2, %v5128_v14, 0.0 }
 0x4d9   : > { %1632 = vrot.lane.b32.xlu1 %v5004_v6, %s4567_s4  ;;  %v1872_v40 = vpop.xlane.xlu0 %1871 }
 0x4da   : > { %v1874_v58 = vsub.f32 %v5062_v2, %v1872_v40 }
 0x4dc   : > { %v1877_v30 = vmul.f32 1.442695, %v1874_v58 }
 0x4e1   : > { %v2004_v11 = vpop.xlane.xlu0 %2003 }
 0x4e2   : > { %1500 = vrot.lane.b32.xlu0 %v5004_v6, %s4565_s3  ;;  %v1619_v6 = vmul.f32 1.442695, %v1616_v3 }
 0x4e4   : > { %4282 = vpow2.f32 %v1619_v6 }
 0x4e5   : > { %4284 = vpow2.f32 %v1755_v37  ;;  %v1239_v28 = vpop.xlane.xlu0 %1238 }
 0x4e9   : > { %v2135_v42 = vpop.xlane.xlu0 %2134 }
 0x4ea   : > { %v2137_v44 = vsub.f32 %v5076_v24, %v2135_v42 }
 0x4ec   : > { %v2140_v52 = vmul.f32 1.442695, %v2137_v44 }
 0x4ee   : > { %v5136_v26 = vpop.eup %4282 }
 0x4ef   : > { %v1624_v36 = vsel %vm1221_vm2, %v5136_v26, 0.0  ;;  %v5142_v38 = vpop.eup %4284 }
 0x4f0   : > { %v1760_v43 = vsel %vm1221_vm2, %v5142_v38, 0.0 }
 0x4fc   : > { %v1747_v13 = vpop.xlane.xlu1 %1746 }
 0x4fd   : > { %v1751_v16 = vsub.f32 %v5081_v31, %v1747_v13  ;;  %1490 = vadd.xlane.f32.xlu1 %v1489_v48  ;;  %v2006_v31 = vsub.f32 %v5068_v12, %v2004_v11 }
 0x4ff   : > { %v1753_v17 = vmul.f32 1.442695, %v1751_v16  ;;  %v2009_v41 = vmul.f32 1.442695, %v2006_v31 }
 0x500   : > { %v1869_v19 = vpop.xlane.xlu1 %1868 }
 0x501   : > { %4286 = vpow2.f32 %v1753_v17  ;;  %v1873_v27 = vsub.f32 %v5083_v33, %v1869_v19  ;;  %1493 = vadd.xlane.f32.xlu0 %v1492_v22  ;;  %1622 = vadd.xlane.f32.xlu1 %v1621_v25 }
 0x503   : > { %v1875_v2 = vmul.f32 1.442695, %v1873_v27 }
 0x504   : > { %v2001_v34 = vpop.xlane.xlu1 %2000 }
 0x505   : > { %4288 = vpow2.f32 %v1875_v2  ;;  %1625 = vadd.xlane.f32.xlu0 %v1624_v36  ;;  %v2005_v3 = vsub.f32 %v5087_v35, %v2001_v34 }
 0x506   : > { %4290 = vpow2.f32 %v1877_v30 }
 0x507   : > { %4292 = vrcp.f32 %v1239_v28  ;;  %v2007_v4 = vmul.f32 1.442695, %v2005_v3 }
 0x508   : > { %v1236_v33 = vpop.xlane.xlu1 %1235 }
 0x509   : > { %1761 = vadd.xlane.f32.xlu0 %v1760_v43  ;;  %4294 = vrcp.f32 %v1236_v33 }
 0x50a   : > { %4296 = vpow2.f32 %v2009_v41 }
 0x50b   : > { %v5146_v12 = vpop.eup %4286 }
 0x50c   : > { %v2132_v46 = vpop.xlane.xlu1 %2131  ;;  %v1757_v47 = vsel %vm1221_vm2, %v5146_v12, 0.0 }
 0x50d   : > { %v2136_v49 = vsub.f32 %v5095_v39, %v2132_v46  ;;  %1758 = vadd.xlane.f32.xlu1 %v1757_v47 }
 0x50f   : > { %v5152_v50 = vpop.eup %4288  ;;  %v2138_v56 = vmul.f32 1.442695, %v2136_v49 }
 0x510   : > { %v1879_v29 = vsel %vm1221_vm2, %v5152_v50, 0.0  ;;  %v5156_v32 = vpop.eup %4290 }
 0x511   : > { %4298 = vpow2.f32 %v2138_v56  ;;  %1880 = vadd.xlane.f32.xlu0 %v1879_v29  ;;  %v4293_v57 = vpop.eup %4292  ;;  %v1882_v59 = vsel %vm1221_vm2, %v5156_v32, 0.0 }
 0x512   : > { %4300 = vpow2.f32 %v2140_v52  ;;  %v1243_v39 = vmul.f32 %v4293_v57, %v5072_v15 }
 0x513   : > { %v4295_v24 = vpop.eup %4294  ;;  %4302 = vpow2.f32 %v2007_v4 }
 0x514   : > { %v5160_v60 = vpop.eup %4296  ;;  %v1242_v61 = vmul.f32 %v4295_v24, %v5093_v18 }
 0x515   : > { %1883 = vadd.xlane.f32.xlu0 %v1882_v59  ;;  %v2014_v63 = vsel %vm1221_vm2, %v5160_v60, 0.0 }
 0x516   : > { %v1244_v62 = vpack.c.bf16 %v1243_v39, %v1242_v61 }
 0x518   : > { %3934 = vmatmul.mubr.msk.bf16.vlgmr.msra.gmra.mrb[12].mxu0 %vm1221_vm2, %v1244_v62 }
 0x519   : > { %2015 = vadd.xlane.f32.xlu0 %v2014_v63  ;;  %3944 = vmatpush3.bf16.msra.mxu0 %v5120_v8 }
 0x51a   : > { %3945 = vmatprep.mubr.msk.bf16.mxu0 %vm4564_vm0, %v4563_v10  ;;  %3955 = vmatprep.subr.bf16.mxu0 %v4563_v10 }
 0x51b   : > { %v5170_v0 = vpop.eup %4298 }
 0x51c   : > { %v2142_v15 = vsel %vm1221_vm2, %v5170_v0, 0.0  ;;  %v5175_v18 = vpop.eup %4300 }
 0x51d   : > { %2143 = vadd.xlane.f32.xlu0 %v2142_v15  ;;  %v2145_v1 = vsel %vm1221_vm2, %v5175_v18, 0.0  ;;  %v5184_v6 = vpop.eup %4302 }
 0x51e   : > { %1891 = vrot.lane.b32.xlu1 %v5002_v5, %s4566_s25  ;;  %v2011_v7 = vsel %vm1221_vm2, %v5184_v6, 0.0 }
 0x521   : > { %2146 = vadd.xlane.f32.xlu0 %v2145_v1 }
 0x537   : > { %2022 = vrot.lane.b32.xlu0 %v5002_v5, %s4565_s3 }
 0x542   : > { %2012 = vadd.xlane.f32.xlu1 %v2011_v7 }
 0x553   : > { %2153 = vrot.lane.b32.xlu1 %v5002_v5, %s4567_s4 }
 0x555   : > { %v1358_v37 = vpop.xlane.xlu1 %1357 }
 0x556   : > { %4304 = vrcp.f32 %v1358_v37 }
 0x559   : > { %v1361_v8 = vpop.xlane.xlu0 %1360  ;;  %v1633_v58 = vpop.permute.xlu1 %1632 }
 0x55a   : > { %4306 = vrcp.f32 %v1361_v8 }
 0x55d   : > { %v1501_v16 = vpop.permute.xlu0 %1500 }
 0x560   : > { %v4305_v40 = vpop.eup %4304 }
 0x561   : > { %v1364_v11 = vmul.f32 %v4305_v40, %v5103_v51 }
 0x564   : > { %v4307_v35 = vpop.eup %4306 }
 0x565   : > { %v1365_v13 = vmul.f32 %v4307_v35, %v5107_v54 }
 0x567   : > { %v1366_v48 = vpack.c.bf16 %v1365_v13, %v1364_v11 }
 0x569   : > { %3946 = vmatmul.mubr.msk.bf16.vlgmr.msra.gmra.mrb[16].mxu0 %vm1221_vm2, %v1366_v48 }
 0x56a   : > { %3956 = vmatpush3.bf16.msra.mxu0 %v1501_v16  ;;  %3957 = vmatprep.mubr.msk.bf16.mxu0 %vm4564_vm0, %v4563_v10 }
 0x56b   : > { %3967 = vmatprep.subr.bf16.mxu0 %v4563_v10 }
 0x58a   : > { %v1491_v17 = vpop.xlane.xlu1 %1490 }
 0x58b   : > { %4308 = vrcp.f32 %v1491_v17 }
 0x58e   : > { %v1494_v19 = vpop.xlane.xlu0 %1493  ;;  %v1623_v22 = vpop.xlane.xlu1 %1622 }
 0x58f   : > { %4310 = vrcp.f32 %v1494_v19 }
 0x592   : > { %v1626_v25 = vpop.xlane.xlu0 %1625 }
 0x593   : > { %4312 = vrcp.f32 %v1626_v25  ;;  %v4181_v25 = vld [vmem:[%s4856_s16 + $0x8] sm:$0xff]  }
 0x594   : > { %4314 = vrcp.f32 %v1623_v22  ;;  %v4180_v22 = vld [vmem:[%s4856_s16] sm:$0xff]  }
 0x595   : > { %v4309_v51 = vpop.eup %4308  ;;  %4021 = vmatprep.subr.bf16.mxu1 %v4180_v22 }
 0x596   : > { %v1497_v27 = vmul.f32 %v4309_v51, %v5122_v9  ;;  %v1762_v30 = vpop.xlane.xlu0 %1761  ;;  %4022 = vmatpush3.bf16.msra.mxu1 %v4180_v22  ;;  %v4188_v22 = vld [vmem:[%s4879_s6] ss:$16 sps:$4 sm:$0xff]  }
 0x597   : > { %4023 = vmatprep.subr.bf16.mxu1 %v4181_v25 }
 0x599   : > { %v4311_v54 = vpop.eup %4310 }
 0x59a   : > { %v1498_v28 = vmul.f32 %v4311_v54, %v5124_v45  ;;  %v1759_v31 = vpop.xlane.xlu1 %1758  ;;  %4024 = vmatpush3.bf16.msra.mxu1 %v4181_v25  ;;  %v4190_v25 = vld [vmem:[%s4879_s6 + $0x4] ss:$16 sps:$4 sm:$0xff]  }
 0x59b   : > { %4316 = vrcp.f32 %v1759_v31 }
 0x59c   : > { %v1499_v2 = vpack.c.bf16 %v1498_v28, %v1497_v27  ;;  %4318 = vrcp.f32 %v1762_v30  ;;  %v4182_v28 = vld [vmem:[%s4856_s16 + $0x10] sm:$0xff]  }
 0x59d   : > { %v4313_v34 = vpop.eup %4312  ;;  %4025 = vmatprep.subr.bf16.mxu1 %v4182_v28 }
 0x59e   : > { %v1881_v36 = vpop.xlane.xlu0 %1880  ;;  %3958 = vmatmul.mubr.msk.bf16.vlgmr.msra.gmra.mrb[20].mxu0 %vm1221_vm2, %v1499_v2  ;;  %v4315_v41 = vpop.eup %4314  ;;  %v1630_v42 = vmul.f32 %v4313_v34, %v5136_v26  ;;  %4026 = vmatpush3.bf16.msra.mxu1 %v4182_v28  ;;  %v4199_v28 = vld [vmem:[%s4879_s6 + $0x2c] ss:$16 sps:$4 sm:$0xff]  }
 0x59f   : > { %3968 = vmatpush3.bf16.msra.mxu0 %v1633_v58  ;;  %3969 = vmatprep.mubr.msk.bf16.mxu0 %vm4564_vm0, %v4563_v10  ;;  %v1629_v9 = vmul.f32 %v4315_v41, %v5128_v14  ;;  %v1892_v56 = vpop.permute.xlu1 %1891  ;;  %v4183_v41 = vld [vmem:[%s4856_s16 + $0x18] sm:$0xff]  }
 0x5a0   : > { %3979 = vmatprep.subr.bf16.mxu0 %v4563_v10  ;;  %4027 = vmatprep.subr.bf16.mxu1 %v4183_v41 }
 0x5a1   : > { %v1631_v33 = vpack.c.bf16 %v1630_v42, %v1629_v9  ;;  %v4184_v42 = vld [vmem:[%s4856_s16 + $0x20] sm:$0xff]   ;;  %v4185_v9 = vld [vmem:[%s4856_s16 + $0x28] sm:$0xff]  }
 0x5a2   : > { %v1884_v45 = vpop.xlane.xlu0 %1883  ;;  %4028 = vmatpush3.bf16.msra.mxu1 %v4183_v41 }
 0x5a3   : > { %4320 = vrcp.f32 %v1884_v45  ;;  %4029 = vmatprep.subr.bf16.mxu1 %v4184_v42 }
 0x5a4   : > { %4322 = vrcp.f32 %v1881_v36 }
 0x5a5   : > { %v4317_v43 = vpop.eup %4316 }
 0x5a6   : > { %v2016_v44 = vpop.xlane.xlu0 %2015  ;;  %3970 = vmatmul.mubr.msk.bf16.vlgmr.msra.gmra.mrb[24].mxu0 %vm1221_vm2, %v1631_v33  ;;  %v4319_v46 = vpop.eup %4318  ;;  %v1765_v26 = vmul.f32 %v4317_v43, %v5146_v12  ;;  %4030 = vmatpush3.bf16.msra.mxu1 %v4184_v42  ;;  %v4186_v33 = vld [vmem:[%s4856_s16 + $0x30] sm:$0xff]  }
 0x5a7   : > { %3980 = vmatpush3.bf16.msra.mxu0 %v5002_v5  ;;  %3981 = vmatprep.mubr.msk.bf16.mxu0 %vm4564_vm0, %v4563_v10  ;;  %v1766_v14 = vmul.f32 %v4319_v46, %v5142_v38  ;;  %4324 = vrcp.f32 %v2016_v44  ;;  %v4187_v44 = vld [vmem:[%s4856_s16 + $0x38] sm:$0xff]  }
 0x5a8   : > { %3991 = vmatprep.subr.bf16.mxu0 %v4563_v10  ;;  %4031 = vmatprep.subr.bf16.mxu1 %v4185_v9 }
 0x5a9   : > { %v1767_v49 = vpack.c.bf16 %v1766_v14, %v1765_v26 }
 0x5aa   : > { %v2144_v47 = vpop.xlane.xlu0 %2143  ;;  %4032 = vmatpush3.bf16.msra.mxu1 %v4185_v9 }
 0x5ab   : > { %4033 = vmatprep.subr.bf16.mxu1 %v4186_v33 }
 0x5ad   : > { %v4321_v52 = vpop.eup %4320 }
 0x5ae   : > { %3982 = vmatmul.mubr.msk.bf16.vlgmr.msra.gmra.mrb[28].mxu0 %vm1221_vm2, %v1767_v49  ;;  %v4323_v29 = vpop.eup %4322  ;;  %v1888_v5 = vmul.f32 %v4321_v52, %v5156_v32  ;;  %v2147_v57 = vpop.xlane.xlu0 %2146  ;;  %4034 = vmatpush3.bf16.msra.mxu1 %v4186_v33 }
 0x5af   : > { %3992 = vmatpush3.bf16.msra.mxu0 %v1892_v56  ;;  %3993 = vmatprep.mubr.msk.bf16.mxu0 %vm4564_vm0, %v4563_v10  ;;  %v1887_v12 = vmul.f32 %v4323_v29, %v5152_v50 }
 0x5b0   : > { %4003 = vmatprep.subr.bf16.mxu0 %v4563_v10  ;;  %4035 = vmatprep.subr.bf16.mxu1 %v4187_v44 }
 0x5b1   : > { %v1889_v24 = vpack.c.bf16 %v1888_v5, %v1887_v12  ;;  %v4325_v32 = vpop.eup %4324 }
 0x5b2   : > { %v2023_v38 = vpop.permute.xlu0 %2022  ;;  %v2020_v61 = vmul.f32 %v4325_v32, %v5160_v60  ;;  %4036 = vmatpush3.bf16.msra.mxu1 %v4187_v44 }
 0x5b6   : > { %3994 = vmatmul.mubr.msk.bf16.vlgmr.msra.gmra.mrb[32].mxu0 %vm1221_vm2, %v1889_v24 }
 0x5b7   : > { %4004 = vmatpush3.bf16.msra.mxu0 %v2023_v38  ;;  %4005 = vmatprep.mubr.msk.bf16.mxu0 %vm4564_vm0, %v4563_v10 }
 0x5b8   : > { %4015 = vmatprep.subr.bf16.mxu0 %v4563_v10 }
 0x5cf   : > { %v2013_v59 = vpop.xlane.xlu1 %2012 }
 0x5d0   : > { %4326 = vrcp.f32 %v2013_v59 }
 0x5d1   : > { %4328 = vrcp.f32 %v2147_v57 }
 0x5d2   : > { %4330 = vrcp.f32 %v2144_v47 }
 0x5d3   : > { %v2154_v15 = vpop.permute.xlu1 %2153 }
 0x5da   : > { %v4327_v39 = vpop.eup %4326 }
 0x5db   : > { %v2019_v50 = vmul.f32 %v4327_v39, %v5184_v6  ;;  %v4329_v63 = vpop.eup %4328 }
 0x5dc   : > { %v4331_v1 = vpop.eup %4330  ;;  %v2151_v3 = vmul.f32 %v4329_v63, %v5175_v18 }
 0x5dd   : > { %v2021_v62 = vpack.c.bf16 %v2020_v61, %v2019_v50  ;;  %v2150_v4 = vmul.f32 %v4331_v1, %v5170_v0 }
 0x5df   : > { %4006 = vmatmul.mubr.msk.bf16.vlgmr.msra.gmra.mrb[36].mxu0 %vm1221_vm2, %v2021_v62  ;;  %v2152_v7 = vpack.c.bf16 %v2151_v3, %v2150_v4 }
 0x5e0   : > { %4016 = vmatpush3.bf16.msra.mxu0 %v2154_v15  ;;  %4017 = vmatprep.mubr.msk.bf16.mxu0 %vm4564_vm0, %v4563_v10 }
 0x5e1   : > { %2623 = vmatprep.subr.bf16.mxu0 %v4190_v25 }
 0x5e7   : > { %4018 = vmatmul.mubr.msk.bf16.vlgmr.msra.gmra.mrb[40].mxu0 %vm1221_vm2, %v2152_v7  ;;  %v3693_v7 = vld [vmem:[%s5653_s22] ss:$0 sm:$0xff] }
 0x5e8   : > { %2655 = vmatprep.mubr.bf16.mxu0 %v4562_v53  ;;  %2624 = vmatpush1.bf16.msra.mxu0 %v4188_v22 }
 0x5eb   : > { %v1282_v60 = vpop.f32.mrb[12].mxu0 }
 0x5ec   : > { %1289 = vst.msk [vmem:[#allocation3] sm:$0xff] %vm1173_vm1, %v1282_v60  ;;  %v3935_v6 = vpop.f32.mrb[13].mxu0 }
 0x5ed   : > { %v1285_v37 = vpop.f32.mrb[14].mxu0 }
 0x5ee   : > { %1290 = vst.msk [vmem:[#allocation3 + $0x8] sm:$0xff] %vm1173_vm1, %v1285_v37  ;;  %v3936_v8 = vpop.f32.mrb[15].mxu0 }
 0x63c   : > { %v1408_v40 = vpop.f32.mrb[16].mxu0 }
 0x63d   : > { %1417 = vrot.lane.b32.xlu1 %v1408_v40, %s4567_s4  ;;  %v3947_v10 = vpop.f32.mrb[17].mxu0 }
 0x63e   : > { %v1411_v18 = vpop.f32.mrb[18].mxu0 }
 0x63f   : > { %v3948_v0 = vpop.f32.mrb[19].mxu0 }
 0x640   : > { %v4380_v0 = vld [vmem:[#allocation2] sm:$0xff] }
 0x641   : > { %1419 = vrot.lane.b32.xlu1 %v1411_v18, %s4567_s4 }
 0x671   : > { %v1540_v35 = vpop.f32.mrb[20].mxu0 }
 0x672   : > { %1549 = vrot.lane.b32.xlu1 %v1540_v35, %s4565_s3  ;;  %v3959_v11 = vpop.f32.mrb[21].mxu0 }
 0x673   : > { %v1543_v13 = vpop.f32.mrb[22].mxu0  ;;  %v4381_v11 = vld [vmem:[#allocation2 + $0x8] sm:$0xff] }
 0x674   : > { %v3960_v48 = vpop.f32.mrb[23].mxu0 }
 0x676   : > { %1551 = vrot.lane.b32.xlu1 %v1543_v13, %s4565_s3 }
 0x679   : > { %v1672_v16 = vpop.f32.mrb[24].mxu0 }
 0x67a   : > { %1681 = vrot.lane.b32.xlu0 %v1672_v16, %s4566_s25  ;;  %v3971_v58 = vpop.f32.mrb[25].mxu0  ;;  %v4382_v16 = vld [vmem:[#allocation2 + $0x10] sm:$0xff] }
 0x67b   : > { %v1675_v17 = vpop.f32.mrb[26].mxu0 }
 0x67c   : > { %1683 = vrot.lane.b32.xlu1 %v1675_v17, %s4566_s25  ;;  %v3972_v19 = vpop.f32.mrb[27].mxu0  ;;  %v4383_v17 = vld [vmem:[#allocation2 + $0x18] sm:$0xff] }
 0x681   : > { %v1805_v51 = vpop.f32.mrb[28].mxu0 }
 0x682   : > { %1812 = vst.msk [vmem:[#allocation3 + $0x10] sm:$0xff] %vm1173_vm1, %v1805_v51  ;;  %v3983_v54 = vpop.f32.mrb[29].mxu0  ;;  %v4191_v51 = vld [vmem:[%s4879_s6 + $0x8] ss:$16 sps:$4 sm:$0xff]  }
 0x683   : > { %v1808_v27 = vpop.f32.mrb[30].mxu0  ;;  %v4193_v54 = vld [vmem:[%s4879_s6 + $0xc] ss:$16 sps:$4 sm:$0xff]  }
 0x684   : > { %1813 = vst.msk [vmem:[#allocation3 + $0x18] sm:$0xff] %vm1173_vm1, %v1808_v27  ;;  %v3984_v30 = vpop.f32.mrb[31].mxu0  ;;  %v4196_v27 = vld [vmem:[%s4879_s6 + $0x24] ss:$16 sps:$4 sm:$0xff]   ;;  %2676 = vmatprep.subr.bf16.mxu1 %v4193_v54 }
 0x685   : > { %v4194_v30 = vld [vmem:[%s4879_s6 + $0x20] ss:$16 sps:$4 sm:$0xff]   ;;  %2625 = vmatprep.subr.bf16.mxu0 %v4196_v27 }
 0x686   : > { %2626 = vmatpush1.bf16.msra.mxu0 %v4194_v30 }
 0x689   : > { %v1931_v31 = vpop.f32.mrb[32].mxu0 }
 0x68a   : > { %1940 = vrot.lane.b32.xlu0 %v1931_v31, %s4567_s4  ;;  %v3995_v2 = vpop.f32.mrb[33].mxu0  ;;  %v4197_v31 = vld [vmem:[%s4879_s6 + $0x28] ss:$16 sps:$4 sm:$0xff]  }
 0x68b   : > { %v1934_v34 = vpop.f32.mrb[34].mxu0 }
 0x68c   : > { %1942 = vrot.lane.b32.xlu1 %v1934_v34, %s4567_s4  ;;  %v3996_v36 = vpop.f32.mrb[35].mxu0 }
 0x6af   : > { %v1418_v45 = vpop.permute.xlu1 %1417 }
 0x6b0   : > { %1424 = vst.msk [vmem:[#allocation3] sm:$0xff] %vm1423_vm3, %v1418_v45 }
 0x6b2   : > { %v2062_v43 = vpop.f32.mrb[36].mxu0 }
 0x6b3   : > { %v1420_v46 = vpop.permute.xlu1 %1419  ;;  %2071 = vrot.lane.b32.xlu0 %v2062_v43, %s4565_s3  ;;  %v4007_v26 = vpop.f32.mrb[37].mxu0 }
 0x6b4   : > { %1425 = vst.msk [vmem:[#allocation3 + $0x8] sm:$0xff] %vm1423_vm3, %v1420_v46  ;;  %v2065_v14 = vpop.f32.mrb[38].mxu0 }
 0x6b5   : > { %2073 = vrot.lane.b32.xlu1 %v2065_v14, %s4565_s3  ;;  %v4008_v47 = vpop.f32.mrb[39].mxu0 }
 0x6ba   : > { %v2193_v49 = vpop.f32.mrb[40].mxu0 }
 0x6bb   : > { %2202 = vrot.lane.b32.xlu0 %v2193_v49, %s4566_s25  ;;  %v4019_v52 = vpop.f32.mrb[41].mxu0 }
 0x6bc   : > { %v2196_v56 = vpop.f32.mrb[42].mxu0 }
 0x6bd   : > { %2204 = vrot.lane.b32.xlu1 %v2196_v56, %s4566_s25  ;;  %v4020_v29 = vpop.f32.mrb[43].mxu0  ;;  %v4202_v56 = vld [vmem:[%s4879_s6 + $0x44] ss:$16 sps:$4 sm:$0xff]   ;;  %s5655_s25 = scalar_lea.vmem %s5592_s9, %s4849_s1 }
 0x6be   : > { %v4205_v29 = vld [vmem:[%s4879_s6 + $0x4c] ss:$16 sps:$4 sm:$0xff]   ;;  %2627 = vmatprep.subr.bf16.mxu0 %v4202_v56  ;;  %v4239_v56 = vld [vmem:[%s4837_s18 + $0x80] sm:$0xff]  }
 0x6e4   : > { %v1550_v5 = vpop.permute.xlu1 %1549 }
 0x6e5   : > { %1556 = vst.msk [vmem:[#allocation3] sm:$0xff] %vm1555_vm4, %v1550_v5  ;;  %v4200_v5 = vld [vmem:[%s4879_s6 + $0x40] ss:$16 sps:$4 sm:$0xff]  }
 0x6e6   : > { %2628 = vmatpush1.bf16.msra.mxu0 %v4200_v5  ;;  %v4242_v5 = vld [vmem:[%s4837_s18 + $0x8] sm:$0xff]  }
 0x6e8   : > { %v1552_v57 = vpop.permute.xlu1 %1551 }
 0x6e9   : > { %1557 = vst.msk [vmem:[#allocation3 + $0x8] sm:$0xff] %vm1555_vm4, %v1552_v57  ;;  %v4203_v57 = vld [vmem:[%s4879_s6 + $0x48] ss:$16 sps:$4 sm:$0xff]  }
 0x6ec   : > { %v1682_v12 = vpop.permute.xlu0 %1681 }
 0x6ed   : > { %1688 = vst.msk [vmem:[#allocation3] sm:$0xff] %vm1687_vm5, %v1682_v12  ;;  %v4208_v12 = vld [vmem:[%s4879_s6 + $0x64] ss:$16 sps:$4 sm:$0xff]  }
 0x6ee   : > { %v1684_v24 = vpop.permute.xlu1 %1683  ;;  %2629 = vmatprep.subr.bf16.mxu0 %v4208_v12  ;;  %v4244_v12 = vld [vmem:[%s4837_s18 + $0x50] sm:$0xff]  }
 0x6ef   : > { %1689 = vst.msk [vmem:[#allocation3 + $0x8] sm:$0xff] %vm1687_vm5, %v1684_v24  ;;  %v4211_v24 = vld [vmem:[%s4879_s6 + $0x6c] ss:$16 sps:$4 sm:$0xff]  }
 0x6f4   : > { %v2210_v38 = vld [vmem:[#allocation3] sm:$0xff] }
 0x6f6   : > { %v2211_v59 = vld [vmem:[#allocation3 + $0x8] sm:$0xff] }
 0x6f7   : > { %v2214_v32 = vpack.c.bf16 %v2211_v59, %v2210_v38  ;;  %v4206_v38 = vld [vmem:[%s4879_s6 + $0x60] ss:$16 sps:$4 sm:$0xff]   ;;  %v4209_v59 = vld [vmem:[%s4879_s6 + $0x68] ss:$16 sps:$4 sm:$0xff]  }
 0x6f8   : > { %2630 = vmatpush1.bf16.msra.mxu0 %v4206_v38  ;;  %v4246_v38 = vld [vmem:[%s4837_s18 + $0x10] sm:$0xff]  }
 0x6f9   : > { %4037 = vmatprep.mubr.bf16.mxu1 %v2214_v32  ;;  %v4214_v32 = vld [vmem:[%s4879_s6 + $0x84] ss:$16 sps:$4 sm:$0xff]  }
 0x6fa   : > { %2631 = vmatprep.subr.bf16.mxu0 %v4214_v32  ;;  %v4248_v32 = vld [vmem:[%s4837_s18 + $0x58] sm:$0xff]  }
 0x6fc   : > { %v1941_v39 = vpop.permute.xlu0 %1940 }
 0x6fd   : > { %1946 = vst.msk [vmem:[#allocation3 + $0x10] sm:$0xff] %vm1423_vm3, %v1941_v39  ;;  %v4217_v39 = vld [vmem:[%s4879_s6 + $0x8c] ss:$16 sps:$4 sm:$0xff]  }
 0x6fe   : > { %v1943_v61 = vpop.permute.xlu1 %1942 }
 0x6ff   : > { %1947 = vst.msk [vmem:[#allocation3 + $0x18] sm:$0xff] %vm1423_vm3, %v1943_v61  ;;  %v4212_v61 = vld [vmem:[%s4879_s6 + $0x80] ss:$16 sps:$4 sm:$0xff]  }
 0x700   : > { %2632 = vmatpush1.bf16.msra.mxu0 %v4212_v61  ;;  %v4250_v61 = vld [vmem:[%s4837_s18 + $0x18] sm:$0xff]  }
 0x725   : > { %v2072_v50 = vpop.permute.xlu0 %2071 }
 0x726   : > { %2077 = vst.msk [vmem:[#allocation3 + $0x10] sm:$0xff] %vm1555_vm4, %v2072_v50  ;;  %v4215_v50 = vld [vmem:[%s4879_s6 + $0x88] ss:$16 sps:$4 sm:$0xff]  }
 0x727   : > { %v2074_v62 = vpop.permute.xlu1 %2073 }
 0x728   : > { %2078 = vst.msk [vmem:[#allocation3 + $0x18] sm:$0xff] %vm1555_vm4, %v2074_v62  ;;  %v4220_v62 = vld [vmem:[%s4879_s6 + $0xa4] ss:$16 sps:$4 sm:$0xff]  }
 0x729   : > { %2633 = vmatprep.subr.bf16.mxu0 %v4220_v62  ;;  %v4252_v62 = vld [vmem:[%s4837_s18 + $0x60] sm:$0xff]  }
 0x72d   : > { %v2203_v63 = vpop.permute.xlu0 %2202 }
 0x72e   : > { %2208 = vst.msk [vmem:[#allocation3 + $0x10] sm:$0xff] %vm1687_vm5, %v2203_v63  ;;  %v4223_v63 = vld [vmem:[%s4879_s6 + $0xac] ss:$16 sps:$4 sm:$0xff]  }
 0x72f   : > { %v2205_v15 = vpop.permute.xlu1 %2204 }
 0x730   : > { %2209 = vst.msk [vmem:[#allocation3 + $0x18] sm:$0xff] %vm1687_vm5, %v2205_v15  ;;  %v4218_v15 = vld [vmem:[%s4879_s6 + $0xa0] ss:$16 sps:$4 sm:$0xff]  }
 0x731   : > { %2634 = vmatpush1.bf16.msra.mxu0 %v4218_v15  ;;  %v4254_v15 = vld [vmem:[%s4837_s18 + $0x20] sm:$0xff]  }
 0x735   : > { %v2212_v1 = vld [vmem:[#allocation3 + $0x10] sm:$0xff] }
 0x737   : > { %v2213_v3 = vld [vmem:[#allocation3 + $0x18] sm:$0xff] }
 0x738   : > { %v2215_v4 = vpack.c.bf16 %v2213_v3, %v2212_v1  ;;  %v4221_v1 = vld [vmem:[%s4879_s6 + $0xa8] ss:$16 sps:$4 sm:$0xff]   ;;  %v4224_v3 = vld [vmem:[%s4879_s6 + $0xc0] ss:$16 sps:$4 sm:$0xff]  }
 0x73a   : > { %4038 = vmatmul.mubr.bf16.vlgmr.msra.gmra.mrb[32].mxu1 %v2215_v4  ;;  %v4226_v4 = vld [vmem:[%s4879_s6 + $0xc4] ss:$16 sps:$4 sm:$0xff]  }
 0x73b   : > { %2708 = vmatprep.mubr.bf16.mxu1 %v4562_v53  ;;  %2677 = vmatpush1.bf16.msra.mxu1 %v4191_v51  ;;  %v3702_v51 = vld [vmem:[%s5654_s21] ss:$0 sm:$0xff] }
 0x73c   : > { %2678 = vmatprep.subr.bf16.mxu1 %v4199_v28  ;;  %2635 = vmatprep.subr.bf16.mxu0 %v4226_v4  ;;  %v4257_v4 = vld [vmem:[%s4837_s18 + $0xe8] sm:$0xff]  }
 0x73d   : > { %2636 = vmatpush1.bf16.msra.mxu0 %v4224_v3  ;;  %v4256_v3 = vld [vmem:[%s4837_s18 + $0x68] sm:$0xff]  }
 0x73f   : > { %2679 = vmatpush1.bf16.msra.mxu1 %v4197_v31 }
 0x740   : > { %2680 = vmatprep.subr.bf16.mxu1 %v4205_v29  ;;  %v4241_v29 = vld [vmem:[%s4837_s18 + $0xc8] sm:$0xff]  }
 0x743   : > { %2681 = vmatpush1.bf16.msra.mxu1 %v4203_v57  ;;  %v4243_v57 = vld [vmem:[%s4837_s18 + $0x88] sm:$0xff]  }
 0x744   : > { %2682 = vmatprep.subr.bf16.mxu1 %v4211_v24  ;;  %v4245_v24 = vld [vmem:[%s4837_s18 + $0xd0] sm:$0xff]  }
 0x747   : > { %2683 = vmatpush1.bf16.msra.mxu1 %v4209_v59  ;;  %v4247_v59 = vld [vmem:[%s4837_s18 + $0x90] sm:$0xff]  }
 0x748   : > { %2684 = vmatprep.subr.bf16.mxu1 %v4217_v39  ;;  %v4249_v39 = vld [vmem:[%s4837_s18 + $0xd8] sm:$0xff]  }
 0x74b   : > { %2685 = vmatpush1.bf16.msra.mxu1 %v4215_v50  ;;  %v4251_v50 = vld [vmem:[%s4837_s18 + $0x98] sm:$0xff]  }
 0x74c   : > { %2686 = vmatprep.subr.bf16.mxu1 %v4223_v63  ;;  %v4253_v63 = vld [vmem:[%s4837_s18 + $0xe0] sm:$0xff]  }
 0x74f   : > { %2687 = vmatpush1.bf16.msra.mxu1 %v4221_v1  ;;  %v4255_v1 = vld [vmem:[%s4837_s18 + $0xa0] sm:$0xff]  }
 0x80d   : > { %v4039_v60 = vpop.f32.mrb[32].mxu1 }
 0x80e   : > { %v2321_v6 = vpop.f32.mrb[33].mxu1  ;;  %v2330_v10 = vadd.f32 %v4039_v60, %v3693_v7  ;;  %v4229_v60 = vld [vmem:[%s4879_s6 + $0xcc] ss:$16 sps:$4 sm:$0xff]  }
 0x80f   : > { %v2322_v37 = vadd.f32 %v3693_v7, %v2321_v6  ;;  %v4040_v8 = vpop.f32.mrb[34].mxu1  ;;  %v4232_v6 = vld [vmem:[%s4879_s6 + $0xe4] ss:$16 sps:$4 sm:$0xff]   ;;  %2688 = vmatprep.subr.bf16.mxu1 %v4229_v60  ;;  %v4259_v60 = vld [vmem:[%s4837_s18 + $0xa8] sm:$0xff]  }
 0x810   : > { %v2324_v40 = vpop.f32.mrb[35].mxu1  ;;  %v2333_v48 = vadd.f32 %v4040_v8, %v3693_v7  ;;  %v2338_v58 = vadd.f32 %v4382_v16, %v2330_v10  ;;  %v4230_v8 = vld [vmem:[%s4879_s6 + $0xe0] ss:$16 sps:$4 sm:$0xff]   ;;  %2637 = vmatprep.subr.bf16.mxu0 %v4232_v6 }
 0x811   : > { %v2325_v18 = vadd.f32 %v3693_v7, %v2324_v40  ;;  %v2336_v35 = vadd.f32 %v4380_v0, %v2322_v37  ;;  %v4227_v7 = vld [vmem:[%s4879_s6 + $0xc8] ss:$16 sps:$4 sm:$0xff]   ;;  %v4235_v37 = vld [vmem:[%s4879_s6 + $0xec] ss:$16 sps:$4 sm:$0xff]   ;;  %2638 = vmatpush1.bf16.msra.mxu0 %v4230_v8  ;;  %v4260_v6 = vld [vmem:[%s4837_s18 + $0x70] sm:$0xff]  }
 0x812   : > { %v2339_v19 = vadd.f32 %v4383_v17, %v2333_v48  ;;  %2689 = vmatpush1.bf16.msra.mxu1 %v4227_v7  ;;  %v4233_v40 = vld [vmem:[%s4879_s6 + $0xe8] ss:$16 sps:$4 sm:$0xff]   ;;  %v4262_v8 = vld [vmem:[%s4837_s18 + $0x30] sm:$0xff]  }
 0x813   : > { %2342 = vadd.xlane.f32.xlu0 %v2336_v35  ;;  %v2337_v13 = vadd.f32 %v4381_v11, %v2325_v18  ;;  %2690 = vmatprep.subr.bf16.mxu1 %v4235_v37  ;;  %v4258_v7 = vld [vmem:[%s4837_s18 + $0x28] sm:$0xff]   ;;  %v4261_v37 = vld [vmem:[%s4837_s18 + $0xf0] sm:$0xff]  }
 0x815   : > { %2344 = vadd.xlane.f32.xlu1 %v2337_v13 }
 0x816   : > { %2691 = vmatpush1.bf16.msra.mxu1 %v4233_v40  ;;  %v4263_v40 = vld [vmem:[%s4837_s18 + $0xb0] sm:$0xff]  }
 0x817   : > { %2346 = vadd.xlane.f32.xlu0 %v2338_v58 }
 0x81b   : > { %2348 = vadd.xlane.f32.xlu0 %v2339_v19 }
 0x8a0   : > { %v2343_v2 = vpop.xlane.xlu0 %2342 }
 0x8a1   : > { %v2351_v34 = vmul.f32 0.0078125, %v2343_v2  ;;  %v3703_v2 = vld [vmem:[%s5655_s25] ss:$0 sm:$0xff] }
 0x8a2   : > { %v2345_v36 = vpop.xlane.xlu1 %2344 }
 0x8a3   : > { %v5280_v41 = vsub.f32 %v2336_v35, %v2351_v34  ;;  %v2352_v42 = vmul.f32 0.0078125, %v2345_v36 }
 0x8a4   : > { %v2347_v9 = vpop.xlane.xlu0 %2346 }
 0x8a5   : > { %v5282_v45 = vsub.f32 %v2337_v13, %v2352_v42  ;;  %v2353_v33 = vmul.f32 0.0078125, %v2347_v9  ;;  %v2359_v43 = vmul.f32 %v5280_v41, %v5280_v41 }
 0x8a7   : > { %v5286_v44 = vsub.f32 %v2338_v58, %v2353_v33  ;;  %2363 = vadd.xlane.f32.xlu1 %v2359_v43  ;;  %v2360_v46 = vmul.f32 %v5282_v45, %v5282_v45 }
 0x8a8   : > { %v2349_v26 = vpop.xlane.xlu0 %2348 }
 0x8a9   : > { %v2354_v14 = vmul.f32 0.0078125, %v2349_v26  ;;  %2365 = vadd.xlane.f32.xlu0 %v2360_v46  ;;  %v2361_v47 = vmul.f32 %v5286_v44, %v5286_v44 }
 0x8ab   : > { %v5292_v49 = vsub.f32 %v2339_v19, %v2354_v14  ;;  %2367 = vadd.xlane.f32.xlu1 %v2361_v47  ;;  %v4236_v47 = vld [vmem:[%s4837_s18 + $0x40] sm:$0xff]  }
 0x8ac   : > { %3840 = vmatprep.subr.bf16.mxu0 %v4236_v47 }
 0x8ad   : > { %v2362_v52 = vmul.f32 %v5292_v49, %v5292_v49 }
 0x8af   : > { %2369 = vadd.xlane.f32.xlu0 %v2362_v52  ;;  %v4238_v52 = vld [vmem:[%s4837_s18] sm:$0xff]  }
 0x934   : > { %v2364_v10 = vpop.xlane.xlu1 %2363 }
 0x935   : > { %v2371_v18 = vmul.f32 0.0078125, %v2364_v10  ;;  %v4264_v10 = vld [vmem:[%s4837_s18 + $0x78] sm:$0xff]  }
 0x936   : > { %v2366_v0 = vpop.xlane.xlu0 %2365 }
 0x937   : > { %v2375_v35 = vadd.f32 1e-12, %v2371_v18  ;;  %v2372_v11 = vmul.f32 0.0078125, %v2366_v0  ;;  %v4265_v18 = vld [vmem:[%s4837_s18 + $0xf8] sm:$0xff]  }
 0x938   : > { %v2368_v13 = vpop.xlane.xlu1 %2367  ;;  %v4266_v0 = vld [vmem:[%s4837_s18 + $0x38] sm:$0xff]  }
 0x939   : > { %4332 = vrsqrt.f32 %v2375_v35  ;;  %v2376_v48 = vadd.f32 1e-12, %v2372_v11  ;;  %v2373_v16 = vmul.f32 0.0078125, %v2368_v13  ;;  %v4267_v35 = vld [vmem:[%s4837_s18 + $0xb8] sm:$0xff]   ;;  %v2441_v11 = vld [vmem:[%s4885_s19] sm:$0xf] }
 0x93a   : > { %v2457_v13 = vsub.s32 3, %v4951_v20 }
 0x93b   : > { %4334 = vrsqrt.f32 %v2376_v48  ;;  %v2377_v58 = vadd.f32 1e-12, %v2373_v16  ;;  %v5384_v48 = vrot.slane %v2441_v11, %v917_v21  ;;  %v5388_v16 = vrot.slane %v2441_v11, %v925_v55 }
 0x93c   : > { %v2370_v17 = vpop.xlane.xlu0 %2369 }
 0x93d   : > { %4336 = vrsqrt.f32 %v2377_v58  ;;  %v2374_v19 = vmul.f32 0.0078125, %v2370_v17  ;;  %v5392_v58 = vrot.slane %v2441_v11, %v921_v23  ;;  %v5394_v17 = vrot.slane %v2441_v11, %v2457_v13 }
 0x93f   : > { %v2378_v22 = vadd.f32 1e-12, %v2374_v19 }
 0x941   : > { %4338 = vrsqrt.f32 %v2378_v22 }
 0x943   : > { %v4333_v25 = vpop.eup %4332 }
 0x944   : > { %v2383_v54 = vmul.f32 %v4333_v25, %v5280_v41 }
 0x945   : > { %v4335_v27 = vpop.eup %4334 }
 0x946   : > { %v2384_v28 = vmul.f32 %v4335_v27, %v5282_v45  ;;  %v2393_v30 = vmul.f32 %v3702_v51, %v2383_v54 }
 0x947   : > { %v4337_v31 = vpop.eup %4336 }
 0x948   : > { %v2394_v34 = vmul.f32 %v3702_v51, %v2384_v28  ;;  %v5332_v36 = vadd.f32 %v3703_v2, %v2393_v30  ;;  %v2385_v9 = vmul.f32 %v4337_v31, %v5286_v44 }
 0x94a   : > { %v5334_v42 = vadd.f32 %v3703_v2, %v2394_v34  ;;  %v2395_v43 = vmul.f32 %v3702_v51, %v2385_v9 }
 0x94b   : > { %v4339_v41 = vpop.eup %4338 }
 0x94c   : > { %v2407_v45 = vpack.c.bf16 %v5334_v42, %v5332_v36  ;;  %v2386_v33 = vmul.f32 %v4339_v41, %v5292_v49  ;;  %v5344_v26 = vadd.f32 %v3703_v2, %v2395_v43  ;;  %v4237_v49 = vld [vmem:[%s4837_s18 + $0xc0] sm:$0xff]  }
 0x94d   : > { %3868 = vmatprep.subr.bf16.mxu1 %v4237_v49 }
 0x94e   : > { %2656 = vmatmul.mubr.bf16.vlgmr.msra.gmra.mrb[44].mxu0 %v2407_v45  ;;  %2709 = vmatmul.mubr.bf16.vlgmr.msra.gmra.mrb[36].mxu1 %v2407_v45  ;;  %v2396_v46 = vmul.f32 %v3702_v51, %v2386_v33 }
 0x94f   : > { %2665 = vmatprep.mubr.bf16.mxu0 %v4562_v53  ;;  %2718 = vmatprep.mubr.bf16.mxu1 %v4562_v53  ;;  %v4240_v53 = vld [vmem:[%s4837_s18 + $0x48] sm:$0xff]  }
 0x950   : > { %v5342_v44 = vadd.f32 %v3703_v2, %v2396_v46  ;;  %3841 = vmatpush3.bf16.msra.mxu0 %v4238_v52  ;;  %3869 = vmatpush3.bf16.msra.mxu1 %v4239_v56 }
 0x951   : > { %3842 = vmatprep.subr.bf16.mxu0 %v4240_v53  ;;  %3870 = vmatprep.subr.bf16.mxu1 %v4241_v29 }
 0x952   : > { %v2408_v14 = vpack.c.bf16 %v5342_v44, %v5344_v26 }
 0x954   : > { %3843 = vmatpush3.bf16.msra.mxu0 %v4242_v5  ;;  %3871 = vmatpush3.bf16.msra.mxu1 %v4243_v57 }
 0x955   : > { %3844 = vmatprep.subr.bf16.mxu0 %v4244_v12  ;;  %3872 = vmatprep.subr.bf16.mxu1 %v4245_v24 }
 0x956   : > { %2666 = vmatmul.mubr.bf16.gmra.mrb[48].mxu0 %v2408_v14  ;;  %2719 = vmatmul.mubr.bf16.gmra.mrb[40].mxu1 %v2408_v14 }
 0x958   : > { %3845 = vmatpush3.bf16.msra.mxu0 %v4246_v38  ;;  %3873 = vmatpush3.bf16.msra.mxu1 %v4247_v59 }
 0x959   : > { %3846 = vmatprep.subr.bf16.mxu0 %v4248_v32  ;;  %3874 = vmatprep.subr.bf16.mxu1 %v4249_v39 }
 0x95c   : > { %3847 = vmatpush3.bf16.msra.mxu0 %v4250_v61  ;;  %3875 = vmatpush3.bf16.msra.mxu1 %v4251_v50 }
 0x95d   : > { %3848 = vmatprep.subr.bf16.mxu0 %v4252_v62  ;;  %3876 = vmatprep.subr.bf16.mxu1 %v4253_v63 }
 0x960   : > { %3849 = vmatpush3.bf16.msra.mxu0 %v4254_v15  ;;  %3877 = vmatpush3.bf16.msra.mxu1 %v4255_v1 }
 0x961   : > { %3850 = vmatprep.subr.bf16.mxu0 %v4256_v3  ;;  %3878 = vmatprep.subr.bf16.mxu1 %v4257_v4 }
 0x964   : > { %3851 = vmatpush3.bf16.msra.mxu0 %v4258_v7  ;;  %3879 = vmatpush3.bf16.msra.mxu1 %v4259_v60 }
 0x965   : > { %3852 = vmatprep.subr.bf16.mxu0 %v4260_v6  ;;  %3880 = vmatprep.subr.bf16.mxu1 %v4261_v37 }
 0x968   : > { %3853 = vmatpush3.bf16.msra.mxu0 %v4262_v8  ;;  %3881 = vmatpush3.bf16.msra.mxu1 %v4263_v40 }
 0x969   : > { %3854 = vmatprep.subr.bf16.mxu0 %v4264_v10  ;;  %3882 = vmatprep.subr.bf16.mxu1 %v4265_v18 }
 0x96c   : > { %3855 = vmatpush3.bf16.msra.mxu0 %v4266_v0  ;;  %3883 = vmatpush3.bf16.msra.mxu1 %v4267_v35 }
 0xa21   : > { %v2657_v19 = vpop.f32.mrb[44].mxu0  ;;  %v2710_v22 = vpop.f32.mrb[36].mxu1 }
 0xa22   : > { %v5397_v25 = vadd.f32 %v2657_v19, %v5384_v48  ;;  %v5400_v51 = vadd.f32 %v2710_v22, %v5388_v16  ;;  %v2659_v21 = vpop.f32.mrb[45].mxu0  ;;  %v2712_v54 = vpop.f32.mrb[37].mxu1 }
 0xa23   : > { %v5403_v27 = vadd.f32 %v2659_v21, %v5392_v58  ;;  %v5406_v55 = vadd.f32 %v2712_v54, %v5394_v17  ;;  %v2661_v20 = vpop.f32.mrb[46].mxu0  ;;  %v2714_v23 = vpop.f32.mrb[38].mxu1 }
 0xa24   : > { %v2729_v28 = vmul.f32 %v5397_v25, %v5397_v25  ;;  %v2731_v30 = vmul.f32 %v5400_v51, %v5400_v51  ;;  %v5413_v31 = vadd.f32 %v2661_v20, %v5384_v48  ;;  %v5416_v2 = vadd.f32 %v2714_v23, %v5388_v16  ;;  %v2663_v34 = vpop.f32.mrb[47].mxu0  ;;  %v2716_v9 = vpop.f32.mrb[39].mxu1 }
 0xa25   : > { %v2730_v41 = vmul.f32 %v5403_v27, %v5403_v27  ;;  %v2732_v45 = vmul.f32 %v5406_v55, %v5406_v55  ;;  %v5423_v33 = vadd.f32 %v2663_v34, %v5392_v58  ;;  %v5426_v43 = vadd.f32 %v2716_v9, %v5394_v17 }
 0xa26   : > { %v2745_v46 = vmul.f32 %v2729_v28, %v5397_v25  ;;  %v2747_v14 = vmul.f32 %v2731_v30, %v5400_v51  ;;  %v2733_v47 = vmul.f32 %v5413_v31, %v5413_v31  ;;  %v2735_v49 = vmul.f32 %v5416_v2, %v5416_v2 }
 0xa27   : > { %v2746_v52 = vmul.f32 %v2730_v41, %v5403_v27  ;;  %v2748_v56 = vmul.f32 %v2732_v45, %v5406_v55  ;;  %v2734_v53 = vmul.f32 %v5423_v33, %v5423_v33  ;;  %v2736_v29 = vmul.f32 %v5426_v43, %v5426_v43 }
 0xa28   : > { %v2761_v5 = vmul.f32 0.044715, %v2745_v46  ;;  %v2763_v57 = vmul.f32 0.044715, %v2747_v14  ;;  %v2749_v12 = vmul.f32 %v2733_v47, %v5413_v31  ;;  %v2751_v24 = vmul.f32 %v2735_v49, %v5416_v2 }
 0xa29   : > { %v2762_v38 = vmul.f32 0.044715, %v2746_v52  ;;  %v2764_v59 = vmul.f32 0.044715, %v2748_v56  ;;  %v2750_v32 = vmul.f32 %v2734_v53, %v5423_v33  ;;  %v2752_v39 = vmul.f32 %v2736_v29, %v5426_v43  ;;  %v2667_v61 = vpop.f32.mrb[48].mxu0  ;;  %v2720_v50 = vpop.f32.mrb[40].mxu1 }
 0xa2a   : > { %v2777_v62 = vadd.f32 %v2761_v5, %v5397_v25  ;;  %v2779_v63 = vadd.f32 %v2763_v57, %v5400_v51  ;;  %v2765_v15 = vmul.f32 0.044715, %v2749_v12  ;;  %v2767_v1 = vmul.f32 0.044715, %v2751_v24  ;;  %v2669_v3 = vpop.f32.mrb[49].mxu0  ;;  %v2722_v4 = vpop.f32.mrb[41].mxu1 }
 0xa2b   : > { %v2778_v7 = vadd.f32 %v2762_v38, %v5403_v27  ;;  %v2780_v60 = vadd.f32 %v2764_v59, %v5406_v55  ;;  %v2766_v6 = vmul.f32 0.044715, %v2750_v32  ;;  %v2768_v37 = vmul.f32 0.044715, %v2752_v39  ;;  %v2671_v8 = vpop.f32.mrb[50].mxu0  ;;  %v2724_v40 = vpop.f32.mrb[42].mxu1 }
 0xa2c   : > { %v2793_v10 = vmul.f32 0.7978846, %v2777_v62  ;;  %v2795_v18 = vmul.f32 0.7978846, %v2779_v63  ;;  %v2781_v0 = vadd.f32 %v2765_v15, %v5413_v31  ;;  %v2783_v35 = vadd.f32 %v2767_v1, %v5416_v2  ;;  %v2673_v11 = vpop.f32.mrb[51].mxu0  ;;  %v2726_v13 = vpop.f32.mrb[43].mxu1 }
 0xa2d   : > { %v2794_v19 = vmul.f32 0.7978846, %v2778_v7  ;;  %v2796_v22 = vmul.f32 0.7978846, %v2780_v60  ;;  %v2782_v21 = vadd.f32 %v2766_v6, %v5423_v33  ;;  %v2784_v54 = vadd.f32 %v2768_v37, %v5426_v43 }
 0xa2e   : > { %4340 = vtanh.f32 %v2793_v10  ;;  %v2797_v20 = vmul.f32 0.7978846, %v2781_v0  ;;  %v2799_v23 = vmul.f32 0.7978846, %v2783_v35  ;;  %v5453_v28 = vadd.f32 %v2667_v61, %v5384_v48 }
 0xa2f   : > { %4342 = vtanh.f32 %v2795_v18  ;;  %v2798_v30 = vmul.f32 0.7978846, %v2782_v21  ;;  %v2800_v34 = vmul.f32 0.7978846, %v2784_v54  ;;  %v5456_v9 = vadd.f32 %v2720_v50, %v5388_v16 }
 0xa30   : > { %4344 = vtanh.f32 %v2794_v19  ;;  %v2737_v41 = vmul.f32 %v5453_v28, %v5453_v28  ;;  %v5461_v45 = vadd.f32 %v2669_v3, %v5392_v58  ;;  %v5464_v46 = vadd.f32 %v2722_v4, %v5394_v17 }
 0xa31   : > { %4346 = vtanh.f32 %v2796_v22  ;;  %v2739_v14 = vmul.f32 %v5456_v9, %v5456_v9  ;;  %v5469_v47 = vadd.f32 %v2671_v8, %v5384_v48  ;;  %v5472_v49 = vadd.f32 %v2724_v40, %v5388_v16 }
 0xa32   : > { %4348 = vtanh.f32 %v2797_v20  ;;  %v2753_v52 = vmul.f32 %v2737_v41, %v5453_v28  ;;  %v2738_v56 = vmul.f32 %v5461_v45, %v5461_v45  ;;  %v2740_v53 = vmul.f32 %v5464_v46, %v5464_v46 }
 0xa33   : > { %4350 = vtanh.f32 %v2799_v23  ;;  %v2755_v29 = vmul.f32 %v2739_v14, %v5456_v9  ;;  %v2741_v5 = vmul.f32 %v5469_v47, %v5469_v47  ;;  %v2743_v48 = vmul.f32 %v5472_v49, %v5472_v49 }
 0xa34   : > { %4352 = vtanh.f32 %v2798_v30  ;;  %v2769_v16 = vmul.f32 0.044715, %v2753_v52  ;;  %v2754_v57 = vmul.f32 %v2738_v56, %v5461_v45  ;;  %v2756_v12 = vmul.f32 %v2740_v53, %v5464_v46 }
 0xa35   : > { %4354 = vtanh.f32 %v2800_v34  ;;  %v2771_v24 = vmul.f32 0.044715, %v2755_v29  ;;  %v2757_v38 = vmul.f32 %v2741_v5, %v5469_v47  ;;  %v2759_v59 = vmul.f32 %v2743_v48, %v5472_v49 }
 0xa36   : > { %v2785_v32 = vadd.f32 %v2769_v16, %v5453_v28  ;;  %v2770_v39 = vmul.f32 0.044715, %v2754_v57  ;;  %v2772_v61 = vmul.f32 0.044715, %v2756_v12  ;;  %v5490_v50 = vadd.f32 %v2673_v11, %v5392_v58 }
 0xa37   : > { %v2787_v62 = vadd.f32 %v2771_v24, %v5456_v9  ;;  %v2773_v63 = vmul.f32 0.044715, %v2757_v38  ;;  %v2775_v15 = vmul.f32 0.044715, %v2759_v59  ;;  %v5494_v1 = vadd.f32 %v2726_v13, %v5394_v17 }
 0xa38   : > { %v4341_v3 = vpop.eup %4340  ;;  %v2801_v4 = vmul.f32 0.7978846, %v2785_v32  ;;  %v2786_v7 = vadd.f32 %v2770_v39, %v5461_v45  ;;  %v2788_v60 = vadd.f32 %v2772_v61, %v5464_v46  ;;  %v2742_v6 = vmul.f32 %v5490_v50, %v5490_v50 }
 0xa39   : > { %v4343_v37 = vpop.eup %4342  ;;  %v2825_v8 = vadd.f32 1.0, %v4341_v3  ;;  %v2803_v58 = vmul.f32 0.7978846, %v2787_v62  ;;  %v2789_v40 = vadd.f32 %v2773_v63, %v5469_v47  ;;  %v2791_v10 = vadd.f32 %v2775_v15, %v5472_v49 }
 0xa3a   : > { %v4345_v18 = vpop.eup %4344  ;;  %v2827_v0 = vadd.f32 1.0, %v4343_v37  ;;  %4356 = vtanh.f32 %v2801_v4  ;;  %v2802_v17 = vmul.f32 0.7978846, %v2786_v7  ;;  %v2804_v35 = vmul.f32 0.7978846, %v2788_v60 }
 0xa3b   : > { %v4347_v11 = vpop.eup %4346  ;;  %v2841_v13 = vmul.f32 0.5, %v2825_v8  ;;  %4358 = vtanh.f32 %v2803_v58  ;;  %v2805_v19 = vmul.f32 0.7978846, %v2789_v40  ;;  %v2807_v22 = vmul.f32 0.7978846, %v2791_v10 }
 0xa3c   : > { %v4349_v21 = vpop.eup %4348  ;;  %v2843_v54 = vmul.f32 0.5, %v2827_v0  ;;  %4360 = vtanh.f32 %v2802_v17  ;;  %v2758_v20 = vmul.f32 %v2742_v6, %v5490_v50  ;;  %v2744_v23 = vmul.f32 %v5494_v1, %v5494_v1 }
 0xa3d   : > { %v4351_v30 = vpop.eup %4350  ;;  %v2857_v34 = vmul.f32 %v2841_v13, %v5397_v25  ;;  %v2829_v41 = vadd.f32 1.0, %v4349_v21  ;;  %4362 = vtanh.f32 %v2804_v35  ;;  %v2826_v14 = vadd.f32 1.0, %v4345_v18 }
 0xa3e   : > { %v4353_v52 = vpop.eup %4352  ;;  %v2859_v56 = vmul.f32 %v2843_v54, %v5400_v51  ;;  %v2831_v53 = vadd.f32 1.0, %v4351_v30  ;;  %4364 = vtanh.f32 %v2805_v19  ;;  %v2774_v29 = vmul.f32 0.044715, %v2758_v20 }
 0xa3f   : > { %v4355_v5 = vpop.eup %4354  ;;  %v2845_v48 = vmul.f32 0.5, %v2829_v41  ;;  %4366 = vtanh.f32 %v2807_v22  ;;  %v2760_v16 = vmul.f32 %v2744_v23, %v5494_v1  ;;  %v2830_v57 = vadd.f32 1.0, %v4353_v52 }
 0xa40   : > { %v2847_v12 = vmul.f32 0.5, %v2831_v53  ;;  %v2790_v24 = vadd.f32 %v2774_v29, %v5490_v50  ;;  %v2842_v38 = vmul.f32 0.5, %v2826_v14  ;;  %v2828_v25 = vadd.f32 1.0, %v4347_v11 }
 0xa41   : > { %v2861_v59 = vmul.f32 %v2845_v48, %v5413_v31  ;;  %v2776_v32 = vmul.f32 0.044715, %v2760_v16  ;;  %v2846_v39 = vmul.f32 0.5, %v2830_v57  ;;  %v2832_v61 = vadd.f32 1.0, %v4355_v5 }
 0xa42   : > { %v2863_v51 = vmul.f32 %v2847_v12, %v5416_v2  ;;  %v2806_v62 = vmul.f32 0.7978846, %v2790_v24  ;;  %v2858_v63 = vmul.f32 %v2842_v38, %v5403_v27  ;;  %v2844_v15 = vmul.f32 0.5, %v2828_v25  ;;  %v3736_v25 = vld [vmem:[%s787_s23] ss:$0 sm:$0xff] }
 0xa43   : > { %v2873_v3 = vpack.c.bf16 %v2861_v59, %v2857_v34  ;;  %v2792_v4 = vadd.f32 %v2776_v32, %v5494_v1  ;;  %v2862_v7 = vmul.f32 %v2846_v39, %v5423_v33  ;;  %v2848_v60 = vmul.f32 0.5, %v2832_v61 }
 0xa44   : > { %v4357_v6 = vpop.eup %4356  ;;  %v2875_v37 = vpack.c.bf16 %v2863_v51, %v2859_v56  ;;  %4368 = vtanh.f32 %v2806_v62  ;;  %v2860_v31 = vmul.f32 %v2844_v15, %v5406_v55 }
 0xa45   : > { %v4359_v8 = vpop.eup %4358  ;;  %v2808_v58 = vmul.f32 0.7978846, %v2792_v4  ;;  %v2874_v40 = vpack.c.bf16 %v2862_v7, %v2858_v63  ;;  %v2864_v2 = vmul.f32 %v2848_v60, %v5426_v43  ;;  %v2833_v10 = vadd.f32 1.0, %v4357_v6 }
 0xa46   : > { %v4361_v18 = vpop.eup %4360  ;;  %v2835_v27 = vadd.f32 1.0, %v4359_v8 }
 0xa47   : > { %v4363_v0 = vpop.eup %4362  ;;  %4370 = vtanh.f32 %v2808_v58  ;;  %3176 = vmatprep.mubr.bf16.mxu0 %v2874_v40  ;;  %v2876_v17 = vpack.c.bf16 %v2864_v2, %v2860_v31  ;;  %v2849_v13 = vmul.f32 0.5, %v2833_v10  ;;  %v2834_v22 = vadd.f32 1.0, %v4361_v18 }
 0xa48   : > { %v4365_v35 = vpop.eup %4364  ;;  %3177 = vmatmul.mubr.bf16.vlgmr.msra.gmra.mrb[52].mxu0 %v2873_v3  ;;  %v2851_v19 = vmul.f32 0.5, %v2835_v27  ;;  %v2836_v30 = vadd.f32 1.0, %v4363_v0 }
 0xa49   : > { %v4367_v33 = vpop.eup %4366  ;;  %3225 = vmatprep.mubr.bf16.mxu1 %v2876_v17  ;;  %v2837_v11 = vadd.f32 1.0, %v4365_v35  ;;  %v2865_v43 = vmul.f32 %v2849_v13, %v5453_v28  ;;  %v2850_v52 = vmul.f32 0.5, %v2834_v22 }
 0xa4a   : > { %3226 = vmatmul.mubr.bf16.vlgmr.msra.gmra.mrb[44].mxu1 %v2875_v37  ;;  %v2839_v55 = vadd.f32 1.0, %v4367_v33  ;;  %v2867_v34 = vmul.f32 %v2851_v19, %v5456_v9  ;;  %v2852_v16 = vmul.f32 0.5, %v2836_v30 }
 0xa4b   : > { %v2853_v21 = vmul.f32 0.5, %v2837_v11  ;;  %v2866_v57 = vmul.f32 %v2850_v52, %v5461_v45 }
 0xa4c   : > { %v2855_v54 = vmul.f32 0.5, %v2839_v55  ;;  %v2868_v24 = vmul.f32 %v2852_v16, %v5464_v46 }
 0xa4d   : > { %v2869_v20 = vmul.f32 %v2853_v21, %v5469_v47 }
 0xa4e   : > { %v4369_v23 = vpop.eup %4368  ;;  %v2871_v41 = vmul.f32 %v2855_v54, %v5472_v49 }
 0xa4f   : > { %v2838_v14 = vadd.f32 1.0, %v4369_v23  ;;  %v2877_v56 = vpack.c.bf16 %v2869_v20, %v2865_v43 }
 0xa50   : > { %v2879_v53 = vpack.c.bf16 %v2871_v41, %v2867_v34 }
 0xa51   : > { %v4371_v29 = vpop.eup %4370  ;;  %v2854_v5 = vmul.f32 0.5, %v2838_v14 }
 0xa52   : > { %v2840_v48 = vadd.f32 1.0, %v4371_v29 }
 0xa53   : > { %v2870_v28 = vmul.f32 %v2854_v5, %v5490_v50 }
 0xa54   : > { %v2856_v47 = vmul.f32 0.5, %v2840_v48 }
 0xa55   : > { %v2878_v12 = vpack.c.bf16 %v2870_v28, %v2866_v57 }
 0xa56   : > { %v2872_v9 = vmul.f32 %v2856_v47, %v5494_v1 }
 0xa57   : > { %3184 = vmatprep.mubr.bf16.mxu0 %v2878_v12  ;;  %v3769_v12 = vld [vmem:[%s790_s26] ss:$0 sm:$0xff] }
 0xa58   : > { %v2880_v49 = vpack.c.bf16 %v2872_v9, %v2868_v24  ;;  %3185 = vmatmul.mubr.bf16.gmra.mrb[56].mxu0 %v2877_v56 }
 0xa5a   : > { %3233 = vmatprep.mubr.bf16.mxu1 %v2880_v49  ;;  %v3770_v49 = vld [vmem:[%s793_s27] ss:$0 sm:$0xff]  ;;  %s5658_s27 = sld [smem:[#allocation29_spill]] (!%p3771_p8) }
 0xa5b   : > { %3234 = vmatmul.mubr.bf16.gmra.mrb[48].mxu1 %v2879_v53 }
 0xb1b   : > { %v3856_v38 = vpop.f32.mrb[52].mxu0 }
 0xb1c   : > { %v3857_v45 = vpop.f32.mrb[53].mxu0 }
 0xb1d   : > { %v3884_v59 = vpop.f32.mrb[44].mxu1  ;;  %v3858_v50 = vadd.f32 %v3857_v45, %v3856_v38  ;;  %v3859_v32 = vpop.f32.mrb[54].mxu0 }
 0xb1e   : > { %v3885_v39 = vpop.f32.mrb[45].mxu1  ;;  %v3860_v61 = vpop.f32.mrb[55].mxu0 }
 0xb1f   : > { %v3179_v46 = vadd.f32 %v3858_v50, %v3736_v25  ;;  %v3886_v51 = vadd.f32 %v3885_v39, %v3884_v59  ;;  %v3887_v1 = vpop.f32.mrb[46].mxu1  ;;  %v3861_v62 = vadd.f32 %v3860_v61, %v3859_v32 }
 0xb20   : > { %v3888_v63 = vpop.f32.mrb[47].mxu1 }
 0xb21   : > { %v3228_v15 = vadd.f32 %v3886_v51, %v3179_v46  ;;  %v3182_v3 = vadd.f32 %v3861_v62, %v3736_v25  ;;  %v3889_v4 = vadd.f32 %v3888_v63, %v3887_v1 }
 0xb23   : > { %v3231_v7 = vadd.f32 %v3889_v4, %v3182_v3  ;;  %v3242_v60 = vadd.f32 %v3228_v15, %v5332_v36 }
 0xb25   : > { %3248 = vadd.xlane.f32.xlu1 %v3242_v60  ;;  %v3243_v6 = vadd.f32 %v3231_v7, %v5334_v42 }
 0xb27   : > { %3250 = vadd.xlane.f32.xlu0 %v3243_v6 }
 0xb2b   : > { %v3862_v37 = vpop.f32.mrb[56].mxu0 }
 0xb2c   : > { %v3863_v31 = vpop.f32.mrb[57].mxu0 }
 0xb2d   : > { %v3864_v8 = vadd.f32 %v3863_v31, %v3862_v37  ;;  %v3865_v58 = vpop.f32.mrb[58].mxu0  ;;  %v4384_v37 = vld [vmem:[#allocation9] sm:$0xff] (!%p3771_p8)   ;;  %v4568_v31 = vmov (!%p3771_p8), 0.0  }
 0xb2e   : > { %v3890_v40 = vpop.f32.mrb[48].mxu1  ;;  %v3866_v2 = vpop.f32.mrb[59].mxu0  ;;  %4041 = vmatprep.subr.bf16.mxu0 (!%p3771_p8), %v4568_v31  ;;  %4057 = vmatprep.mubr.msk.bf16.mxu0 (!%p3771_p8), %vm4569_vm6, %v4568_v31 }
 0xb2f   : > { %v3187_v10 = vadd.f32 %v3864_v8, %v3736_v25  ;;  %v3891_v18 = vpop.f32.mrb[49].mxu1  ;;  %v3867_v27 = vadd.f32 %v3866_v2, %v3865_v58  ;;  %4042 = vmatpush3.bf16.msra.mxu0 (!%p3771_p8), %v4384_v37  ;;  %v4385_v8 = vld [vmem:[#allocation9 + $0x8] sm:$0xff] (!%p3771_p8)   ;;  %v4386_v58 = vld [vmem:[#allocation9 + $0x10] sm:$0xff] (!%p3771_p8)   ;;  %v4388_v2 = vld [vmem:[#allocation9 + $0x20] sm:$0xff] (!%p3771_p8)  }
 0xb30   : > { %v3892_v0 = vadd.f32 %v3891_v18, %v3890_v40  ;;  %v3893_v17 = vpop.f32.mrb[50].mxu1  ;;  %4043 = vmatprep.subr.bf16.mxu0 (!%p3771_p8), %v4568_v31  ;;  %v4387_v40 = vld [vmem:[#allocation9 + $0x18] sm:$0xff] (!%p3771_p8)  }
 0xb31   : > { %v3190_v35 = vadd.f32 %v3867_v27, %v3736_v25  ;;  %v3894_v33 = vpop.f32.mrb[51].mxu1  ;;  %v4390_v27 = vld [vmem:[#allocation9 + $0x30] sm:$0xff] (!%p3771_p8)  }
 0xb32   : > { %v3236_v11 = vadd.f32 %v3892_v0, %v3187_v10  ;;  %v3895_v13 = vadd.f32 %v3894_v33, %v3893_v17  ;;  %v4389_v10 = vld [vmem:[#allocation9 + $0x28] sm:$0xff] (!%p3771_p8)  }
 0xb33   : > { %4044 = vmatpush3.bf16.msra.mxu0 (!%p3771_p8), %v4385_v8 }
 0xb34   : > { %v3239_v36 = vadd.f32 %v3895_v13, %v3190_v35  ;;  %v3244_v55 = vadd.f32 %v3236_v11, %v5344_v26  ;;  %4045 = vmatprep.subr.bf16.mxu0 (!%p3771_p8), %v4568_v31  ;;  %v4391_v35 = vld [vmem:[#allocation9 + $0x38] sm:$0xff] (!%p3771_p8)   ;;  %v3772_v13 = vld [vmem:[%s5658_s27] ss:$0 sm:$0xff] (!%p3771_p8) }
 0xb36   : > { %3252 = vadd.xlane.f32.xlu1 %v3244_v55  ;;  %v3245_v42 = vadd.f32 %v3239_v36, %v5342_v44 }
 0xb37   : > { %4046 = vmatpush3.bf16.msra.mxu0 (!%p3771_p8), %v4386_v58 }
 0xb38   : > { %3254 = vadd.xlane.f32.xlu0 %v3245_v42  ;;  %4047 = vmatprep.subr.bf16.mxu0 (!%p3771_p8), %v4568_v31 }
 0xb3b   : > { %4048 = vmatpush3.bf16.msra.mxu0 (!%p3771_p8), %v4387_v40 }
 0xb3c   : > { %4049 = vmatprep.subr.bf16.mxu0 (!%p3771_p8), %v4568_v31 }
 0xb3f   : > { %4050 = vmatpush3.bf16.msra.mxu0 (!%p3771_p8), %v4388_v2 }
 0xb40   : > { %4051 = vmatprep.subr.bf16.mxu0 (!%p3771_p8), %v4568_v31 }
 0xb43   : > { %4052 = vmatpush3.bf16.msra.mxu0 (!%p3771_p8), %v4389_v10 }
 0xb44   : > { %4053 = vmatprep.subr.bf16.mxu0 (!%p3771_p8), %v4568_v31 }
 0xb47   : > { %4054 = vmatpush3.bf16.msra.mxu0 (!%p3771_p8), %v4390_v27 }
 0xb48   : > { %4055 = vmatprep.subr.bf16.mxu0 (!%p3771_p8), %v4568_v31 }
 0xb4b   : > { %4056 = vmatpush3.bf16.msra.mxu0 (!%p3771_p8), %v4391_v35 }
 0xbb2   : > { %v3249_v19 = vpop.xlane.xlu1 %3248 }
 0xbb3   : > { %v3256_v22 = vmul.f32 0.0078125, %v3249_v19 }
 0xbb4   : > { %v3251_v21 = vpop.xlane.xlu0 %3250 }
 0xbb5   : > { %v3260_v54 = vsub.f32 %v3242_v60, %v3256_v22  ;;  %v3257_v43 = vmul.f32 0.0078125, %v3251_v21 }
 0xbb7   : > { %v3261_v20 = vsub.f32 %v3243_v6, %v3257_v43  ;;  %v3264_v23 = vmul.f32 %v3260_v54, %v3260_v54 }
 0xbb9   : > { %3268 = vadd.xlane.f32.xlu1 %v3264_v23  ;;  %v3265_v30 = vmul.f32 %v3261_v20, %v3261_v20 }
 0xbbb   : > { %3270 = vadd.xlane.f32.xlu0 %v3265_v30 }
 0xbc3   : > { %v3253_v34 = vpop.xlane.xlu1 %3252 }
 0xbc4   : > { %v3258_v41 = vmul.f32 0.0078125, %v3253_v34 }
 0xbc5   : > { %v3255_v14 = vpop.xlane.xlu0 %3254 }
 0xbc6   : > { %v3262_v52 = vsub.f32 %v3244_v55, %v3258_v41  ;;  %v3259_v26 = vmul.f32 0.0078125, %v3255_v14 }
 0xbc8   : > { %v3263_v56 = vsub.f32 %v3245_v42, %v3259_v26  ;;  %v3266_v53 = vmul.f32 %v3262_v52, %v3262_v52 }
 0xbca   : > { %3272 = vadd.xlane.f32.xlu1 %v3266_v53  ;;  %v3267_v44 = vmul.f32 %v3263_v56, %v3263_v56 }
 0xbcc   : > { %3274 = vadd.xlane.f32.xlu0 %v3267_v44 }
 0xc46   : > { %v3269_v29 = vpop.xlane.xlu1 %3268 }
 0xc47   : > { %v3276_v5 = vmul.f32 0.0078125, %v3269_v29 }
 0xc48   : > { %v3271_v48 = vpop.xlane.xlu0 %3270 }
 0xc49   : > { %v3280_v16 = vadd.f32 1e-12, %v3276_v5  ;;  %v3277_v57 = vmul.f32 0.0078125, %v3271_v48 }
 0xc4b   : > { %4372 = vrsqrt.f32 %v3280_v16  ;;  %v3281_v28 = vadd.f32 1e-12, %v3277_v57 }
 0xc4d   : > { %4374 = vrsqrt.f32 %v3281_v28 }
 0xc55   : > { %v4373_v47 = vpop.eup %4372 }
 0xc56   : > { %v3288_v24 = vmul.f32 %v4373_v47, %v3260_v54 }
 0xc57   : > { %v4375_v9 = vpop.eup %4374  ;;  %v3273_v38 = vpop.xlane.xlu1 %3272 }
 0xc58   : > { %v3298_v25 = vmul.f32 %v3769_v12, %v3288_v24  ;;  %v3289_v45 = vmul.f32 %v4375_v9, %v3261_v20  ;;  %v3278_v59 = vmul.f32 0.0078125, %v3273_v38 }
 0xc59   : > { %v3275_v50 = vpop.xlane.xlu0 %3274 }
 0xc5a   : > { %v3308_v32 = vadd.f32 %v3770_v49, %v3298_v25  ;;  %v3299_v39 = vmul.f32 %v3769_v12, %v3289_v45  ;;  %v3282_v61 = vadd.f32 1e-12, %v3278_v59  ;;  %v3279_v46 = vmul.f32 0.0078125, %v3275_v50 }
 0xc5c   : > { %3312 = vst [vmem:[#allocation2] sm:$0xff] %v3308_v32  ;;  %v3309_v51 = vadd.f32 %v3770_v49, %v3299_v39  ;;  %4376 = vrsqrt.f32 %v3282_v61  ;;  %v3283_v1 = vadd.f32 1e-12, %v3279_v46 }
 0xc5e   : > { %3313 = vst [vmem:[#allocation2 + $0x8] sm:$0xff] %v3309_v51  ;;  %4378 = vrsqrt.f32 %v3283_v1 }
 0xc63   : > { %v3320_v17 = vld [vmem:[#allocation2] sm:$0x1] (!%p3771_p8) }
 0xc66   : > { %v4377_v62 = vpop.eup %4376 }
 0xc67   : > { %v3290_v63 = vmul.f32 %v4377_v62, %v3262_v52 }
 0xc68   : > { %v4379_v15 = vpop.eup %4378 }
 0xc69   : > { %v3300_v3 = vmul.f32 %v3769_v12, %v3290_v63  ;;  %v3291_v4 = vmul.f32 %v4379_v15, %v3263_v56  ;;  %3319 = sbr.rel (%p3771_p8) target bundleno = 3409 (0xd51), region = 112 }
 0xc6b   : > { %v3310_v7 = vadd.f32 %v3770_v49, %v3300_v3  ;;  %v3301_v60 = vmul.f32 %v3769_v12, %v3291_v4 }
 0xc6d   : > { %3314 = vst [vmem:[#allocation2 + $0x10] sm:$0xff] %v3310_v7  ;;  %v3311_v6 = vadd.f32 %v3770_v49, %v3301_v60 }
 0xc6f   : > { %3315 = vst [vmem:[#allocation2 + $0x18] sm:$0xff] %v3311_v6 }
 0xc74   : > { %v3321_v18 = vld [vmem:[#allocation2 + $0x10] sm:$0x1] }
 0xc75   : > { %v3323_v0 = vrot.slane %v3321_v18, 7 }
 0xc77   : > { %v3326_v33 = vsel %vm3325_vm7, %v3320_v17, %v3323_v0 }
 0xc78   : > { %v3327_v11 = vpack.c.bf16 %v3326_v33, %v3326_v33 }
 0xc7a   : > { %4058 = vmatmul.mubr.bf16.vlgmr.msra.gmra.mrb[0].mxu0 %v3327_v11 }
 0xd4d   : > { %v3433_v36 = vpop.f32.mrb[0].mxu0 }
 0xd4e   : > { %v3434_v55 = vadd.f32 %v3772_v13, %v3433_v36  ;;  %v4059_v42 = vpop.f32.mrb[1].mxu0 }
 0xd4f   : > { %v3436_v19 = vpop.f32.mrb[2].mxu0 }
 0xd50   : > { %3439 = vst [vmem:[#allocation10] sm:$0x3] %v3434_v55  ;;  %v4060_v22 = vpop.f32.mrb[3].mxu0 }
 0xd51 PF: > { %p4091_p12 = scmp.eq.s32.totalorder %s4685_s0, 1  ;;  %s4570_s12 = smov [#allocation10]  }
 0xd52   : > { %s3447_s16 = sshll.u32 %s4570_s12, 4  ;;  %s3448_s16 = int_to_ptr.vmem [resolvable:$true] %s3447_s16 }
 0xd53   : > { %s4480_s2 = scalar_lea.vmem %s3448_s16, 32  ;;  %p4487_p3 = scmp.lt.s32.totalorder %s3448_s16, %s3448_s16 }
 0xd54   : > { %p4481_p0 = scmp.ne.s32.totalorder %s3448_s16, %s4480_s2  ;;  %p4488_p1 = scmp.lt.s32.totalorder %s4480_s2, %s4480_s2 }
 0xd56   : > { %p4482_p2 = pnand %p4481_p0, %p4091_p12  ;;  %p4489_p4 = por %p4488_p1, %p4487_p3 }
 0xd58   : > { %p4483_p13 = pneg %p4482_p2 }
 0xd5a   : > { %p4490_p11 = pnand %p4489_p4, %p4483_p13 }
 0xd5c   : > { %4493 = shalt.err (!%p4490_p11)
}
 0xd5d   : > { %s5659_s20 = sld [smem:[#allocation30_spill]] }
 0xd63   : > { %s4494_s21 = scalar_lea.hbm %s5659_s20, 32 }
 0xd64   : > { %p4495_p7 = scmp.ne.s32.totalorder %s5659_s20, %s4494_s21  ;;  %p4500_p6 = scmp.lt.u32.totalorder %s4494_s21, %s5659_s20 }
 0xd66   : > { %p4496_p10 = pnand %p4495_p7, %p4091_p12 }
 0xd68   : > { %p4497_p5 = pneg %p4496_p10 }
 0xd6a   : > { %p4502_p9 = pnand %p4500_p6, %p4497_p5 }
 0xd6c   : > { %4505 = shalt.err (!%p4502_p9)
}
 0xd6d   : > { %4074 = dma.vmem_to_hbm [thread:$0]  (%p4091_p12), %s3448_s16, 32, %s5659_s20, [#allocation6]  }
 0xd6e   : > { %4535 = dma.done.wait (%p4091_p12), [#allocation6], 32  }
 0xd6f   : > { %4537 = vsyncadd (%p4091_p12), [#allocation6], 4294967264 }
 0xd70 PF: > { %s5660_s30 = sld [smem:[#allocation16_spill]]  ;;  %s5661_s4 = sld [smem:[#allocation15_spill]] }
 0xd71   : > { %s5662_s29 = sld [smem:[#allocation17_spill]]  ;;  %s5663_s27 = smov %s4544_s28 }
 0xd76   : > { %p32_p8 = scmp.ge.s32.totalorder %s5660_s30, 4   ;;  %s5664_s28 = smov %s5661_s4 }
 0xd78   :  { %34 = sbr.rel (!%p32_p8) target bundleno = 20 (0x14), region = 185 }
 0xd7f   :  { %3460 = vsyncpa [#allocation5], 1 }
 0xd80   :  { %3462 = vsyncpa [#allocation5 + $0x1], 1 }
 0xd81   :  { %3463 = vsyncpa [#allocation8], 1 }
 0xd82   :  { %3465 = vsyncpa [#allocation8 + $0x1], 1 }
 0xd83   :  { %3466 = vsyncpa [#allocation6], 1 }
 0xd84   :  { %3468 = vsyncpa [#allocation6 + $0x1], 1 }

</bundles_post_ra>
